<compile_context>
chip_gen: v5e
topology: v5e:2x2
jax: 0.10.0
libtpu: 0.0.40
codegen_flags: <defaults>
</compile_context>

<pallas_src>
import math

import jax
import jax.numpy as jnp
from jax.experimental import pallas as pl
from jax.experimental.pallas import tpu as pltpu


# --------------------------------------------------------------------------- #
# Hardware / sizing helpers
# --------------------------------------------------------------------------- #
def _physical_vmem_bytes():
    """Best-effort physical VMEM per core; conservative fallback = 64 MiB (v7x)."""
    try:
        info = pltpu.get_tpu_info()
        for name in ("vmem_capacity_bytes", "vmem_size_bytes", "vmem_bytes"):
            v = getattr(info, name, None)
            if v:
                return int(v)
    except Exception:
        pass
    return 64 << 20


def _round_up(x, mult):
    return ((x + mult - 1) // mult) * mult


def _est_vmem_bytes(tm, n_out, T, C, out_bytes):
    out_blk = n_out * 2 * T * tm * tm * out_bytes   # double-buffered output blocks
    operands = 2 * 2 * tm * C * 4                   # double-buffered row/col slabs
    temps = 6 * tm * tm * 4                         # transient f32 working set (per-t unroll)
    return out_blk + operands + temps


def _choose_tile(M_pad, B, n_out, T, C, out_bytes, limit_cap):
    tm = 128
    for cand in (512, 384, 256, 128):
        if M_pad % cand == 0 and _est_vmem_bytes(cand, n_out, T, C, out_bytes) <= limit_cap:
            tm = cand
            break
    # v7x megacore: keep >= 2 grid steps so both TensorCores get work.
    if B * (M_pad // tm) ** 2 < 2:
        for cand in (256, 128):
            if cand < tm and M_pad % cand == 0:
                tm = cand
                break
    return tm


# --------------------------------------------------------------------------- #
# Kernel
# --------------------------------------------------------------------------- #
def _make_kernel(apply_tanh, predict_uncertainty, T, bf16_math):
    """One (batch, row-tile, col-tile) grid step.

    pr_ref: (1, TM, C)  pre-projected row operand (row index on sublanes)
    pc_ref: (1, C, TM)  pre-projected col operand (col index on lanes)
    C = T (mu-only) or 2*T (mu channels [0:T], clipped logvar channels [T:2T]).
    """
    cdt = jnp.bfloat16 if bf16_math else jnp.float32

    if predict_uncertainty:
        def kernel(pr_ref, pc_ref, mu_ref, lv_ref):
            pr = pr_ref[0]                                   # [TM, 2T]
            pc = pc_ref[0]                                   # [2T, TM]
            for t in range(T):                               # static unroll, T small
                # --- mu channel t: pairwise difference (+ optional tanh)
                d = pr[:, t:t + 1] - pc[t:t + 1, :]          # [TM, TM]
                if apply_tanh:
                    d = jnp.tanh(d.astype(cdt))
                mu_ref[0, t] = d.astype(mu_ref.dtype)
                # --- logvar channel t: stable logaddexp of pre-clipped logvars
                a = pr[:, T + t:T + t + 1]                   # [TM, 1]
                b = pc[T + t:T + t + 1, :]                   # [1, TM]
                m = jnp.maximum(a, b)                        # [TM, TM], f32
                r = jnp.abs(a - b).astype(cdt)
                lv = m + jnp.log1p(jnp.exp(-r)).astype(jnp.float32)
                lv_ref[0, t] = lv.astype(lv_ref.dtype)
        return kernel

    def kernel(pr_ref, pc_ref, mu_ref):
        pr = pr_ref[0]                                       # [TM, T]
        pc = pc_ref[0]                                       # [T, TM]
        for t in range(T):
            d = pr[:, t:t + 1] - pc[t:t + 1, :]
            if apply_tanh:
                d = jnp.tanh(d.astype(cdt))
            mu_ref[0, t] = d.astype(mu_ref.dtype)
    return kernel


# --------------------------------------------------------------------------- #
# Wrapper
# --------------------------------------------------------------------------- #
def pose_head_forward(z, w_mu, w_logvar=None, b_logvar=None, *,
                      apply_tanh=False, predict_uncertainty=False,
                      min_logvar=-14.0, max_logvar=2.0,
                      out_dtype=jnp.float32, out_layout="BTMM",
                      tile_m=None, bf16_math=None):
    """
    z:        [B, M, D] float32
    w_mu:     [T, D]             (nn.Linear weight, y = z @ w_mu.T)
    w_logvar: [T, D], b_logvar: [T]   (only if predict_uncertainty)
    out_layout: "BTMM" (default) -> kernel-native (B, T, M, M), no extra HBM pass;
                "BMMT"           -> PyTorch (B, M, M, T) layout (wrapper transpose).
    returns (mu_dT, logvar_dT-or-None)
    """
    B, M, D = z.shape
    T = int(w_mu.shape[0])
    n_out = 2 if predict_uncertainty else 1
    C = n_out * T
    out_bytes = jnp.dtype(out_dtype).itemsize
    if bf16_math is None:
        # bf16 transcendentals pay off once bf16 stores shrink write time
        # (v6e/v7x EUP supports bf16; on v5e it is a harmless upcast).
        bf16_math = (jnp.dtype(out_dtype) == jnp.dtype(jnp.bfloat16))

    phys_vmem = _physical_vmem_bytes()
    limit_cap = max(phys_vmem - (8 << 20), 24 << 20)     # never request > physical

    # Pad M to a lane-dense multiple (and of the requested tile, if any).
    if tile_m is not None:
        assert tile_m % 128 == 0, "tile_m must be a multiple of 128"
        TM = int(tile_m)
        M_pad = _round_up(M, TM)
    else:
        M_pad = _round_up(M, 128)
        TM = _choose_tile(M_pad, B, n_out, T, C, out_bytes, limit_cap)
    nIJ = M_pad // TM

    zf = z.astype(jnp.float32)
    if M_pad != M:
        zf = jnp.pad(zf, ((0, 0), (0, M_pad - M), (0, 0)))

    # Wrapper-side projection (tiny: O(B*M*D*T) vs the O(T*M^2) output),
    # pre-oriented so the kernel needs no MXU push and no cross-lane relayout.
    mu_p = zf @ w_mu.astype(jnp.float32).T                         # (B, M_pad, T)
    if predict_uncertainty:
        lv_p = jnp.clip(zf @ w_logvar.astype(jnp.float32).T
                        + b_logvar.astype(jnp.float32),
                        min_logvar, max_logvar)                    # (B, M_pad, T)
        p_row = jnp.concatenate([mu_p, lv_p], axis=-1)             # (B, M_pad, 2T)
    else:
        p_row = mu_p                                               # (B, M_pad, T)
    p_col = jnp.transpose(p_row, (0, 2, 1))                        # (B, C, M_pad)

    kernel = _make_kernel(apply_tanh, predict_uncertainty, T, bf16_math)

    in_specs = [
        pl.BlockSpec((1, TM, C), lambda b, i, j: (b, i, 0)),       # row slab
        pl.BlockSpec((1, C, TM), lambda b, i, j: (b, 0, j)),       # col slab
    ]
    out_shapes = [jax.ShapeDtypeStruct((B, T, M_pad, M_pad), out_dtype)]
    out_specs = [pl.BlockSpec((1, T, TM, TM), lambda b, i, j: (b, 0, i, j))]
    if predict_uncertainty:
        out_shapes.append(jax.ShapeDtypeStruct((B, T, M_pad, M_pad), out_dtype))
        out_specs.append(pl.BlockSpec((1, T, TM, TM), lambda b, i, j: (b, 0, i, j)))

    vmem_est = _est_vmem_bytes(TM, n_out, T, C, out_bytes)
    vmem_limit = int(min(max(vmem_est + (12 << 20), 32 << 20), limit_cap))

    outs = pl.pallas_call(
        kernel,
        grid=(B, nIJ, nIJ),
        in_specs=in_specs,
        out_specs=tuple(out_specs),
        out_shape=tuple(out_shapes),
        compiler_params=pltpu.CompilerParams(
            dimension_semantics=("parallel", "parallel", "parallel"),
            vmem_limit_bytes=vmem_limit),
    )(p_row, p_col)

    def _finish(x):
        if M_pad != M:
            x = x[:, :, :M, :M]
        if out_layout == "BMMT":        # PyTorch layout: pure glue, extra HBM pass
            x = jnp.transpose(x, (0, 2, 3, 1))
        return x

    mu_dT = _finish(outs[0])
    if not predict_uncertainty:
        return mu_dT, None
    return mu_dT, _finish(outs[1])


# --------------------------------------------------------------------------- #
# Pure-JAX reference (mirrors the PyTorch forward)
# --------------------------------------------------------------------------- #
def pose_head_ref(z, w_mu, w_logvar, b_logvar, *, apply_tanh, predict_uncertainty,
                  min_logvar=-14.0, max_logvar=2.0):
    mu_z = z @ w_mu.T                                       # [B, M, T]
    mu_dT = mu_z[:, :, None, :] - mu_z[:, None, :, :]       # [B, M, M, T]
    if apply_tanh:
        mu_dT = jnp.tanh(mu_dT)
    if not predict_uncertainty:
        return mu_dT, None
    raw_lv = jnp.clip(z @ w_logvar.T + b_logvar, min_logvar, max_logvar)
    logvar_dT = jnp.logaddexp(raw_lv[:, :, None, :], raw_lv[:, None, :, :])
    return mu_dT, logvar_dT


if __name__ == "__main__":
    B, M, D, T = 2, 8, 32, 6  # batch, tokens, embed_dim, num_targets

    key = jax.random.PRNGKey(0)
    kz, kmu, klv, kz2 = jax.random.split(key, 4)
    z = jax.random.normal(kz, (B, M, D), dtype=jnp.float32)

    # Deterministic synthetic parameters (the module zero-inits these; use small
    # random values so the kernel computation is non-trivial).
    w_mu = 0.1 * jax.random.normal(kmu, (T, D), dtype=jnp.float32)
    w_logvar = 0.1 * jax.random.normal(klv, (T, D), dtype=jnp.float32)
    b_logvar = jnp.full((T,), math.log(0.1 ** 2) * 0.5, dtype=jnp.float32)

    mu_ref, lv_ref = pose_head_ref(z, w_mu, w_logvar, b_logvar,
                                   apply_tanh=True, predict_uncertainty=True)
    mu_ref_t = jnp.transpose(mu_ref, (0, 3, 1, 2))
    lv_ref_t = jnp.transpose(lv_ref, (0, 3, 1, 2))

    # 1) default path: tanh + uncertainty, kernel-native (B, T, M, M) layout
    mu_n, lv_n = jax.block_until_ready(
        pose_head_forward(z, w_mu, w_logvar, b_logvar,
                          apply_tanh=True, predict_uncertainty=True))
    assert mu_n.shape == (B, T, M, M) and lv_n.shape == (B, T, M, M)
    assert jnp.allclose(mu_n, mu_ref_t, atol=1e-5, rtol=1e-4)
    assert jnp.allclose(lv_n, lv_ref_t, atol=1e-5, rtol=1e-4)

    # 2) PyTorch (B, M, M, T) layout (optional wrapper glue)
    mu_t, lv_t = jax.block_until_ready(
        pose_head_forward(z, w_mu, w_logvar, b_logvar,
                          apply_tanh=True, predict_uncertainty=True,
                          out_layout="BMMT"))
    assert mu_t.shape == (B, M, M, T) and lv_t.shape == (B, M, M, T)
    assert jnp.allclose(mu_t, mu_ref, atol=1e-5, rtol=1e-4)
    assert jnp.allclose(lv_t, lv_ref, atol=1e-5, rtol=1e-4)

    # 3) bf16 stores + bf16 transcendentals (compute skeleton stays f32)
    mu_b, lv_b = jax.block_until_ready(
        pose_head_forward(z, w_mu, w_logvar, b_logvar,
                          apply_tanh=True, predict_uncertainty=True,
                          out_dtype=jnp.bfloat16))
    assert jnp.allclose(mu_b.astype(jnp.float32), mu_ref_t, atol=5e-2, rtol=2e-2)
    assert jnp.allclose(lv_b.astype(jnp.float32), lv_ref_t, atol=5e-2, rtol=2e-2)

    # 4) mu-only path (no tanh, no uncertainty)
    mu_only, none_lv = pose_head_forward(z, w_mu, apply_tanh=False,
                                         predict_uncertainty=False)
    mu_only = jax.block_until_ready(mu_only)
    mu_only_ref, _ = pose_head_ref(z, w_mu, None, None,
                                   apply_tanh=False, predict_uncertainty=False)
    assert none_lv is None
    assert jnp.allclose(mu_only, jnp.transpose(mu_only_ref, (0, 3, 1, 2)),
                        atol=1e-5, rtol=1e-4)

    # 5) multi-tile path: M=256 with tile_m=128 (lane-dense, 2x2x2 parallel grid)
    M2 = 256
    z2 = jax.random.normal(kz2, (B, M2, D), dtype=jnp.float32)
    mu2, lv2 = jax.block_until_ready(
        pose_head_forward(z2, w_mu, w_logvar, b_logvar,
                          apply_tanh=True, predict_uncertainty=True,
                          tile_m=128))
    mu2_ref, lv2_ref = pose_head_ref(z2, w_mu, w_logvar, b_logvar,
                                     apply_tanh=True, predict_uncertainty=True)
    assert jnp.allclose(mu2, jnp.transpose(mu2_ref, (0, 3, 1, 2)), atol=1e-5, rtol=1e-4)
    assert jnp.allclose(lv2, jnp.transpose(lv2_ref, (0, 3, 1, 2)), atol=1e-5, rtol=1e-4)

    print("KERNEL_OK")
</pallas_src>

<mosaic_0001>
module attributes {stable_mosaic.version = 11 : i64} {
  func.func @kernel(%arg0: i32, %arg1: i32, %arg2: i32, %arg3: memref<1x128x12xf32, #tpu.memory_space<vmem>>, %arg4: memref<1x12x128xf32, #tpu.memory_space<vmem>>, %arg5: memref<1x6x128x128xf32, #tpu.memory_space<vmem>>, %arg6: memref<1x6x128x128xf32, #tpu.memory_space<vmem>>) attributes {dimension_semantics = [#tpu.dimension_semantics<parallel>, #tpu.dimension_semantics<parallel>, #tpu.dimension_semantics<parallel>], iteration_bounds = array<i64: 2, 1, 1>, scalar_prefetch = 0 : i64, scratch_operands = 0 : i64, tpu.core_type = #tpu.core_type<tc>, window_params = [{transform_indices = @transform_0, window_bounds = array<i64: 1, 128, 12>}, {transform_indices = @transform_1, window_bounds = array<i64: 1, 12, 128>}, {transform_indices = @transform_2, window_bounds = array<i64: 1, 6, 128, 128>}, {transform_indices = @transform_3, window_bounds = array<i64: 1, 6, 128, 128>}]} {
    %c0 = arith.constant 0 : index
    %c0_0 = arith.constant 0 : index
    %c0_1 = arith.constant 0 : index
    %0 = vector.load %arg3[%c0, %c0_0, %c0_1] : memref<1x128x12xf32, #tpu.memory_space<vmem>>, vector<1x128x12xf32>
    %1 = vector.shape_cast %0 : vector<1x128x12xf32> to vector<128x12xf32>
    %c0_2 = arith.constant 0 : index
    %c0_3 = arith.constant 0 : index
    %c0_4 = arith.constant 0 : index
    %2 = vector.load %arg4[%c0_2, %c0_3, %c0_4] : memref<1x12x128xf32, #tpu.memory_space<vmem>>, vector<1x12x128xf32>
    %3 = vector.shape_cast %2 : vector<1x12x128xf32> to vector<12x128xf32>
    %4 = vector.extract_strided_slice %1 {offsets = [0, 0], sizes = [128, 1], strides = [1, 1]} : vector<128x12xf32> to vector<128x1xf32>
    %5 = vector.extract_strided_slice %3 {offsets = [0, 0], sizes = [1, 128], strides = [1, 1]} : vector<12x128xf32> to vector<1x128xf32>
    %6 = vector.broadcast %4 : vector<128x1xf32> to vector<128x128xf32>
    %7 = vector.broadcast %5 : vector<1x128xf32> to vector<128x128xf32>
    %8 = arith.subf %6, %7 : vector<128x128xf32>
    %9 = math.tanh %8 : vector<128x128xf32>
    %c0_5 = arith.constant 0 : index
    %c0_6 = arith.constant 0 : index
    %c0_7 = arith.constant 0 : index
    %c0_8 = arith.constant 0 : index
    %10 = vector.load %arg5[%c0_5, %c0_6, %c0_7, %c0_8] : memref<1x6x128x128xf32, #tpu.memory_space<vmem>>, vector<1x1x128x128xf32>
    %11 = vector.shape_cast %10 : vector<1x1x128x128xf32> to vector<128x128xf32>
    %12 = vector.shape_cast %9 : vector<128x128xf32> to vector<1x1x128x128xf32>
    tpu.vector_store %arg5[%c0_5, %c0_6, %c0_7, %c0_8], %12 {strides = array<i32>} : memref<1x6x128x128xf32, #tpu.memory_space<vmem>>, vector<1x1x128x128xf32>,
    %13 = vector.extract_strided_slice %1 {offsets = [0, 6], sizes = [128, 1], strides = [1, 1]} : vector<128x12xf32> to vector<128x1xf32>
    %14 = vector.extract_strided_slice %3 {offsets = [6, 0], sizes = [1, 128], strides = [1, 1]} : vector<12x128xf32> to vector<1x128xf32>
    %15 = vector.broadcast %13 : vector<128x1xf32> to vector<128x128xf32>
    %16 = vector.broadcast %14 : vector<1x128xf32> to vector<128x128xf32>
    %17 = arith.maximumf %15, %16 : vector<128x128xf32>
    %18 = vector.broadcast %13 : vector<128x1xf32> to vector<128x128xf32>
    %19 = vector.broadcast %14 : vector<1x128xf32> to vector<128x128xf32>
    %20 = arith.subf %18, %19 : vector<128x128xf32>
    %21 = math.absf %20 : vector<128x128xf32>
    %cst = arith.constant 0.000000e+00 : f32
    %22 = vector.broadcast %cst : f32 to vector<128x128xf32>
    %23 = arith.subf %22, %21 : vector<128x128xf32>
    %24 = math.exp %23 : vector<128x128xf32>
    %25 = math.log1p %24 : vector<128x128xf32>
    %26 = arith.addf %17, %25 : vector<128x128xf32>
    %c0_9 = arith.constant 0 : index
    %c0_10 = arith.constant 0 : index
    %c0_11 = arith.constant 0 : index
    %c0_12 = arith.constant 0 : index
    %27 = vector.load %arg6[%c0_9, %c0_10, %c0_11, %c0_12] : memref<1x6x128x128xf32, #tpu.memory_space<vmem>>, vector<1x1x128x128xf32>
    %28 = vector.shape_cast %27 : vector<1x1x128x128xf32> to vector<128x128xf32>
    %29 = vector.shape_cast %26 : vector<128x128xf32> to vector<1x1x128x128xf32>
    tpu.vector_store %arg6[%c0_9, %c0_10, %c0_11, %c0_12], %29 {strides = array<i32>} : memref<1x6x128x128xf32, #tpu.memory_space<vmem>>, vector<1x1x128x128xf32>,
    %30 = vector.extract_strided_slice %1 {offsets = [0, 1], sizes = [128, 1], strides = [1, 1]} : vector<128x12xf32> to vector<128x1xf32>
    %31 = vector.extract_strided_slice %3 {offsets = [1, 0], sizes = [1, 128], strides = [1, 1]} : vector<12x128xf32> to vector<1x128xf32>
    %32 = vector.broadcast %30 : vector<128x1xf32> to vector<128x128xf32>
    %33 = vector.broadcast %31 : vector<1x128xf32> to vector<128x128xf32>
    %34 = arith.subf %32, %33 : vector<128x128xf32>
    %35 = math.tanh %34 : vector<128x128xf32>
    %c0_13 = arith.constant 0 : index
    %c1 = arith.constant 1 : index
    %c0_14 = arith.constant 0 : index
    %c0_15 = arith.constant 0 : index
    %36 = vector.load %arg5[%c0_13, %c1, %c0_14, %c0_15] : memref<1x6x128x128xf32, #tpu.memory_space<vmem>>, vector<1x1x128x128xf32>
    %37 = vector.shape_cast %36 : vector<1x1x128x128xf32> to vector<128x128xf32>
    %38 = vector.shape_cast %35 : vector<128x128xf32> to vector<1x1x128x128xf32>
    tpu.vector_store %arg5[%c0_13, %c1, %c0_14, %c0_15], %38 {strides = array<i32>} : memref<1x6x128x128xf32, #tpu.memory_space<vmem>>, vector<1x1x128x128xf32>,
    %39 = vector.extract_strided_slice %1 {offsets = [0, 7], sizes = [128, 1], strides = [1, 1]} : vector<128x12xf32> to vector<128x1xf32>
    %40 = vector.extract_strided_slice %3 {offsets = [7, 0], sizes = [1, 128], strides = [1, 1]} : vector<12x128xf32> to vector<1x128xf32>
    %41 = vector.broadcast %39 : vector<128x1xf32> to vector<128x128xf32>
    %42 = vector.broadcast %40 : vector<1x128xf32> to vector<128x128xf32>
    %43 = arith.maximumf %41, %42 : vector<128x128xf32>
    %44 = vector.broadcast %39 : vector<128x1xf32> to vector<128x128xf32>
    %45 = vector.broadcast %40 : vector<1x128xf32> to vector<128x128xf32>
    %46 = arith.subf %44, %45 : vector<128x128xf32>
    %47 = math.absf %46 : vector<128x128xf32>
    %cst_16 = arith.constant 0.000000e+00 : f32
    %48 = vector.broadcast %cst_16 : f32 to vector<128x128xf32>
    %49 = arith.subf %48, %47 : vector<128x128xf32>
    %50 = math.exp %49 : vector<128x128xf32>
    %51 = math.log1p %50 : vector<128x128xf32>
    %52 = arith.addf %43, %51 : vector<128x128xf32>
    %c0_17 = arith.constant 0 : index
    %c1_18 = arith.constant 1 : index
    %c0_19 = arith.constant 0 : index
    %c0_20 = arith.constant 0 : index
    %53 = vector.load %arg6[%c0_17, %c1_18, %c0_19, %c0_20] : memref<1x6x128x128xf32, #tpu.memory_space<vmem>>, vector<1x1x128x128xf32>
    %54 = vector.shape_cast %53 : vector<1x1x128x128xf32> to vector<128x128xf32>
    %55 = vector.shape_cast %52 : vector<128x128xf32> to vector<1x1x128x128xf32>
    tpu.vector_store %arg6[%c0_17, %c1_18, %c0_19, %c0_20], %55 {strides = array<i32>} : memref<1x6x128x128xf32, #tpu.memory_space<vmem>>, vector<1x1x128x128xf32>,
    %56 = vector.extract_strided_slice %1 {offsets = [0, 2], sizes = [128, 1], strides = [1, 1]} : vector<128x12xf32> to vector<128x1xf32>
    %57 = vector.extract_strided_slice %3 {offsets = [2, 0], sizes = [1, 128], strides = [1, 1]} : vector<12x128xf32> to vector<1x128xf32>
    %58 = vector.broadcast %56 : vector<128x1xf32> to vector<128x128xf32>
    %59 = vector.broadcast %57 : vector<1x128xf32> to vector<128x128xf32>
    %60 = arith.subf %58, %59 : vector<128x128xf32>
    %61 = math.tanh %60 : vector<128x128xf32>
    %c0_21 = arith.constant 0 : index
    %c2 = arith.constant 2 : index
    %c0_22 = arith.constant 0 : index
    %c0_23 = arith.constant 0 : index
    %62 = vector.load %arg5[%c0_21, %c2, %c0_22, %c0_23] : memref<1x6x128x128xf32, #tpu.memory_space<vmem>>, vector<1x1x128x128xf32>
    %63 = vector.shape_cast %62 : vector<1x1x128x128xf32> to vector<128x128xf32>
    %64 = vector.shape_cast %61 : vector<128x128xf32> to vector<1x1x128x128xf32>
    tpu.vector_store %arg5[%c0_21, %c2, %c0_22, %c0_23], %64 {strides = array<i32>} : memref<1x6x128x128xf32, #tpu.memory_space<vmem>>, vector<1x1x128x128xf32>,
    %65 = vector.extract_strided_slice %1 {offsets = [0, 8], sizes = [128, 1], strides = [1, 1]} : vector<128x12xf32> to vector<128x1xf32>
    %66 = vector.extract_strided_slice %3 {offsets = [8, 0], sizes = [1, 128], strides = [1, 1]} : vector<12x128xf32> to vector<1x128xf32>
    %67 = vector.broadcast %65 : vector<128x1xf32> to vector<128x128xf32>
    %68 = vector.broadcast %66 : vector<1x128xf32> to vector<128x128xf32>
    %69 = arith.maximumf %67, %68 : vector<128x128xf32>
    %70 = vector.broadcast %65 : vector<128x1xf32> to vector<128x128xf32>
    %71 = vector.broadcast %66 : vector<1x128xf32> to vector<128x128xf32>
    %72 = arith.subf %70, %71 : vector<128x128xf32>
    %73 = math.absf %72 : vector<128x128xf32>
    %cst_24 = arith.constant 0.000000e+00 : f32
    %74 = vector.broadcast %cst_24 : f32 to vector<128x128xf32>
    %75 = arith.subf %74, %73 : vector<128x128xf32>
    %76 = math.exp %75 : vector<128x128xf32>
    %77 = math.log1p %76 : vector<128x128xf32>
    %78 = arith.addf %69, %77 : vector<128x128xf32>
    %c0_25 = arith.constant 0 : index
    %c2_26 = arith.constant 2 : index
    %c0_27 = arith.constant 0 : index
    %c0_28 = arith.constant 0 : index
    %79 = vector.load %arg6[%c0_25, %c2_26, %c0_27, %c0_28] : memref<1x6x128x128xf32, #tpu.memory_space<vmem>>, vector<1x1x128x128xf32>
    %80 = vector.shape_cast %79 : vector<1x1x128x128xf32> to vector<128x128xf32>
    %81 = vector.shape_cast %78 : vector<128x128xf32> to vector<1x1x128x128xf32>
    tpu.vector_store %arg6[%c0_25, %c2_26, %c0_27, %c0_28], %81 {strides = array<i32>} : memref<1x6x128x128xf32, #tpu.memory_space<vmem>>, vector<1x1x128x128xf32>,
    %82 = vector.extract_strided_slice %1 {offsets = [0, 3], sizes = [128, 1], strides = [1, 1]} : vector<128x12xf32> to vector<128x1xf32>
    %83 = vector.extract_strided_slice %3 {offsets = [3, 0], sizes = [1, 128], strides = [1, 1]} : vector<12x128xf32> to vector<1x128xf32>
    %84 = vector.broadcast %82 : vector<128x1xf32> to vector<128x128xf32>
    %85 = vector.broadcast %83 : vector<1x128xf32> to vector<128x128xf32>
    %86 = arith.subf %84, %85 : vector<128x128xf32>
    %87 = math.tanh %86 : vector<128x128xf32>
    %c0_29 = arith.constant 0 : index
    %c3 = arith.constant 3 : index
    %c0_30 = arith.constant 0 : index
    %c0_31 = arith.constant 0 : index
    %88 = vector.load %arg5[%c0_29, %c3, %c0_30, %c0_31] : memref<1x6x128x128xf32, #tpu.memory_space<vmem>>, vector<1x1x128x128xf32>
    %89 = vector.shape_cast %88 : vector<1x1x128x128xf32> to vector<128x128xf32>
    %90 = vector.shape_cast %87 : vector<128x128xf32> to vector<1x1x128x128xf32>
    tpu.vector_store %arg5[%c0_29, %c3, %c0_30, %c0_31], %90 {strides = array<i32>} : memref<1x6x128x128xf32, #tpu.memory_space<vmem>>, vector<1x1x128x128xf32>,
    %91 = vector.extract_strided_slice %1 {offsets = [0, 9], sizes = [128, 1], strides = [1, 1]} : vector<128x12xf32> to vector<128x1xf32>
    %92 = vector.extract_strided_slice %3 {offsets = [9, 0], sizes = [1, 128], strides = [1, 1]} : vector<12x128xf32> to vector<1x128xf32>
    %93 = vector.broadcast %91 : vector<128x1xf32> to vector<128x128xf32>
    %94 = vector.broadcast %92 : vector<1x128xf32> to vector<128x128xf32>
    %95 = arith.maximumf %93, %94 : vector<128x128xf32>
    %96 = vector.broadcast %91 : vector<128x1xf32> to vector<128x128xf32>
    %97 = vector.broadcast %92 : vector<1x128xf32> to vector<128x128xf32>
    %98 = arith.subf %96, %97 : vector<128x128xf32>
    %99 = math.absf %98 : vector<128x128xf32>
    %cst_32 = arith.constant 0.000000e+00 : f32
    %100 = vector.broadcast %cst_32 : f32 to vector<128x128xf32>
    %101 = arith.subf %100, %99 : vector<128x128xf32>
    %102 = math.exp %101 : vector<128x128xf32>
    %103 = math.log1p %102 : vector<128x128xf32>
    %104 = arith.addf %95, %103 : vector<128x128xf32>
    %c0_33 = arith.constant 0 : index
    %c3_34 = arith.constant 3 : index
    %c0_35 = arith.constant 0 : index
    %c0_36 = arith.constant 0 : index
    %105 = vector.load %arg6[%c0_33, %c3_34, %c0_35, %c0_36] : memref<1x6x128x128xf32, #tpu.memory_space<vmem>>, vector<1x1x128x128xf32>
    %106 = vector.shape_cast %105 : vector<1x1x128x128xf32> to vector<128x128xf32>
    %107 = vector.shape_cast %104 : vector<128x128xf32> to vector<1x1x128x128xf32>
    tpu.vector_store %arg6[%c0_33, %c3_34, %c0_35, %c0_36], %107 {strides = array<i32>} : memref<1x6x128x128xf32, #tpu.memory_space<vmem>>, vector<1x1x128x128xf32>,
    %108 = vector.extract_strided_slice %1 {offsets = [0, 4], sizes = [128, 1], strides = [1, 1]} : vector<128x12xf32> to vector<128x1xf32>
    %109 = vector.extract_strided_slice %3 {offsets = [4, 0], sizes = [1, 128], strides = [1, 1]} : vector<12x128xf32> to vector<1x128xf32>
    %110 = vector.broadcast %108 : vector<128x1xf32> to vector<128x128xf32>
    %111 = vector.broadcast %109 : vector<1x128xf32> to vector<128x128xf32>
    %112 = arith.subf %110, %111 : vector<128x128xf32>
    %113 = math.tanh %112 : vector<128x128xf32>
    %c0_37 = arith.constant 0 : index
    %c4 = arith.constant 4 : index
    %c0_38 = arith.constant 0 : index
    %c0_39 = arith.constant 0 : index
    %114 = vector.load %arg5[%c0_37, %c4, %c0_38, %c0_39] : memref<1x6x128x128xf32, #tpu.memory_space<vmem>>, vector<1x1x128x128xf32>
    %115 = vector.shape_cast %114 : vector<1x1x128x128xf32> to vector<128x128xf32>
    %116 = vector.shape_cast %113 : vector<128x128xf32> to vector<1x1x128x128xf32>
    tpu.vector_store %arg5[%c0_37, %c4, %c0_38, %c0_39], %116 {strides = array<i32>} : memref<1x6x128x128xf32, #tpu.memory_space<vmem>>, vector<1x1x128x128xf32>,
    %117 = vector.extract_strided_slice %1 {offsets = [0, 10], sizes = [128, 1], strides = [1, 1]} : vector<128x12xf32> to vector<128x1xf32>
    %118 = vector.extract_strided_slice %3 {offsets = [10, 0], sizes = [1, 128], strides = [1, 1]} : vector<12x128xf32> to vector<1x128xf32>
    %119 = vector.broadcast %117 : vector<128x1xf32> to vector<128x128xf32>
    %120 = vector.broadcast %118 : vector<1x128xf32> to vector<128x128xf32>
    %121 = arith.maximumf %119, %120 : vector<128x128xf32>
    %122 = vector.broadcast %117 : vector<128x1xf32> to vector<128x128xf32>
    %123 = vector.broadcast %118 : vector<1x128xf32> to vector<128x128xf32>
    %124 = arith.subf %122, %123 : vector<128x128xf32>
    %125 = math.absf %124 : vector<128x128xf32>
    %cst_40 = arith.constant 0.000000e+00 : f32
    %126 = vector.broadcast %cst_40 : f32 to vector<128x128xf32>
    %127 = arith.subf %126, %125 : vector<128x128xf32>
    %128 = math.exp %127 : vector<128x128xf32>
    %129 = math.log1p %128 : vector<128x128xf32>
    %130 = arith.addf %121, %129 : vector<128x128xf32>
    %c0_41 = arith.constant 0 : index
    %c4_42 = arith.constant 4 : index
    %c0_43 = arith.constant 0 : index
    %c0_44 = arith.constant 0 : index
    %131 = vector.load %arg6[%c0_41, %c4_42, %c0_43, %c0_44] : memref<1x6x128x128xf32, #tpu.memory_space<vmem>>, vector<1x1x128x128xf32>
    %132 = vector.shape_cast %131 : vector<1x1x128x128xf32> to vector<128x128xf32>
    %133 = vector.shape_cast %130 : vector<128x128xf32> to vector<1x1x128x128xf32>
    tpu.vector_store %arg6[%c0_41, %c4_42, %c0_43, %c0_44], %133 {strides = array<i32>} : memref<1x6x128x128xf32, #tpu.memory_space<vmem>>, vector<1x1x128x128xf32>,
    %134 = vector.extract_strided_slice %1 {offsets = [0, 5], sizes = [128, 1], strides = [1, 1]} : vector<128x12xf32> to vector<128x1xf32>
    %135 = vector.extract_strided_slice %3 {offsets = [5, 0], sizes = [1, 128], strides = [1, 1]} : vector<12x128xf32> to vector<1x128xf32>
    %136 = vector.broadcast %134 : vector<128x1xf32> to vector<128x128xf32>
    %137 = vector.broadcast %135 : vector<1x128xf32> to vector<128x128xf32>
    %138 = arith.subf %136, %137 : vector<128x128xf32>
    %139 = math.tanh %138 : vector<128x128xf32>
    %c0_45 = arith.constant 0 : index
    %c5 = arith.constant 5 : index
    %c0_46 = arith.constant 0 : index
    %c0_47 = arith.constant 0 : index
    %140 = vector.load %arg5[%c0_45, %c5, %c0_46, %c0_47] : memref<1x6x128x128xf32, #tpu.memory_space<vmem>>, vector<1x1x128x128xf32>
    %141 = vector.shape_cast %140 : vector<1x1x128x128xf32> to vector<128x128xf32>
    %142 = vector.shape_cast %139 : vector<128x128xf32> to vector<1x1x128x128xf32>
    tpu.vector_store %arg5[%c0_45, %c5, %c0_46, %c0_47], %142 {strides = array<i32>} : memref<1x6x128x128xf32, #tpu.memory_space<vmem>>, vector<1x1x128x128xf32>,
    %143 = vector.extract_strided_slice %1 {offsets = [0, 11], sizes = [128, 1], strides = [1, 1]} : vector<128x12xf32> to vector<128x1xf32>
    %144 = vector.extract_strided_slice %3 {offsets = [11, 0], sizes = [1, 128], strides = [1, 1]} : vector<12x128xf32> to vector<1x128xf32>
    %145 = vector.broadcast %143 : vector<128x1xf32> to vector<128x128xf32>
    %146 = vector.broadcast %144 : vector<1x128xf32> to vector<128x128xf32>
    %147 = arith.maximumf %145, %146 : vector<128x128xf32>
    %148 = vector.broadcast %143 : vector<128x1xf32> to vector<128x128xf32>
    %149 = vector.broadcast %144 : vector<1x128xf32> to vector<128x128xf32>
    %150 = arith.subf %148, %149 : vector<128x128xf32>
    %151 = math.absf %150 : vector<128x128xf32>
    %cst_48 = arith.constant 0.000000e+00 : f32
    %152 = vector.broadcast %cst_48 : f32 to vector<128x128xf32>
    %153 = arith.subf %152, %151 : vector<128x128xf32>
    %154 = math.exp %153 : vector<128x128xf32>
    %155 = math.log1p %154 : vector<128x128xf32>
    %156 = arith.addf %147, %155 : vector<128x128xf32>
    %c0_49 = arith.constant 0 : index
    %c5_50 = arith.constant 5 : index
    %c0_51 = arith.constant 0 : index
    %c0_52 = arith.constant 0 : index
    %157 = vector.load %arg6[%c0_49, %c5_50, %c0_51, %c0_52] : memref<1x6x128x128xf32, #tpu.memory_space<vmem>>, vector<1x1x128x128xf32>
    %158 = vector.shape_cast %157 : vector<1x1x128x128xf32> to vector<128x128xf32>
    %159 = vector.shape_cast %156 : vector<128x128xf32> to vector<1x1x128x128xf32>
    tpu.vector_store %arg6[%c0_49, %c5_50, %c0_51, %c0_52], %159 {strides = array<i32>} : memref<1x6x128x128xf32, #tpu.memory_space<vmem>>, vector<1x1x128x128xf32>,
    return
  }
  func.func @transform_0(%arg0: i32, %arg1: i32, %arg2: i32) -> (i32, i32, i32) {
    %c0_i32 = arith.constant 0 : i32
    %c0_i32_0 = arith.constant 0 : i32
    return %arg0, %arg1, %c0_i32 : i32, i32, i32
  }
  func.func @transform_1(%arg0: i32, %arg1: i32, %arg2: i32) -> (i32, i32, i32) {
    %c0_i32 = arith.constant 0 : i32
    %c0_i32_0 = arith.constant 0 : i32
    return %arg0, %c0_i32, %arg2 : i32, i32, i32
  }
  func.func @transform_2(%arg0: i32, %arg1: i32, %arg2: i32) -> (i32, i32, i32, i32) {
    %c0_i32 = arith.constant 0 : i32
    %c0_i32_0 = arith.constant 0 : i32
    return %arg0, %c0_i32, %arg1, %arg2 : i32, i32, i32, i32
  }
  func.func @transform_3(%arg0: i32, %arg1: i32, %arg2: i32) -> (i32, i32, i32, i32) {
    %c0_i32 = arith.constant 0 : i32
    %c0_i32_0 = arith.constant 0 : i32
    return %arg0, %c0_i32, %arg1, %arg2 : i32, i32, i32, i32
  }
}

</mosaic_0001>

<bundles_post_ra>
// kernel: tpu_custom_call.1
= control target key start
LH: loop header
LB: loop body
LE: loop exit
PB: predicated region body
PF: predicated region fallthrough
CT: control target
= control target key end

     0   :  { %9 = vsyncpa [#allocation3], 0  ;;  %s6271_s0 = inlined_call_operand.vmem [shape: f32[2,128,12], index: 0, kind: input, shape index: {}]   ;;  %s6272_s1 = inlined_call_operand.vmem [shape: f32[2,12,128], index: 1, kind: input, shape index: {}]   ;;  %s6273_s2 = inlined_call_operand.hbm [shape: f32[2,6,128,128], index: 2, kind: output, shape index: {0}]   ;;  %s6274_s3 = inlined_call_operand.hbm [shape: f32[2,6,128,128], index: 3, kind: output, shape index: {1}]  }
   0x1   :  { %11 = vsyncpa [#allocation3 + $0x1], 0 }
   0x2   :  { %12 = vsyncpa [#allocation5], 0 }
   0x3   :  { %14 = vsyncpa [#allocation5 + $0x1], 0  ;;  %s4241_s12 = smov 0   ;;  %s4243_s13 = smov 0  }
   0x4   :  { %s4245_s14 = smov 0   ;;  %s4247_s15 = smov 0  }
   0x5   :  { %s4249_s16 = smov 0   ;;  %s4251_s17 = smov 0  }
   0x6 LB: > { %s3182_s18 = sadd.s32 4294967295, %s4205_s17   ;;  %s3183_s19 = sadd.s32 4294967294, %s4205_s17   ;;  %s4205_s17 = sphi %s4251_s17, %s20_s17   ;;  %s4201_s16 = sphi %s4249_s16, %s6405_s16   ;;  %s4197_s15 = sphi %s4247_s15, %s6404_s15   ;;  %s4193_s14 = sphi %s4245_s14, %s6403_s14   ;;  %s4189_s13 = sphi %s4243_s13, %s6402_s13   ;;  %s4185_s12 = sphi %s4241_s12, %s6401_s12  }
   0x7   : > { %s39_s20 = sadd.s32 1, %s4201_s16  ;;  %s106_s21 = sadd.s32 1, %s4193_s14 }
   0x8   : > { %p41_p0 = scmp.ge.s32.totalorder %s39_s20, 2  ;;  %p116_p1 = scmp.ne.s32.totalorder %s4193_s14, %s4189_s13 }
   0x9   : > { %p117_p2 = scmp.eq.s32.totalorder %s3182_s18, 1  ;;  %p122_p3 = scmp.ne.s32.totalorder %s4189_s13, %s4185_s12 }
   0xa   : > { %s6407_s20 = smov (%p41_p0, %s39_s20), 0  ;;  %p123_p5 = scmp.eq.s32.totalorder %s3183_s19, 1 }
   0xb   : > { %p4281_p4 = por %p117_p2, %p116_p1  ;;  %s99_s23 = ssub.s32 %s4201_s16, %s6407_s20 }
   0xc   : > { %p3186_p6 = scmp.ge.s32.totalorder %s4205_s17, 1  ;;  %p104_p7 = scmp.eq.s32.totalorder %s99_s23, 0 }
   0xd   : > { %p4288_p8 = por %p123_p5, %p122_p3  ;;  %p195_p9 = scmp.lt.s32.totalorder %s4205_s17, 3 }
   0xe   : > { %s4294_s25 = scalar_select %p104_p7, %s4193_s14, %s106_s21  }
   0xf   : > { %p196_p10 = pnand %p3186_p6, %p195_p9 }
  0x10   : > { %p237_p11 = scmp.lt.s32.totalorder (!%p196_p10), %s4197_s15, 1  ;;  %s4403_s8 = sand.u32 (!%p196_p10), 1, %s4189_s13  }
  0x11   : > { %199 = sbr.rel (%p196_p10) target bundleno = 726 (0x2d6), region = 28  ;;  %s3001_s28 = scalar_lea.sflag (!%p196_p10), [#allocation3], %s4403_s8 }
  0x12   : > { %s3357_s9 = smul.u32 (!%p196_p10), 768, %s4403_s8  ;;  %s4115_s6 = scalar_lea.hbm (!%p196_p10), %s6273_s2, 1536 }
  0x13   : > { %s3358_s18 = smul.u32 (!%p196_p10), 768, %s4197_s15 }
  0x14   : > { %s4412_s10 = scalar_lea.vmem (!%p196_p10), [#allocation2], %s3357_s9  ;;  %s4499_s11 = scalar_lea.vmem (!%p196_p10), [#allocation4], %s3357_s9 }
  0x15   : > { %s6117_s23 = scalar_lea.hbm (!%p196_p10), %s6273_s2, %s3358_s18 }
  0x16   : > { %v4207_v0 = vmov 0   ;;  %s4298_s26 = scalar_select %p237_p11, %s4197_s15, 1  ;;  %v4208_v16 = vmov 6   ;;  %v4209_v18 = vmov 1   ;;  %v4210_v41 = vmov 7  }
  0x17   : > { %3436 = vset.pattern.permute.xlu2 %v4207_v0  ;;  %3435 = vset.pattern.permute.xlu1 %v4207_v0 }
  0x18   : > { %3434 = vset.pattern.permute.xlu0 %v4207_v0  ;;  %s3355_s27 = sshll.u32 %s4298_s26, 7  ;;  %s3356_s4 = sshll.u32 %s4298_s26, 4 }
  0x19   : > { %s4304_s30 = scalar_lea.vmem %s6271_s0, %s3355_s27  ;;  %s4390_s7 = scalar_lea.vmem %s6272_s1, %s3356_s4 }
  0x1a   : > { %v4307_v1 = vld [vmem:[%s4304_s30 + $0x20] sm:$0xff]  ;;  %v4311_v2 = vld [vmem:[%s4304_s30 + $0x10] sm:$0xff]  ;;  %v4319_v4 = vld [vmem:[%s4304_s30 + $0x28] sm:$0xff]  ;;  %s3021_s26 = sshll.u32 %s4412_s10, 4  ;;  %s3023_s27 = sshll.u32 %s6117_s23, 4  ;;  %s6142_s26 = int_to_ptr.vmem [resolvable:$true] %s3021_s26  ;;  %s6144_s27 = int_to_ptr.hbm [resolvable:$true] %s3023_s27 }
  0x1b   : > { %296 = vperm.xlu2 %3436, %v4307_v1   ;;  %286 = vperm.xlu1 %3435, %v4311_v2   ;;  %v4315_v3 = vld [vmem:[%s4304_s30] sm:$0xff]  ;;  %v4322_v5 = vld [vmem:[%s4304_s30 + $0x18] sm:$0xff]  ;;  %v4326_v6 = vld [vmem:[%s4304_s30 + $0x8] sm:$0xff]  ;;  %s4109_s29 = sshra.s32 %s6144_s27, 4  ;;  %s4110_s29 = int_to_ptr.hbm [resolvable:$true] %s4109_s29 }
  0x1c   : > { %276 = vperm.xlu0 %3434, %v4315_v3   ;;  %v4331_v7 = vld [vmem:[%s4304_s30 + $0x40] sm:$0xff]  ;;  %v4334_v8 = vld [vmem:[%s4304_s30 + $0x38] sm:$0xff]  ;;  %v4338_v9 = vld [vmem:[%s4304_s30 + $0x30] sm:$0xff]  ;;  %p4116_p1 = scmp.lt.s32.totalorder %s4110_s29, %s6273_s2 }
  0x1d   : > { %v4343_v10 = vld [vmem:[%s4304_s30 + $0x58] sm:$0xff]  ;;  %v4346_v11 = vld [vmem:[%s4304_s30 + $0x50] sm:$0xff]  ;;  %v4350_v12 = vld [vmem:[%s4304_s30 + $0x48] sm:$0xff] }
  0x1e   : > { %v4355_v13 = vld [vmem:[%s4304_s30 + $0x70] sm:$0xff]  ;;  %v4358_v14 = vld [vmem:[%s4304_s30 + $0x68] sm:$0xff]  ;;  %v4362_v15 = vld [vmem:[%s4304_s30 + $0x60] sm:$0xff] }
  0x1f   : > { %v4367_v17 = vld [vmem:[%s4304_s30 + $0x78] sm:$0xff]  ;;  %v4394_v19 = vld [vmem:[%s4390_s7] sm:$0xff] }
  0x20   : > { %v4397_v20 = vperm.slane %v4394_v19, 0  ;;  %v4435_v42 = vperm.slane %v4394_v19, 6 }
  0x23   : > { %301 = vperm.xlu2 %3436, %v4319_v4   ;;  %291 = vperm.xlu1 %3435, %v4322_v5  }
  0x24   : > { %281 = vperm.xlu0 %3434, %v4326_v6  }
  0x2b   : > { %316 = vperm.xlu2 %3436, %v4331_v7   ;;  %311 = vperm.xlu1 %3435, %v4334_v8  }
  0x2c   : > { %306 = vperm.xlu0 %3434, %v4338_v9  }
  0x33   : > { %331 = vperm.xlu2 %3436, %v4343_v10   ;;  %326 = vperm.xlu1 %3435, %v4346_v11  }
  0x34   : > { %321 = vperm.xlu0 %3434, %v4350_v12  }
  0x3b   : > { %346 = vperm.xlu2 %3436, %v4355_v13   ;;  %341 = vperm.xlu1 %3435, %v4358_v14  }
  0x3c   : > { %336 = vperm.xlu0 %3434, %v4362_v15  }
  0x43   : > { %3438 = vset.pattern.permute.xlu2 %v4208_v16  ;;  %3437 = vset.pattern.permute.xlu1 %v4208_v16 }
  0x44   : > { %408 = vperm.xlu2 %3438, %v4326_v6   ;;  %404 = vperm.xlu1 %3437, %v4315_v3  }
  0x45   : > { %351 = vperm.xlu0 %3434, %v4367_v17  }
  0x4c   : > { %420 = vperm.xlu2 %3438, %v4307_v1   ;;  %416 = vperm.xlu1 %3437, %v4322_v5  }
  0x4d   : > { %3439 = vset.pattern.permute.xlu0 %v4208_v16 }
  0x4e   : > { %412 = vperm.xlu0 %3439, %v4311_v2  }
  0x54   : > { %428 = vperm.xlu2 %3438, %v4338_v9   ;;  %424 = vperm.xlu1 %3437, %v4319_v4  }
  0x56   : > { %432 = vperm.xlu0 %3439, %v4334_v8  }
  0x5c   : > { %440 = vperm.xlu2 %3438, %v4350_v12   ;;  %436 = vperm.xlu1 %3437, %v4331_v7  }
  0x5e   : > { %444 = vperm.xlu0 %3439, %v4346_v11  }
  0x64   : > { %452 = vperm.xlu2 %3438, %v4362_v15   ;;  %448 = vperm.xlu1 %3437, %v4343_v10  }
  0x66   : > { %456 = vperm.xlu0 %3439, %v4358_v14  }
  0x6c   : > { %464 = vperm.xlu2 %3438, %v4367_v17   ;;  %460 = vperm.xlu1 %3437, %v4355_v13  }
  0x6e   : > { %3440 = vset.pattern.permute.xlu0 %v4209_v18 }
  0x6f   : > { %741 = vperm.xlu0 %3440, %v4315_v3  }
  0x74   : > { %3442 = vset.pattern.permute.xlu2 %v4209_v18  ;;  %3441 = vset.pattern.permute.xlu1 %v4209_v18 }
  0x75   : > { %v297_v21 = vpop.permute.xlu2 %296  ;;  %749 = vperm.xlu2 %3442, %v4311_v2   ;;  %745 = vperm.xlu1 %3441, %v4326_v6  }
  0x76   : > { %v359_v22 = vsub.f32 %v297_v21, %v4397_v20 }
  0x77   : > { %761 = vperm.xlu0 %3440, %v4319_v4  }
  0x78   : > { %3470 = vtanh.f32 %v359_v22 }
  0x7d   : > { %v302_v23 = vpop.permute.xlu2 %301  ;;  %757 = vperm.xlu2 %3442, %v4307_v1   ;;  %753 = vperm.xlu1 %3441, %v4322_v5  }
  0x7e   : > { %v3471_v24 = vpop.eup %3470  ;;  %v360_v25 = vsub.f32 %v302_v23, %v4397_v20 }
  0x7f   : > { %391 = vst [vmem:[%s4412_s10 + $0x20] sm:$0xff] %v3471_v24  ;;  %773 = vperm.xlu0 %3440, %v4331_v7  }
  0x80   : > { %3472 = vtanh.f32 %v360_v25 }
  0x85   : > { %v317_v26 = vpop.permute.xlu2 %316  ;;  %769 = vperm.xlu2 %3442, %v4334_v8   ;;  %765 = vperm.xlu1 %3441, %v4338_v9  }
  0x86   : > { %v3473_v27 = vpop.eup %3472  ;;  %v363_v28 = vsub.f32 %v317_v26, %v4397_v20 }
  0x87   : > { %392 = vst [vmem:[%s4412_s10 + $0x28] sm:$0xff] %v3473_v27  ;;  %785 = vperm.xlu0 %3440, %v4343_v10  }
  0x88   : > { %3474 = vtanh.f32 %v363_v28 }
  0x8d   : > { %v332_v29 = vpop.permute.xlu2 %331  ;;  %781 = vperm.xlu2 %3442, %v4346_v11   ;;  %v287_v32 = vpop.permute.xlu1 %286  ;;  %777 = vperm.xlu1 %3441, %v4350_v12  }
  0x8e   : > { %v3475_v30 = vpop.eup %3474  ;;  %v366_v31 = vsub.f32 %v332_v29, %v4397_v20  ;;  %v357_v33 = vsub.f32 %v287_v32, %v4397_v20  ;;  %v277_v34 = vpop.permute.xlu0 %276 }
  0x8f   : > { %395 = vst [vmem:[%s4412_s10 + $0x40] sm:$0xff] %v3475_v30  ;;  %797 = vperm.xlu0 %3440, %v4355_v13   ;;  %v355_v61 = vsub.f32 %v277_v34, %v4397_v20 }
  0x90   : > { %3476 = vtanh.f32 %v366_v31 }
  0x91   : > { %3478 = vtanh.f32 %v357_v33 }
  0x95   : > { %v347_v35 = vpop.permute.xlu2 %346  ;;  %793 = vperm.xlu2 %3442, %v4358_v14   ;;  %v292_v38 = vpop.permute.xlu1 %291  ;;  %789 = vperm.xlu1 %3441, %v4362_v15  }
  0x96   : > { %v3477_v36 = vpop.eup %3476  ;;  %v369_v37 = vsub.f32 %v347_v35, %v4397_v20  ;;  %v358_v40 = vsub.f32 %v292_v38, %v4397_v20  ;;  %v4437_v43 = vpop.permute.xlu0 %281 }
  0x97   : > { %v3479_v39 = vpop.eup %3478  ;;  %398 = vst [vmem:[%s4412_s10 + $0x58] sm:$0xff] %v3477_v36  ;;  %3444 = vset.pattern.permute.xlu0 %v4210_v41 }
  0x98   : > { %389 = vst [vmem:[%s4412_s10 + $0x10] sm:$0xff] %v3479_v39  ;;  %3480 = vtanh.f32 %v369_v37  ;;  %859 = vperm.xlu0 %3444, %v4326_v6  }
  0x99   : > { %3482 = vtanh.f32 %v358_v40  ;;  %v356_v40 = vsub.f32 %v4437_v43, %v4397_v20 }
  0x9d   : > { %3443 = vset.pattern.permute.xlu2 %v4210_v41  ;;  %v312_v45 = vpop.permute.xlu1 %311  ;;  %801 = vperm.xlu1 %3441, %v4367_v17  }
  0x9e   : > { %v3481_v44 = vpop.eup %3480  ;;  %v4440_v46 = vpop.permute.xlu2 %408  ;;  %855 = vperm.xlu2 %3443, %v4315_v3   ;;  %v362_v48 = vsub.f32 %v312_v45, %v4397_v20 }
  0x9f   : > { %v3483_v47 = vpop.eup %3482  ;;  %401 = vst [vmem:[%s4412_s10 + $0x70] sm:$0xff] %v3481_v44  ;;  %v485_v49 = vsub.f32 %v4440_v46, %v4435_v42  ;;  %v4449_v53 = vpop.permute.xlu0 %306  ;;  %v469_v32 = vmax.f32 %v4440_v46, %v4435_v42 }
  0xa0   : > { %390 = vst [vmem:[%s4412_s10 + $0x18] sm:$0xff] %v3483_v47  ;;  %3484 = vtanh.f32 %v362_v48  ;;  %879 = vperm.xlu0 %3444, %v4338_v9  }
  0xa1   : > { %v501_v50 = vand.u32 2147483647, %v485_v49 }
  0xa3   : > { %v517_v51 = vsub.f32 0.0, %v501_v50 }
  0xa5   : > { %v534_v52 = vmul.f32 1.442695, %v517_v51  ;;  %v327_v54 = vpop.permute.xlu1 %326  ;;  %3445 = vset.pattern.permute.xlu1 %v4210_v41 }
  0xa6   : > { %v4451_v55 = vpop.permute.xlu2 %420  ;;  %867 = vperm.xlu2 %3443, %v4322_v5   ;;  %v3485_v56 = vpop.eup %3484  ;;  %v365_v57 = vsub.f32 %v327_v54, %v4397_v20  ;;  %863 = vperm.xlu1 %3445, %v4311_v2  }
  0xa7   : > { %3486 = vpow2.f32 %v534_v52  ;;  %v488_v58 = vsub.f32 %v4451_v55, %v4435_v42  ;;  %394 = vst [vmem:[%s4412_s10 + $0x38] sm:$0xff] %v3485_v56  ;;  %v4468_v25 = vpop.permute.xlu0 %321 }
  0xa8   : > { %3488 = vtanh.f32 %v365_v57  ;;  %891 = vperm.xlu0 %3444, %v4350_v12  }
  0xa9   : > { %v504_v59 = vand.u32 2147483647, %v488_v58  ;;  %3490 = vtanh.f32 %v355_v61 }
  0xab   : > { %v520_v60 = vsub.f32 0.0, %v504_v59 }
  0xad   : > { %v3487_v62 = vpop.eup %3486  ;;  %v540_v63 = vmul.f32 1.442695, %v520_v60  ;;  %v342_v18 = vpop.permute.xlu1 %341 }
  0xae   : > { %v573_v0 = vadd.f32 1.0, %v3487_v62  ;;  %v576_v16 = vmul.f32 -0.5, %v3487_v62  ;;  %v4461_v21 = vpop.permute.xlu2 %428  ;;  %875 = vperm.xlu2 %3443, %v4319_v4   ;;  %v3489_v22 = vpop.eup %3488  ;;  %v368_v23 = vsub.f32 %v342_v18, %v4397_v20  ;;  %871 = vperm.xlu1 %3445, %v4307_v1   ;;  %v579_v28 = vand.u32 2147483647, %v3487_v62 }
  0xaf   : > { %3492 = vpow2.f32 %v540_v63  ;;  %v490_v24 = vsub.f32 %v4461_v21, %v4435_v42  ;;  %397 = vst [vmem:[%s4412_s10 + $0x50] sm:$0xff] %v3489_v22  ;;  %v3491_v30 = vpop.eup %3490  ;;  %v4489_v47 = vpop.permute.xlu0 %336 }
  0xb0   : > { %3494 = vlog2.f32 %v573_v0  ;;  %v577_v26 = vadd.f32 1.0, %v576_v16  ;;  %903 = vperm.xlu0 %3444, %v4362_v15   ;;  %387 = vst [vmem:[%s4412_s10] sm:$0xff] %v3491_v30  ;;  %vm4475_vm0 = vcmp.lt.f32.partialorder %v579_v28, 0.0004427343 }
  0xb1   : > { %3496 = vtanh.f32 %v368_v23  ;;  %v506_v27 = vand.u32 2147483647, %v490_v24 }
  0xb2   : > { %v578_v33 = vmul.f32 %v3487_v62, %v577_v26  ;;  %v472_v62 = vmax.f32 %v4451_v55, %v4435_v42 }
  0xb3   : > { %v522_v29 = vsub.f32 0.0, %v506_v27 }
  0xb5   : > { %v3493_v31 = vpop.eup %3492  ;;  %v544_v34 = vmul.f32 1.442695, %v522_v29 }
  0xb6   : > { %v3495_v35 = vpop.eup %3494  ;;  %v600_v37 = vadd.f32 1.0, %v3493_v31  ;;  %v603_v38 = vmul.f32 -0.5, %v3493_v31  ;;  %v4479_v39 = vpop.permute.xlu2 %440  ;;  %887 = vperm.xlu2 %3443, %v4331_v7   ;;  %883 = vperm.xlu1 %3445, %v4334_v8   ;;  %v606_v52 = vand.u32 2147483647, %v3493_v31 }
  0xb7   : > { %v3497_v41 = vpop.eup %3496  ;;  %v575_v44 = vmul.f32 0.6931472, %v3495_v35  ;;  %3498 = vpow2.f32 %v544_v34  ;;  %v493_v45 = vsub.f32 %v4479_v39, %v4435_v42  ;;  %v4487_v46 = vpop.permute.xlu1 %404  ;;  %v361_v35 = vsub.f32 %v4449_v53, %v4397_v20 }
  0xb8   : > { %3500 = vlog2.f32 %v600_v37  ;;  %v604_v48 = vadd.f32 1.0, %v603_v38  ;;  %400 = vst [vmem:[%s4412_s10 + $0x68] sm:$0xff] %v3497_v41  ;;  %v484_v50 = vsub.f32 %v4487_v46, %v4435_v42  ;;  %915 = vperm.xlu0 %3444, %v4367_v17   ;;  %vm4504_vm1 = vcmp.lt.f32.partialorder %v606_v52, 0.0004427343  ;;  %v4514_v27 = vpop.permute.xlu0 %351 }
  0xb9   : > { %v581_v49 = vsel %vm4475_vm0, %v578_v33, %v575_v44  ;;  %v509_v43 = vand.u32 2147483647, %v493_v45  ;;  %3502 = vtanh.f32 %v356_v40 }
  0xba   : > { %v709_v51 = vadd.f32 %v581_v49, %v469_v32  ;;  %v500_v56 = vand.u32 2147483647, %v484_v50  ;;  %v605_v58 = vmul.f32 %v3493_v31, %v604_v48  ;;  %v4211_v31 = vmov 2  }
  0xbb   : > { %v525_v54 = vsub.f32 0.0, %v509_v43 }
  0xbc   : > { %725 = vst [vmem:[%s4499_s11 + $0x8] sm:$0xff] %v709_v51  ;;  %v516_v60 = vsub.f32 0.0, %v500_v56 }
  0xbd   : > { %v3499_v57 = vpop.eup %3498  ;;  %v550_v59 = vmul.f32 1.442695, %v525_v54 }
  0xbe   : > { %v3501_v61 = vpop.eup %3500  ;;  %v618_v0 = vadd.f32 1.0, %v3499_v57  ;;  %v621_v16 = vmul.f32 -0.5, %v3499_v57  ;;  %v4508_v18 = vpop.permute.xlu2 %452  ;;  %899 = vperm.xlu2 %3443, %v4343_v10   ;;  %v532_v24 = vmul.f32 1.442695, %v516_v60  ;;  %895 = vperm.xlu1 %3445, %v4346_v11   ;;  %v624_v33 = vand.u32 2147483647, %v3499_v57 }
  0xbf   : > { %v3503_v22 = vpop.eup %3502  ;;  %v602_v23 = vmul.f32 0.6931472, %v3501_v61  ;;  %3504 = vpow2.f32 %v550_v59  ;;  %v4512_v26 = vpop.permute.xlu1 %416  ;;  %v496_v55 = vsub.f32 %v4508_v18, %v4435_v42 }
  0xc0   : > { %3506 = vlog2.f32 %v618_v0  ;;  %388 = vst [vmem:[%s4412_s10 + $0x8] sm:$0xff] %v3503_v22  ;;  %v622_v29 = vadd.f32 1.0, %v621_v16  ;;  %v487_v30 = vsub.f32 %v4512_v26, %v4435_v42  ;;  %3448 = vset.pattern.permute.xlu0 %v4211_v31  ;;  %vm4527_vm2 = vcmp.lt.f32.partialorder %v624_v33, 0.0004427343  ;;  %v4539_v56 = vpop.permute.xlu0 %412 }
  0xc1   : > { %v608_v28 = vsel %vm4504_vm1, %v605_v58, %v602_v23  ;;  %3508 = vpow2.f32 %v532_v24  ;;  %v512_v34 = vand.u32 2147483647, %v496_v55  ;;  %1201 = vperm.xlu0 %3448, %v4311_v2   ;;  %v364_v24 = vsub.f32 %v4468_v25, %v4397_v20 }
  0xc2   : > { %v712_v32 = vadd.f32 %v608_v28, %v472_v62  ;;  %v503_v36 = vand.u32 2147483647, %v487_v30  ;;  %3510 = vtanh.f32 %v361_v35  ;;  %v623_v40 = vmul.f32 %v3499_v57, %v622_v29 }
  0xc3   : > { %v528_v37 = vsub.f32 0.0, %v512_v34  ;;  %v474_v57 = vmax.f32 %v4461_v21, %v4435_v42  ;;  %v367_v29 = vsub.f32 %v4489_v47, %v4397_v20 }
  0xc4   : > { %728 = vst [vmem:[%s4499_s11 + $0x20] sm:$0xff] %v712_v32  ;;  %v519_v41 = vsub.f32 0.0, %v503_v36 }
  0xc5   : > { %v3505_v38 = vpop.eup %3504  ;;  %v556_v43 = vmul.f32 1.442695, %v528_v37 }
  0xc6   : > { %v3507_v44 = vpop.eup %3506  ;;  %v645_v48 = vadd.f32 1.0, %v3505_v38  ;;  %v648_v49 = vmul.f32 -0.5, %v3505_v38  ;;  %v4531_v50 = vpop.permute.xlu2 %464  ;;  %911 = vperm.xlu2 %3443, %v4355_v13   ;;  %v538_v51 = vmul.f32 1.442695, %v519_v41  ;;  %907 = vperm.xlu1 %3445, %v4358_v14   ;;  %v651_v58 = vand.u32 2147483647, %v3505_v38 }
  0xc7   : > { %v3509_v2 = vpop.eup %3508  ;;  %v620_v53 = vmul.f32 0.6931472, %v3507_v44  ;;  %v499_v52 = vsub.f32 %v4531_v50, %v4435_v42  ;;  %v4537_v54 = vpop.permute.xlu1 %424 }
  0xc8   : > { %3512 = vlog2.f32 %v645_v48  ;;  %v564_v59 = vadd.f32 1.0, %v3509_v2  ;;  %v649_v61 = vadd.f32 1.0, %v648_v49  ;;  %v567_v62 = vmul.f32 -0.5, %v3509_v2  ;;  %v3511_v63 = vpop.eup %3510  ;;  %v4564_v41 = vpop.permute.xlu0 %432 }
  0xc9   : > { %v626_v60 = vsel %vm4527_vm2, %v623_v40, %v620_v53  ;;  %3514 = vpow2.f32 %v556_v43  ;;  %v515_v16 = vand.u32 2147483647, %v499_v52  ;;  %1221 = vperm.xlu0 %3448, %v4334_v8   ;;  %393 = vst [vmem:[%s4412_s10 + $0x30] sm:$0xff] %v3511_v63  ;;  %v489_v23 = vsub.f32 %v4537_v54, %v4435_v42 }
  0xca   : > { %v714_v0 = vadd.f32 %v626_v60, %v474_v57  ;;  %3516 = vlog2.f32 %v564_v59  ;;  %v568_v22 = vadd.f32 1.0, %v567_v62  ;;  %v650_v55 = vmul.f32 %v3505_v38, %v649_v61 }
  0xcb   : > { %3518 = vpow2.f32 %v538_v51  ;;  %v531_v21 = vsub.f32 0.0, %v515_v16  ;;  %vm4552_vm3 = vcmp.lt.f32.partialorder %v651_v58, 0.0004427343  ;;  %v570_v30 = vand.u32 2147483647, %v3509_v2 }
  0xcc   : > { %730 = vst [vmem:[%s4499_s11 + $0x30] sm:$0xff] %v714_v0  ;;  %v505_v33 = vand.u32 2147483647, %v489_v23  ;;  %3520 = vtanh.f32 %v364_v24  ;;  %v477_v38 = vmax.f32 %v4479_v39, %v4435_v42  ;;  %v569_v47 = vmul.f32 %v3509_v2, %v568_v22 }
  0xcd   : > { %v562_v32 = vmul.f32 1.442695, %v531_v21  ;;  %3522 = vtanh.f32 %v367_v29  ;;  %v468_v43 = vmax.f32 %v4487_v46, %v4435_v42  ;;  %vm571_vm4 = vcmp.lt.f32.partialorder %v570_v30, 0.0004427343 }
  0xce   : > { %v3513_v8 = vpop.eup %3512  ;;  %3447 = vset.pattern.permute.xlu2 %v4211_v31  ;;  %3446 = vset.pattern.permute.xlu1 %v4211_v31  ;;  %v4572_v51 = vperm.slane %v4394_v19, 1  ;;  %v480_v63 = vmax.f32 %v4508_v18, %v4435_v42  ;;  %v370_v16 = vsub.f32 %v4514_v27, %v4397_v20  ;;  %v471_v18 = vmax.f32 %v4512_v26, %v4435_v42 }
  0xcf   : > { %v3515_v34 = vpop.eup %3514  ;;  %v647_v35 = vmul.f32 0.6931472, %v3513_v8  ;;  %v4558_v36 = vpop.permute.xlu1 %436  ;;  %1197 = vperm.xlu2 %3447, %v4326_v6   ;;  %3524 = vpow2.f32 %v562_v32  ;;  %1193 = vperm.xlu1 %3446, %v4315_v3   ;;  %v521_v6 = vsub.f32 0.0, %v505_v33 }
  0xd0   : > { %v750_v25 = vpop.permute.xlu2 %749  ;;  %v3517_v37 = vpop.eup %3516  ;;  %v672_v40 = vadd.f32 1.0, %v3515_v34  ;;  %v675_v48 = vmul.f32 -0.5, %v3515_v34  ;;  %v492_v59 = vsub.f32 %v4558_v36, %v4435_v42  ;;  %v678_v61 = vand.u32 2147483647, %v3515_v34 }
  0xd1   : > { %v3519_v44 = vpop.eup %3518  ;;  %v653_v31 = vsel %vm4552_vm3, %v650_v55, %v647_v35  ;;  %v566_v45 = vmul.f32 0.6931472, %v3517_v37  ;;  %1233 = vperm.xlu0 %3448, %v4346_v11   ;;  %v542_v58 = vmul.f32 1.442695, %v521_v6  ;;  %v807_v11 = vsub.f32 %v750_v25, %v4572_v51  ;;  %v4597_v27 = vpop.permute.xlu0 %444 }
  0xd2   : > { %v717_v49 = vadd.f32 %v653_v31, %v477_v38  ;;  %3526 = vlog2.f32 %v672_v40  ;;  %v591_v2 = vadd.f32 1.0, %v3519_v44  ;;  %v594_v53 = vmul.f32 -0.5, %v3519_v44  ;;  %v3521_v52 = vpop.eup %3520 }
  0xd3   : > { %v572_v39 = vsel %vm571_vm4, %v569_v47, %v566_v45  ;;  %v3523_v46 = vpop.eup %3522  ;;  %v676_v60 = vadd.f32 1.0, %v675_v48  ;;  %396 = vst [vmem:[%s4412_s10 + $0x48] sm:$0xff] %v3521_v52  ;;  %v508_v0 = vand.u32 2147483647, %v492_v59  ;;  %v597_v21 = vand.u32 2147483647, %v3519_v44 }
  0xd4   : > { %733 = vst [vmem:[%s4499_s11 + $0x48] sm:$0xff] %v717_v49  ;;  %v708_v57 = vadd.f32 %v572_v39, %v468_v43  ;;  %3528 = vlog2.f32 %v591_v2  ;;  %v595_v22 = vadd.f32 1.0, %v594_v53  ;;  %vm679_vm5 = vcmp.lt.f32.partialorder %v678_v61, 0.0004427343 }
  0xd5   : > { %v4579_v62 = vpop.eup %3524  ;;  %3530 = vpow2.f32 %v542_v58  ;;  %399 = vst [vmem:[%s4412_s10 + $0x60] sm:$0xff] %v3523_v46  ;;  %v524_v8 = vsub.f32 0.0, %v508_v0  ;;  %v677_v32 = vmul.f32 %v3515_v34, %v676_v60  ;;  %vm4601_vm6 = vcmp.lt.f32.partialorder %v597_v21, 0.0004427343 }
  0xd6   : > { %724 = vst [vmem:[%s4499_s11] sm:$0xff] %v708_v57  ;;  %v699_v23 = vadd.f32 1.0, %v4579_v62  ;;  %v702_v24 = vmul.f32 -0.5, %v4579_v62  ;;  %3532 = vtanh.f32 %v807_v11  ;;  %v596_v37 = vmul.f32 %v3519_v44, %v595_v22 }
  0xd7   : > { %v4589_v55 = vpop.permute.xlu1 %448  ;;  %1209 = vperm.xlu2 %3447, %v4307_v1   ;;  %1205 = vperm.xlu1 %3446, %v4322_v5   ;;  %v548_v33 = vmul.f32 1.442695, %v524_v8  ;;  %v705_v45 = vand.u32 2147483647, %v4579_v62  ;;  %v486_v43 = vsub.f32 %v4539_v56, %v4435_v42  ;;  %v483_v53 = vmax.f32 %v4531_v50, %v4435_v42 }
  0xd8   : > { %v758_v28 = vpop.permute.xlu2 %757  ;;  %v3527_v29 = vpop.eup %3526  ;;  %v495_v20 = vsub.f32 %v4589_v55, %v4435_v42  ;;  %3534 = vlog2.f32 %v699_v23  ;;  %v703_v5 = vadd.f32 1.0, %v702_v24 }
  0xd9   : > { %v674_v30 = vmul.f32 0.6931472, %v3527_v29  ;;  %v809_v1 = vsub.f32 %v758_v28, %v4572_v51  ;;  %3536 = vtanh.f32 %v370_v16  ;;  %1245 = vperm.xlu0 %3448, %v4358_v14   ;;  %v4621_v61 = vpop.permute.xlu0 %456  ;;  %vm706_vm7 = vcmp.lt.f32.partialorder %v705_v45, 0.0004427343 }
  0xda   : > { %v511_v35 = vand.u32 2147483647, %v495_v20  ;;  %v3529_v26 = vpop.eup %3528  ;;  %3538 = vpow2.f32 %v548_v33  ;;  %v704_v46 = vmul.f32 %v4579_v62, %v703_v5  ;;  %v491_v16 = vsub.f32 %v4564_v41, %v4435_v42 }
  0xdb   : > { %v680_v25 = vsel %vm679_vm5, %v677_v32, %v674_v30  ;;  %v3531_v47 = vpop.eup %3530  ;;  %v593_v40 = vmul.f32 0.6931472, %v3529_v26  ;;  %3540 = vtanh.f32 %v809_v1  ;;  %v473_v30 = vmax.f32 %v4537_v54, %v4435_v42 }
  0xdc   : > { %v720_v34 = vadd.f32 %v680_v25, %v480_v63  ;;  %v527_v31 = vsub.f32 0.0, %v511_v35  ;;  %v609_v48 = vadd.f32 1.0, %v3531_v47  ;;  %v612_v6 = vmul.f32 -0.5, %v3531_v47  ;;  %v3533_v14 = vpop.eup %3532 }
  0xdd   : > { %v599_v44 = vsel %vm4601_vm6, %v596_v37, %v593_v40  ;;  %3193 = vst [vmem:[%s4412_s10 + $0x90] sm:$0xff] %v3533_v14  ;;  %v502_v63 = vand.u32 2147483647, %v486_v43  ;;  %v615_v23 = vand.u32 2147483647, %v3531_v47  ;;  %v494_v25 = vsub.f32 %v4597_v27, %v4435_v42 }
  0xde   : > { %736 = vst [vmem:[%s4499_s11 + $0x60] sm:$0xff] %v720_v34  ;;  %v554_v49 = vmul.f32 1.442695, %v527_v31  ;;  %v3535_v39 = vpop.eup %3534  ;;  %v711_v2 = vadd.f32 %v599_v44, %v471_v18  ;;  %3542 = vlog2.f32 %v609_v48  ;;  %v613_v50 = vadd.f32 1.0, %v612_v6 }
  0xdf   : > { %v4614_v52 = vpop.permute.xlu1 %460  ;;  %1217 = vperm.xlu2 %3447, %v4338_v9   ;;  %v3537_v58 = vpop.eup %3536  ;;  %v701_v59 = vmul.f32 0.6931472, %v3535_v39  ;;  %1213 = vperm.xlu1 %3446, %v4319_v4   ;;  %v518_v18 = vsub.f32 0.0, %v502_v63  ;;  %v507_v8 = vand.u32 2147483647, %v491_v16  ;;  %v476_v6 = vmax.f32 %v4558_v36, %v4435_v42 }
  0xe0   : > { %v770_v57 = vpop.permute.xlu2 %769  ;;  %3544 = vpow2.f32 %v554_v49  ;;  %v498_v60 = vsub.f32 %v4614_v52, %v4435_v42  ;;  %727 = vst [vmem:[%s4499_s11 + $0x18] sm:$0xff] %v711_v2  ;;  %v3539_v9 = vpop.eup %3538  ;;  %v614_v32 = vmul.f32 %v3531_v47, %v613_v50  ;;  %vm616_vm8 = vcmp.lt.f32.partialorder %v615_v23, 0.0004427343 }
  0xe1   : > { %v812_v11 = vsub.f32 %v770_v57, %v4572_v51  ;;  %v707_v0 = vsel %vm706_vm7, %v704_v46, %v701_v59  ;;  %402 = vst [vmem:[%s4412_s10 + $0x78] sm:$0xff] %v3537_v58  ;;  %v3541_v22 = vpop.eup %3540  ;;  %v636_v24 = vadd.f32 1.0, %v3539_v9  ;;  %v639_v28 = vmul.f32 -0.5, %v3539_v9  ;;  %v4641_v45 = vpop.permute.xlu0 %741 }
  0xe2   : > { %v514_v62 = vand.u32 2147483647, %v498_v60  ;;  %v723_v21 = vadd.f32 %v707_v0, %v483_v53  ;;  %3195 = vst [vmem:[%s4412_s10 + $0xa0] sm:$0xff] %v3541_v22  ;;  %v536_v26 = vmul.f32 1.442695, %v518_v18  ;;  %v523_v31 = vsub.f32 0.0, %v507_v8 }
  0xe3   : > { %3546 = vtanh.f32 %v812_v11  ;;  %v640_v37 = vadd.f32 1.0, %v639_v28  ;;  %v642_v14 = vand.u32 2147483647, %v3539_v9  ;;  %v510_v43 = vand.u32 2147483647, %v494_v25 }
  0xe4   : > { %v530_v29 = vsub.f32 0.0, %v514_v62  ;;  %v3543_v20 = vpop.eup %3542  ;;  %739 = vst [vmem:[%s4499_s11 + $0x78] sm:$0xff] %v723_v21  ;;  %3548 = vlog2.f32 %v636_v24  ;;  %v546_v49 = vmul.f32 1.442695, %v523_v31  ;;  %v497_v53 = vsub.f32 %v4621_v61, %v4435_v42 }
  0xe5   : > { %v611_v35 = vmul.f32 0.6931472, %v3543_v20  ;;  %v526_v36 = vsub.f32 0.0, %v510_v43  ;;  %vm643_vm9 = vcmp.lt.f32.partialorder %v642_v14, 0.0004427343  ;;  %v4212_v46 = vmov 8  }
  0xe6   : > { %v4632_v33 = vpop.eup %3544  ;;  %v560_v1 = vmul.f32 1.442695, %v530_v29  ;;  %v513_v59 = vand.u32 2147483647, %v497_v53  ;;  %3449 = vset.pattern.permute.xlu0 %v4212_v46  ;;  %v479_v0 = vmax.f32 %v4589_v55, %v4435_v42  ;;  %v4679_v31 = vperm.slane %v4394_v19, 7 }
  0xe7   : > { %v663_v38 = vadd.f32 1.0, %v4632_v33  ;;  %v666_v5 = vmul.f32 -0.5, %v4632_v33  ;;  %1229 = vperm.xlu2 %3447, %v4350_v12   ;;  %v617_v54 = vsel %vm616_vm8, %v614_v32, %v611_v35  ;;  %1225 = vperm.xlu1 %3446, %v4331_v7   ;;  %v746_v40 = vpop.permute.xlu1 %745  ;;  %v641_v7 = vmul.f32 %v3539_v9, %v640_v37 }
  0xe8   : > { %v782_v34 = vpop.permute.xlu2 %781  ;;  %3550 = vpow2.f32 %v560_v1  ;;  %v713_v48 = vadd.f32 %v617_v54, %v473_v30  ;;  %v806_v12 = vsub.f32 %v746_v40, %v4572_v51  ;;  %v669_v58 = vand.u32 2147483647, %v4632_v33  ;;  %1307 = vperm.xlu0 %3449, %v4315_v3  }
  0xe9   : > { %v815_v47 = vsub.f32 %v782_v34, %v4572_v51  ;;  %3552 = vlog2.f32 %v663_v38  ;;  %v3547_v44 = vpop.eup %3546  ;;  %v667_v2 = vadd.f32 1.0, %v666_v5  ;;  %v552_v11 = vmul.f32 1.442695, %v526_v36  ;;  %v4663_v29 = vpop.permute.xlu0 %761 }
  0xea   : > { %3554 = vpow2.f32 %v536_v26  ;;  %v3549_v39 = vpop.eup %3548  ;;  %729 = vst [vmem:[%s4499_s11 + $0x28] sm:$0xff] %v713_v48  ;;  %vm670_vm10 = vcmp.lt.f32.partialorder %v669_v58, 0.0004427343  ;;  %v470_v35 = vmax.f32 %v4539_v56, %v4435_v42  ;;  %v482_v5 = vmax.f32 %v4614_v52, %v4435_v42 }
  0xeb   : > { %3556 = vtanh.f32 %v815_v47  ;;  %v638_v57 = vmul.f32 0.6931472, %v3549_v39  ;;  %3198 = vst [vmem:[%s4412_s10 + $0xb8] sm:$0xff] %v3547_v44  ;;  %v668_v24 = vmul.f32 %v4632_v33, %v667_v2  ;;  %v475_v56 = vmax.f32 %v4564_v41, %v4435_v42 }
  0xec   : > { %3558 = vtanh.f32 %v806_v12 }
  0xed   : > { %3560 = vpow2.f32 %v546_v49  ;;  %v644_v50 = vsel %vm643_vm9, %v641_v7, %v638_v57 }
  0xee   : > { %v4652_v60 = vpop.eup %3550  ;;  %v716_v9 = vadd.f32 %v644_v50, %v476_v6  ;;  %3562 = vpow2.f32 %v552_v11 }
  0xef   : > { %v3553_v63 = vpop.eup %3552  ;;  %v690_v62 = vadd.f32 1.0, %v4652_v60  ;;  %v693_v16 = vmul.f32 -0.5, %v4652_v60  ;;  %1241 = vperm.xlu2 %3447, %v4362_v15   ;;  %1237 = vperm.xlu1 %3446, %v4343_v10   ;;  %v754_v28 = vpop.permute.xlu1 %753  ;;  %v529_v15 = vsub.f32 0.0, %v513_v59  ;;  %v696_v26 = vand.u32 2147483647, %v4652_v60 }
  0xf0   : > { %v794_v22 = vpop.permute.xlu2 %793  ;;  %v3555_v21 = vpop.eup %3554  ;;  %v665_v23 = vmul.f32 0.6931472, %v3553_v63  ;;  %732 = vst [vmem:[%s4499_s11 + $0x40] sm:$0xff] %v716_v9  ;;  %v808_v1 = vsub.f32 %v754_v28, %v4572_v51  ;;  %1327 = vperm.xlu0 %3449, %v4319_v4   ;;  %v805_v4 = vsub.f32 %v4641_v45, %v4572_v51 }
  0xf1   : > { %v818_v3 = vsub.f32 %v794_v22, %v4572_v51  ;;  %v3557_v55 = vpop.eup %3556  ;;  %3564 = vlog2.f32 %v690_v62  ;;  %v582_v18 = vadd.f32 1.0, %v3555_v21  ;;  %v694_v30 = vadd.f32 1.0, %v693_v16  ;;  %v4694_v2 = vpop.permute.xlu0 %773 }
  0xf2   : > { %v3559_v8 = vpop.eup %3558  ;;  %v671_v20 = vsel %vm670_vm10, %v668_v24, %v665_v23  ;;  %v585_v32 = vmul.f32 -0.5, %v3555_v21  ;;  %3201 = vst [vmem:[%s4412_s10 + $0xd0] sm:$0xff] %v3557_v55  ;;  %v588_v34 = vand.u32 2147483647, %v3555_v21  ;;  %v558_v54 = vmul.f32 1.442695, %v529_v15 }
  0xf3   : > { %3566 = vtanh.f32 %v818_v3  ;;  %v3561_v33 = vpop.eup %3560  ;;  %v719_v10 = vadd.f32 %v671_v20, %v479_v0  ;;  %3192 = vst [vmem:[%s4412_s10 + $0x88] sm:$0xff] %v3559_v8  ;;  %v695_v40 = vmul.f32 %v4652_v60, %v694_v30  ;;  %vm697_vm11 = vcmp.lt.f32.partialorder %v696_v26, 0.0004427343  ;;  %v4709_v24 = vld [vmem:[%s4304_s30 + $0x40] sm:$0xff]  ;;  %v4731_v26 = vld [vmem:[%s4304_s30 + $0x8] sm:$0xff]  ;;  %v4794_v55 = vld [vmem:[%s4304_s30 + $0x30] sm:$0xff] }
  0xf4   : > { %3568 = vlog2.f32 %v582_v18  ;;  %v586_v25 = vadd.f32 1.0, %v585_v32  ;;  %v627_v37 = vadd.f32 1.0, %v3561_v33  ;;  %v630_v38 = vmul.f32 -0.5, %v3561_v33  ;;  %v3563_v47 = vpop.eup %3562  ;;  %v4722_v32 = vld [vmem:[%s4304_s30 + $0x10] sm:$0xff] }
  0xf5   : > { %735 = vst [vmem:[%s4499_s11 + $0x58] sm:$0xff] %v719_v10  ;;  %3570 = vtanh.f32 %v808_v1  ;;  %v633_v14 = vand.u32 2147483647, %v3561_v33  ;;  %v654_v52 = vadd.f32 1.0, %v3563_v47  ;;  %v657_v44 = vmul.f32 -0.5, %v3563_v47 }
  0xf6   : > { %3572 = vlog2.f32 %v627_v37  ;;  %v631_v6 = vadd.f32 1.0, %v630_v38  ;;  %v587_v43 = vmul.f32 %v3555_v21, %v586_v25  ;;  %vm4688_vm12 = vcmp.lt.f32.partialorder %v588_v34, 0.0004427343 }
  0xf7   : > { %v3565_v48 = vpop.eup %3564  ;;  %1253 = vperm.xlu2 %3447, %v4367_v17   ;;  %1249 = vperm.xlu1 %3446, %v4355_v13   ;;  %v766_v41 = vpop.permute.xlu1 %765  ;;  %3574 = vpow2.f32 %v558_v54  ;;  %v658_v57 = vadd.f32 1.0, %v657_v44  ;;  %v660_v60 = vand.u32 2147483647, %v3563_v47  ;;  %vm4700_vm13 = vcmp.lt.f32.partialorder %v633_v14, 0.0004427343 }
  0xf8   : > { %v692_v49 = vmul.f32 0.6931472, %v3565_v48  ;;  %v4684_v39 = vpop.permute.xlu2 %855  ;;  %3576 = vlog2.f32 %v654_v52  ;;  %v811_v17 = vsub.f32 %v766_v41, %v4572_v51  ;;  %v632_v59 = vmul.f32 %v3561_v33, %v631_v6  ;;  %1339 = vperm.xlu0 %3449, %v4709_v24  }
  0xf9   : > { %v3567_v12 = vpop.eup %3566  ;;  %v935_v45 = vsub.f32 %v4684_v39, %v4679_v31  ;;  %v478_v22 = vmax.f32 %v4597_v27, %v4435_v42  ;;  %v659_v21 = vmul.f32 %v3563_v47, %v658_v57  ;;  %vm4715_vm14 = vcmp.lt.f32.partialorder %v660_v60, 0.0004427343 }
  0xfa   : > { %v3569_v19 = vpop.eup %3568  ;;  %3204 = vst [vmem:[%s4412_s10 + $0xe8] sm:$0xff] %v3567_v12  ;;  %v698_v13 = vsel %vm697_vm11, %v695_v40, %v692_v49  ;;  %3578 = vtanh.f32 %v811_v17  ;;  %v810_v10 = vsub.f32 %v4663_v29, %v4572_v51  ;;  %v481_v6 = vmax.f32 %v4621_v61, %v4435_v42  ;;  %v4762_v61 = vld [vmem:[%s4304_s30 + $0x18] sm:$0xff] }
  0xfb   : > { %v584_v53 = vmul.f32 0.6931472, %v3569_v19  ;;  %v3571_v36 = vpop.eup %3570  ;;  %v722_v58 = vadd.f32 %v698_v13, %v482_v5  ;;  %v951_v9 = vand.u32 2147483647, %v935_v45  ;;  %3580 = vtanh.f32 %v805_v4 }
  0xfc   : > { %v3573_v50 = vpop.eup %3572  ;;  %3194 = vst [vmem:[%s4412_s10 + $0x98] sm:$0xff] %v3571_v36  ;;  %v813_v17 = vsub.f32 %v4694_v2, %v4572_v51  ;;  %v919_v63 = vmax.f32 %v4684_v39, %v4679_v31 }
  0xfd   : > { %v590_v11 = vsel %vm4688_vm12, %v587_v43, %v584_v53  ;;  %738 = vst [vmem:[%s4499_s11 + $0x70] sm:$0xff] %v722_v58  ;;  %v629_v62 = vmul.f32 0.6931472, %v3573_v50  ;;  %v3575_v16 = vpop.eup %3574  ;;  %v967_v23 = vsub.f32 0.0, %v951_v9  ;;  %v4755_v43 = vld [vmem:[%s4304_s30 + $0x20] sm:$0xff]  ;;  %v4777_v50 = vld [vmem:[%s4304_s30 + $0x70] sm:$0xff] }
  0xfe   : > { %v710_v0 = vadd.f32 %v590_v11, %v470_v35  ;;  %v3577_v3 = vpop.eup %3576  ;;  %v681_v18 = vadd.f32 1.0, %v3575_v16  ;;  %v684_v15 = vmul.f32 -0.5, %v3575_v16  ;;  %v687_v34 = vand.u32 2147483647, %v3575_v16 }
  0xff   : > { %v635_v28 = vsel %vm4700_vm13, %v632_v59, %v629_v62  ;;  %3451 = vset.pattern.permute.xlu2 %v4212_v46  ;;  %v656_v8 = vmul.f32 0.6931472, %v3577_v3  ;;  %v983_v20 = vmul.f32 1.442695, %v967_v23  ;;  %3450 = vset.pattern.permute.xlu1 %v4212_v46  ;;  %v778_v30 = vpop.permute.xlu1 %777  ;;  %v4734_v46 = vpop.permute.xlu0 %785 }
 0x100   : > { %726 = vst [vmem:[%s4499_s11 + $0x10] sm:$0xff] %v710_v0  ;;  %v715_v27 = vadd.f32 %v635_v28, %v475_v56  ;;  %1315 = vperm.xlu2 %3451, %v4722_v32   ;;  %v4725_v33 = vpop.permute.xlu2 %867  ;;  %v3579_v35 = vpop.eup %3578  ;;  %3582 = vlog2.f32 %v681_v18  ;;  %v814_v1 = vsub.f32 %v778_v30, %v4572_v51  ;;  %1311 = vperm.xlu1 %3450, %v4731_v26   ;;  %v685_v38 = vadd.f32 1.0, %v684_v15  ;;  %v4745_v56 = vld [vmem:[%s4304_s30 + $0x58] sm:$0xff]  ;;  %v4843_v0 = vld [vmem:[%s4304_s30 + $0x68] sm:$0xff] }
 0x101   : > { %v3581_v25 = vpop.eup %3580  ;;  %v662_v37 = vsel %vm4715_vm14, %v659_v21, %v656_v8  ;;  %3584 = vpow2.f32 %v983_v20  ;;  %v938_v29 = vsub.f32 %v4725_v33, %v4679_v31  ;;  %3197 = vst [vmem:[%s4412_s10 + $0xb0] sm:$0xff] %v3579_v35  ;;  %1351 = vperm.xlu0 %3449, %v4745_v56   ;;  %vm4750_vm15 = vcmp.lt.f32.partialorder %v687_v34, 0.0004427343 }
 0x102   : > { %731 = vst [vmem:[%s4499_s11 + $0x38] sm:$0xff] %v715_v27  ;;  %v718_v5 = vadd.f32 %v662_v37, %v478_v22  ;;  %3586 = vtanh.f32 %v814_v1  ;;  %v686_v47 = vmul.f32 %v3575_v16, %v685_v38  ;;  %v4787_v22 = vld [vmem:[%s4304_s30 + $0x38] sm:$0xff]  ;;  %v816_v18 = vsub.f32 %v4734_v46, %v4572_v51 }
 0x103   : > { %3191 = vst [vmem:[%s4412_s10 + $0x80] sm:$0xff] %v3581_v25  ;;  %v954_v54 = vand.u32 2147483647, %v938_v29  ;;  %3588 = vtanh.f32 %v810_v10  ;;  %v4213_v38 = vmov 3  }
 0x104   : > { %734 = vst [vmem:[%s4499_s11 + $0x50] sm:$0xff] %v718_v5 }
 0x105   : > { %v970_v40 = vsub.f32 0.0, %v954_v54  ;;  %v4811_v54 = vld [vmem:[%s4304_s30 + $0x50] sm:$0xff] }
 0x106   : > { %v3583_v48 = vpop.eup %3582 }
 0x107   : > { %v3585_v52 = vpop.eup %3584  ;;  %v683_v44 = vmul.f32 0.6931472, %v3583_v48  ;;  %v989_v12 = vmul.f32 1.442695, %v970_v40  ;;  %v790_v49 = vpop.permute.xlu1 %789  ;;  %v922_v48 = vmax.f32 %v4725_v33, %v4679_v31 }
 0x108   : > { %1323 = vperm.xlu2 %3451, %v4755_v43   ;;  %v4758_v41 = vpop.permute.xlu2 %875  ;;  %v3587_v4 = vpop.eup %3586  ;;  %v1015_v19 = vadd.f32 1.0, %v3585_v52  ;;  %v1018_v7 = vmul.f32 -0.5, %v3585_v52  ;;  %v817_v42 = vsub.f32 %v790_v49, %v4572_v51  ;;  %1319 = vperm.xlu1 %3450, %v4762_v61   ;;  %v1021_v59 = vand.u32 2147483647, %v3585_v52 }
 0x109   : > { %v4767_v13 = vpop.permute.xlu0 %797  ;;  %v3589_v53 = vpop.eup %3588  ;;  %v689_v57 = vsel %vm4750_vm15, %v686_v47, %v683_v44  ;;  %3200 = vst [vmem:[%s4412_s10 + $0xc8] sm:$0xff] %v3587_v4  ;;  %3590 = vpow2.f32 %v989_v12  ;;  %v940_v45 = vsub.f32 %v4758_v41, %v4679_v31  ;;  %1363 = vperm.xlu0 %3449, %v4777_v50   ;;  %v4823_v44 = vld [vmem:[%s4304_s30 + $0x48] sm:$0xff] }
 0x10a   : > { %v721_v36 = vadd.f32 %v689_v57, %v481_v6  ;;  %3592 = vlog2.f32 %v1015_v19  ;;  %3196 = vst [vmem:[%s4412_s10 + $0xa8] sm:$0xff] %v3589_v53  ;;  %v1019_v58 = vadd.f32 1.0, %v1018_v7  ;;  %vm4782_vm0 = vcmp.lt.f32.partialorder %v1021_v59, 0.0004427343 }
 0x10b   : > { %3594 = vtanh.f32 %v817_v42  ;;  %v956_v2 = vand.u32 2147483647, %v940_v45  ;;  %v819_v45 = vsub.f32 %v4767_v13, %v4572_v51 }
 0x10c   : > { %737 = vst [vmem:[%s4499_s11 + $0x68] sm:$0xff] %v721_v36  ;;  %3596 = vtanh.f32 %v813_v17  ;;  %v1020_v9 = vmul.f32 %v3585_v52, %v1019_v58 }
 0x10d   : > { %v972_v60 = vsub.f32 0.0, %v956_v2 }
 0x10f   : > { %v3591_v11 = vpop.eup %3590  ;;  %v993_v62 = vmul.f32 1.442695, %v972_v60  ;;  %v802_v16 = vpop.permute.xlu1 %801 }
 0x110   : > { %1335 = vperm.xlu2 %3451, %v4787_v22   ;;  %v4790_v21 = vpop.permute.xlu2 %887  ;;  %v3593_v23 = vpop.eup %3592  ;;  %v1042_v3 = vadd.f32 1.0, %v3591_v11  ;;  %v1045_v28 = vmul.f32 -0.5, %v3591_v11  ;;  %v820_v39 = vsub.f32 %v802_v16, %v4572_v51  ;;  %1331 = vperm.xlu1 %3450, %v4794_v55   ;;  %v1048_v25 = vand.u32 2147483647, %v3591_v11 }
 0x111   : > { %v4799_v15 = vpop.permute.xlu0 %859  ;;  %v3595_v27 = vpop.eup %3594  ;;  %v1017_v8 = vmul.f32 0.6931472, %v3593_v23  ;;  %3598 = vpow2.f32 %v993_v62  ;;  %v943_v20 = vsub.f32 %v4790_v21, %v4679_v31  ;;  %3453 = vset.pattern.permute.xlu0 %v4213_v38 }
 0x112   : > { %v3597_v30 = vpop.eup %3596  ;;  %3600 = vlog2.f32 %v1042_v3  ;;  %3203 = vst [vmem:[%s4412_s10 + $0xe0] sm:$0xff] %v3595_v27  ;;  %v1046_v35 = vadd.f32 1.0, %v1045_v28  ;;  %1649 = vperm.xlu0 %3453, %v4731_v26   ;;  %vm4818_vm1 = vcmp.lt.f32.partialorder %v1048_v25, 0.0004427343  ;;  %v4853_v28 = vld [vmem:[%s4304_s30 + $0x60] sm:$0xff] }
 0x113   : > { %v1023_v10 = vsel %vm4782_vm0, %v1020_v9, %v1017_v8  ;;  %3602 = vtanh.f32 %v820_v39  ;;  %3199 = vst [vmem:[%s4412_s10 + $0xc0] sm:$0xff] %v3597_v30  ;;  %v959_v1 = vand.u32 2147483647, %v943_v20  ;;  %v924_v20 = vmax.f32 %v4758_v41, %v4679_v31 }
 0x114   : > { %v1159_v46 = vadd.f32 %v1023_v10, %v919_v63  ;;  %3604 = vtanh.f32 %v816_v18  ;;  %v1047_v5 = vmul.f32 %v3591_v11, %v1046_v35  ;;  %v927_v41 = vmax.f32 %v4790_v21, %v4679_v31 }
 0x115   : > { %v975_v37 = vsub.f32 0.0, %v959_v1 }
 0x116   : > { %3207 = vst [vmem:[%s4499_s11 + $0x80] sm:$0xff] %v1159_v46 }
 0x117   : > { %v3599_v29 = vpop.eup %3598  ;;  %v999_v34 = vmul.f32 1.442695, %v975_v37 }
 0x118   : > { %1347 = vperm.xlu2 %3451, %v4811_v54   ;;  %v4814_v47 = vpop.permute.xlu2 %899  ;;  %v3601_v40 = vpop.eup %3600  ;;  %v1060_v14 = vadd.f32 1.0, %v3599_v29  ;;  %v1063_v52 = vmul.f32 -0.5, %v3599_v29  ;;  %1343 = vperm.xlu1 %3450, %v4823_v44   ;;  %v1066_v58 = vand.u32 2147483647, %v3599_v29 }
 0x119   : > { %v4826_v12 = vpop.permute.xlu1 %863  ;;  %v4828_v49 = vpop.permute.xlu0 %879  ;;  %v1044_v19 = vmul.f32 0.6931472, %v3601_v40  ;;  %3606 = vpow2.f32 %v999_v34  ;;  %v946_v33 = vsub.f32 %v4814_v47, %v4679_v31 }
 0x11a   : > { %v3603_v4 = vpop.eup %3602  ;;  %3608 = vlog2.f32 %v1060_v14  ;;  %v937_v42 = vsub.f32 %v4826_v12, %v4679_v31  ;;  %v1064_v53 = vadd.f32 1.0, %v1063_v52  ;;  %1669 = vperm.xlu0 %3453, %v4794_v55   ;;  %vm4848_vm2 = vcmp.lt.f32.partialorder %v1066_v58, 0.0004427343 }
 0x11b   : > { %v3605_v7 = vpop.eup %3604  ;;  %3206 = vst [vmem:[%s4412_s10 + $0xf8] sm:$0xff] %v3603_v4  ;;  %v1050_v17 = vsel %vm4818_vm1, %v1047_v5, %v1044_v19  ;;  %v962_v57 = vand.u32 2147483647, %v946_v33  ;;  %3610 = vtanh.f32 %v819_v45  ;;  %v930_v14 = vmax.f32 %v4814_v47, %v4679_v31 }
 0x11c   : > { %3202 = vst [vmem:[%s4412_s10 + $0xd8] sm:$0xff] %v3605_v7  ;;  %v1162_v36 = vadd.f32 %v1050_v17, %v922_v48  ;;  %v953_v59 = vand.u32 2147483647, %v937_v42  ;;  %v1065_v63 = vmul.f32 %v3599_v29, %v1064_v53  ;;  %v936_v29 = vsub.f32 %v4799_v15, %v4679_v31  ;;  %v4883_v17 = vld [vmem:[%s4304_s30 + $0x78] sm:$0xff] }
 0x11d   : > { %v978_v2 = vsub.f32 0.0, %v962_v57  ;;  %v4889_v57 = vld [vmem:[%s4304_s30] sm:$0xff] }
 0x11e   : > { %3210 = vst [vmem:[%s4499_s11 + $0x98] sm:$0xff] %v1162_v36  ;;  %v969_v60 = vsub.f32 0.0, %v953_v59  ;;  %v952_v40 = vand.u32 2147483647, %v936_v29  ;;  %v921_v59 = vmax.f32 %v4826_v12, %v4679_v31 }
 0x11f   : > { %v3607_v11 = vpop.eup %3606  ;;  %v1005_v9 = vmul.f32 1.442695, %v978_v2 }
 0x120   : > { %1359 = vperm.xlu2 %3451, %v4843_v0   ;;  %v4846_v62 = vpop.permute.xlu2 %911  ;;  %v3609_v51 = vpop.eup %3608  ;;  %v1087_v16 = vadd.f32 1.0, %v3607_v11  ;;  %v1090_v23 = vmul.f32 -0.5, %v3607_v11  ;;  %v987_v3 = vmul.f32 1.442695, %v969_v60  ;;  %1355 = vperm.xlu1 %3450, %v4853_v28   ;;  %v1093_v37 = vand.u32 2147483647, %v3607_v11 }
 0x121   : > { %v4856_v39 = vpop.permute.xlu1 %871  ;;  %v4858_v18 = vpop.permute.xlu0 %891  ;;  %v1062_v27 = vmul.f32 0.6931472, %v3609_v51  ;;  %3612 = vpow2.f32 %v1005_v9  ;;  %v949_v8 = vsub.f32 %v4846_v62, %v4679_v31  ;;  %v968_v42 = vsub.f32 0.0, %v952_v40  ;;  %v4897_v9 = vld [vmem:[%s4390_s7] sm:$0xff] }
 0x122   : > { %3614 = vlog2.f32 %v1087_v16  ;;  %v1091_v30 = vadd.f32 1.0, %v1090_v23  ;;  %v3611_v10 = vpop.eup %3610  ;;  %v939_v46 = vsub.f32 %v4856_v39, %v4679_v31  ;;  %1681 = vperm.xlu0 %3453, %v4823_v44   ;;  %vm4878_vm3 = vcmp.lt.f32.partialorder %v1093_v37, 0.0004427343 }
 0x123   : > { %v1068_v35 = vsel %vm4848_vm2, %v1065_v63, %v1062_v27  ;;  %3616 = vpow2.f32 %v987_v3  ;;  %v965_v1 = vand.u32 2147483647, %v949_v8  ;;  %3205 = vst [vmem:[%s4412_s10 + $0xf0] sm:$0xff] %v3611_v10  ;;  %v4900_v51 = vperm.slane %v4897_v9, 2 }
 0x124   : > { %v1164_v25 = vadd.f32 %v1068_v35, %v924_v20  ;;  %v955_v34 = vand.u32 2147483647, %v939_v46  ;;  %v1092_v6 = vmul.f32 %v3607_v11, %v1091_v30  ;;  %v985_v8 = vmul.f32 1.442695, %v968_v42 }
 0x125   : > { %v981_v5 = vsub.f32 0.0, %v965_v1  ;;  %v933_v30 = vmax.f32 %v4846_v62, %v4679_v31  ;;  %v923_v1 = vmax.f32 %v4856_v39, %v4679_v31  ;;  %v920_v46 = vmax.f32 %v4799_v15, %v4679_v31 }
 0x126   : > { %3212 = vst [vmem:[%s4499_s11 + $0xa8] sm:$0xff] %v1164_v25  ;;  %v971_v4 = vsub.f32 0.0, %v955_v34  ;;  %v941_v25 = vsub.f32 %v4828_v49, %v4679_v31 }
 0x127   : > { %v3613_v48 = vpop.eup %3612  ;;  %v1011_v52 = vmul.f32 1.442695, %v981_v5 }
 0x128   : > { %3452 = vset.pattern.permute.xlu2 %v4213_v38  ;;  %v3615_v19 = vpop.eup %3614  ;;  %v1114_v7 = vadd.f32 1.0, %v3613_v48  ;;  %v1117_v21 = vmul.f32 -0.5, %v3613_v48  ;;  %1367 = vperm.xlu1 %3450, %v4883_v17   ;;  %v991_v2 = vmul.f32 1.442695, %v971_v4  ;;  %v1120_v11 = vand.u32 2147483647, %v3613_v48 }
 0x129   : > { %v4886_v53 = vpop.permute.xlu1 %883  ;;  %1645 = vperm.xlu2 %3452, %v4889_v57   ;;  %v1198_v45 = vpop.permute.xlu2 %1197  ;;  %v1089_v58 = vmul.f32 0.6931472, %v3615_v19  ;;  %3618 = vpow2.f32 %v1011_v52  ;;  %v944_v19 = vsub.f32 %v4858_v18, %v4679_v31 }
 0x12a   : > { %v3617_v36 = vpop.eup %3616  ;;  %v4894_v60 = vpop.permute.xlu0 %903  ;;  %3620 = vlog2.f32 %v1114_v7  ;;  %v1118_v16 = vadd.f32 1.0, %v1117_v21  ;;  %v942_v10 = vsub.f32 %v4886_v53, %v4679_v31  ;;  %v1258_v35 = vsub.f32 %v1198_v45, %v4900_v51  ;;  %1693 = vperm.xlu0 %3453, %v4853_v28  }
 0x12b   : > { %v1033_v63 = vadd.f32 1.0, %v3617_v36  ;;  %v1095_v13 = vsel %vm4878_vm3, %v1092_v6, %v1089_v58  ;;  %v1036_v23 = vmul.f32 -0.5, %v3617_v36  ;;  %3622 = vpow2.f32 %v991_v2 }
 0x12c   : > { %v1167_v3 = vadd.f32 %v1095_v13, %v927_v41  ;;  %v1039_v27 = vand.u32 2147483647, %v3617_v36  ;;  %v1119_v29 = vmul.f32 %v3613_v48, %v1118_v16  ;;  %vm4917_vm4 = vcmp.lt.f32.partialorder %v1120_v11, 0.0004427343 }
 0x12d   : > { %3624 = vlog2.f32 %v1033_v63  ;;  %v1037_v20 = vadd.f32 1.0, %v1036_v23  ;;  %v958_v34 = vand.u32 2147483647, %v942_v10  ;;  %v957_v11 = vand.u32 2147483647, %v941_v25 }
 0x12e   : > { %3215 = vst [vmem:[%s4499_s11 + $0xc0] sm:$0xff] %v1167_v3  ;;  %3626 = vpow2.f32 %v985_v8  ;;  %vm4921_vm5 = vcmp.lt.f32.partialorder %v1039_v27, 0.0004427343 }
 0x12f   : > { %v3619_v37 = vpop.eup %3618  ;;  %3628 = vtanh.f32 %v1258_v35  ;;  %v1038_v21 = vmul.f32 %v3617_v36, %v1037_v20  ;;  %v974_v45 = vsub.f32 0.0, %v958_v34  ;;  %v973_v40 = vsub.f32 0.0, %v957_v11 }
 0x130   : > { %v3621_v41 = vpop.eup %3620  ;;  %v1141_v6 = vadd.f32 1.0, %v3619_v37  ;;  %v1144_v52 = vmul.f32 -0.5, %v3619_v37  ;;  %3454 = vset.pattern.permute.xlu1 %v4213_v38  ;;  %v1147_v42 = vand.u32 2147483647, %v3619_v37 }
 0x131   : > { %v4926_v4 = vpop.permute.xlu1 %895  ;;  %1657 = vperm.xlu2 %3452, %v4762_v61   ;;  %v1210_v48 = vpop.permute.xlu2 %1209  ;;  %v1116_v7 = vmul.f32 0.6931472, %v3621_v41  ;;  %1653 = vperm.xlu1 %3454, %v4722_v32   ;;  %v997_v20 = vmul.f32 1.442695, %v974_v45 }
 0x132   : > { %v3623_v33 = vpop.eup %3622  ;;  %v4932_v58 = vpop.permute.xlu0 %915  ;;  %3630 = vlog2.f32 %v1141_v6  ;;  %v945_v63 = vsub.f32 %v4926_v4, %v4679_v31  ;;  %v1145_v23 = vadd.f32 1.0, %v1144_v52  ;;  %1705 = vperm.xlu0 %3453, %v4883_v17   ;;  %vm4950_vm6 = vcmp.lt.f32.partialorder %v1147_v42, 0.0004427343  ;;  %v4964_v42 = vld [vmem:[%s4304_s30 + $0x28] sm:$0xff] }
 0x133   : > { %v3625_v2 = vpop.eup %3624  ;;  %v1051_v38 = vadd.f32 1.0, %v3623_v33  ;;  %v1122_v13 = vsel %vm4917_vm4, %v1119_v29, %v1116_v7  ;;  %v1054_v36 = vmul.f32 -0.5, %v3623_v33  ;;  %v1057_v8 = vand.u32 2147483647, %v3623_v33 }
 0x134   : > { %v1035_v16 = vmul.f32 0.6931472, %v3625_v2  ;;  %v3627_v3 = vpop.eup %3626  ;;  %v1170_v27 = vadd.f32 %v1122_v13, %v930_v14  ;;  %v947_v29 = vsub.f32 %v4894_v60, %v4679_v31  ;;  %v961_v6 = vand.u32 2147483647, %v945_v63 }
 0x135   : > { %3632 = vlog2.f32 %v1051_v38  ;;  %v3629_v10 = vpop.eup %3628  ;;  %v1055_v25 = vadd.f32 1.0, %v1054_v36  ;;  %v1024_v5 = vadd.f32 1.0, %v3627_v3  ;;  %v1027_v14 = vmul.f32 -0.5, %v3627_v3 }
 0x136   : > { %v1041_v35 = vsel %vm4921_vm5, %v1038_v21, %v1035_v16  ;;  %3218 = vst [vmem:[%s4499_s11 + $0xd8] sm:$0xff] %v1170_v27  ;;  %v1030_v34 = vand.u32 2147483647, %v3627_v3  ;;  %3634 = vpow2.f32 %v997_v20  ;;  %v1146_v7 = vmul.f32 %v3619_v37, %v1145_v23 }
 0x137   : > { %v1161_v47 = vadd.f32 %v1041_v35, %v921_v59  ;;  %3636 = vlog2.f32 %v1024_v5  ;;  %3224 = vst [vmem:[%s4412_s10 + $0x108] sm:$0xff] %v3629_v10  ;;  %vm4956_vm7 = vcmp.lt.f32.partialorder %v1057_v8, 0.0004427343  ;;  %v1028_v59 = vadd.f32 1.0, %v1027_v14 }
 0x138   : > { %v3631_v52 = vpop.eup %3630  ;;  %v1261_v21 = vsub.f32 %v1210_v48, %v4900_v51  ;;  %v1056_v11 = vmul.f32 %v3623_v33, %v1055_v25  ;;  %v995_v63 = vmul.f32 1.442695, %v973_v40  ;;  %v977_v13 = vsub.f32 0.0, %v961_v6 }
 0x139   : > { %3209 = vst [vmem:[%s4499_s11 + $0x90] sm:$0xff] %v1161_v47  ;;  %v4961_v45 = vpop.permute.xlu1 %907  ;;  %1665 = vperm.xlu2 %3452, %v4964_v42   ;;  %v1218_v2 = vpop.permute.xlu2 %1217  ;;  %v1143_v38 = vmul.f32 0.6931472, %v3631_v52  ;;  %1661 = vperm.xlu1 %3454, %v4755_v43   ;;  %vm4970_vm8 = vcmp.lt.f32.partialorder %v1030_v34, 0.0004427343  ;;  %v1029_v35 = vmul.f32 %v3627_v3, %v1028_v59 }
 0x13a   : > { %v4968_v37 = vpop.permute.xlu0 %1201  ;;  %3638 = vtanh.f32 %v1261_v21  ;;  %v960_v48 = vand.u32 2147483647, %v944_v19  ;;  %v948_v36 = vsub.f32 %v4961_v45, %v4679_v31  ;;  %v1003_v8 = vmul.f32 1.442695, %v977_v13 }
 0x13b   : > { %v3633_v16 = vpop.eup %3632  ;;  %v1149_v33 = vsel %vm4950_vm6, %v1146_v7, %v1143_v38  ;;  %3640 = vpow2.f32 %v995_v63  ;;  %v1263_v41 = vsub.f32 %v1218_v2, %v4900_v51  ;;  %v963_v21 = vand.u32 2147483647, %v947_v29 }
 0x13c   : > { %v1053_v27 = vmul.f32 0.6931472, %v3633_v16  ;;  %v3635_v20 = vpop.eup %3634  ;;  %v1173_v10 = vadd.f32 %v1149_v33, %v933_v30  ;;  %v976_v25 = vsub.f32 0.0, %v960_v48  ;;  %v964_v5 = vand.u32 2147483647, %v948_v36 }
 0x13d   : > { %v3637_v19 = vpop.eup %3636  ;;  %v1078_v14 = vadd.f32 1.0, %v3635_v20  ;;  %v1081_v34 = vmul.f32 -0.5, %v3635_v20  ;;  %3642 = vpow2.f32 %v1003_v8  ;;  %v926_v30 = vmax.f32 %v4886_v53, %v4679_v31 }
 0x13e   : > { %v1059_v47 = vsel %vm4956_vm7, %v1056_v11, %v1053_v27  ;;  %3221 = vst [vmem:[%s4499_s11 + $0xf0] sm:$0xff] %v1173_v10  ;;  %v1026_v6 = vmul.f32 0.6931472, %v3637_v19  ;;  %v1001_v62 = vmul.f32 1.442695, %v976_v25  ;;  %v980_v52 = vsub.f32 0.0, %v964_v5 }
 0x13f   : > { %v1163_v40 = vadd.f32 %v1059_v47, %v923_v1  ;;  %3644 = vlog2.f32 %v1078_v14  ;;  %v1084_v3 = vand.u32 2147483647, %v3635_v20  ;;  %v1082_v59 = vadd.f32 1.0, %v1081_v34 }
 0x140   : > { %v3639_v7 = vpop.eup %3638  ;;  %v1032_v12 = vsel %vm4970_vm8, %v1029_v35, %v1026_v6  ;;  %3646 = vpow2.f32 %v1001_v62  ;;  %v925_v2 = vmax.f32 %v4828_v49, %v4679_v31  ;;  %v1009_v38 = vmul.f32 1.442695, %v980_v52 }
 0x141   : > { %3211 = vst [vmem:[%s4499_s11 + $0xa0] sm:$0xff] %v1163_v40  ;;  %1677 = vperm.xlu2 %3452, %v4709_v24   ;;  %v1230_v39 = vpop.permute.xlu2 %1229  ;;  %v3641_v1 = vpop.eup %3640  ;;  %v1160_v53 = vadd.f32 %v1032_v12, %v920_v46  ;;  %3648 = vtanh.f32 %v1263_v41  ;;  %1673 = vperm.xlu1 %3454, %v4787_v22   ;;  %v929_v24 = vmax.f32 %v4926_v4, %v4679_v31  ;;  %v979_v13 = vsub.f32 0.0, %v963_v21 }
 0x142   : > { %3227 = vst [vmem:[%s4412_s10 + $0x120] sm:$0xff] %v3639_v7  ;;  %v1194_v11 = vpop.permute.xlu1 %1193  ;;  %v1069_v63 = vadd.f32 1.0, %v3641_v1  ;;  %v1072_v29 = vmul.f32 -0.5, %v3641_v1  ;;  %v5003_v16 = vpop.permute.xlu0 %1221  ;;  %vm5006_vm9 = vcmp.lt.f32.partialorder %v1084_v3, 0.0004427343  ;;  %v928_v46 = vmax.f32 %v4858_v18, %v4679_v31 }
 0x143   : > { %3208 = vst [vmem:[%s4499_s11 + $0x88] sm:$0xff] %v1160_v53  ;;  %3650 = vpow2.f32 %v1009_v38  ;;  %v1266_v23 = vsub.f32 %v1230_v39, %v4900_v51  ;;  %v3643_v48 = vpop.eup %3642  ;;  %v1083_v36 = vmul.f32 %v3635_v20, %v1082_v59  ;;  %v1007_v33 = vmul.f32 1.442695, %v979_v13 }
 0x144   : > { %3652 = vlog2.f32 %v1069_v63  ;;  %v1257_v27 = vsub.f32 %v1194_v11, %v4900_v51  ;;  %v1073_v10 = vadd.f32 1.0, %v1072_v29  ;;  %v1105_v35 = vadd.f32 1.0, %v3643_v48 }
 0x145   : > { %v3645_v8 = vpop.eup %3644  ;;  %v1108_v25 = vmul.f32 -0.5, %v3643_v48  ;;  %3654 = vtanh.f32 %v1266_v23  ;;  %v1075_v47 = vand.u32 2147483647, %v3641_v1  ;;  %v950_v14 = vsub.f32 %v4932_v58, %v4679_v31 }
 0x146   : > { %v3647_v5 = vpop.eup %3646  ;;  %v1080_v19 = vmul.f32 0.6931472, %v3645_v8  ;;  %3656 = vpow2.f32 %v1007_v33  ;;  %v1111_v41 = vand.u32 2147483647, %v3643_v48  ;;  %v1074_v59 = vmul.f32 %v3641_v1, %v1073_v10 }
 0x147   : > { %v3649_v34 = vpop.eup %3648  ;;  %3658 = vlog2.f32 %v1105_v35  ;;  %v1109_v20 = vadd.f32 1.0, %v1108_v25  ;;  %v1096_v40 = vadd.f32 1.0, %v3647_v5  ;;  %v1099_v62 = vmul.f32 -0.5, %v3647_v5 }
 0x148   : > { %v1086_v6 = vsel %vm5006_vm9, %v1083_v36, %v1080_v19  ;;  %v1102_v3 = vand.u32 2147483647, %v3647_v5  ;;  %3229 = vst [vmem:[%s4412_s10 + $0x130] sm:$0xff] %v3649_v34  ;;  %3660 = vtanh.f32 %v1257_v27  ;;  %v966_v21 = vand.u32 2147483647, %v950_v14 }
 0x149   : > { %1689 = vperm.xlu2 %3452, %v4745_v56   ;;  %v1242_v52 = vpop.permute.xlu2 %1241  ;;  %v5020_v7 = vpop.eup %3650  ;;  %v1166_v12 = vadd.f32 %v1086_v6, %v926_v30  ;;  %3662 = vlog2.f32 %v1096_v40  ;;  %1685 = vperm.xlu1 %3454, %v4811_v54   ;;  %vm5023_vm10 = vcmp.lt.f32.partialorder %v1075_v47, 0.0004427343  ;;  %v1100_v11 = vadd.f32 1.0, %v1099_v62 }
 0x14a   : > { %v1206_v39 = vpop.permute.xlu1 %1205  ;;  %v3653_v53 = vpop.eup %3652  ;;  %v1132_v63 = vadd.f32 1.0, %v5020_v7  ;;  %v1135_v56 = vmul.f32 -0.5, %v5020_v7  ;;  %v1110_v1 = vmul.f32 %v3643_v48, %v1109_v20  ;;  %vm5030_vm11 = vcmp.lt.f32.partialorder %v1111_v41, 0.0004427343 }
 0x14b   : > { %v3655_v29 = vpop.eup %3654  ;;  %3214 = vst [vmem:[%s4499_s11 + $0xb8] sm:$0xff] %v1166_v12  ;;  %v1071_v30 = vmul.f32 0.6931472, %v3653_v53  ;;  %v982_v15 = vsub.f32 0.0, %v966_v21  ;;  %vm5034_vm12 = vcmp.lt.f32.partialorder %v1102_v3, 0.0004427343  ;;  %v1269_v27 = vsub.f32 %v1242_v52, %v4900_v51  ;;  %v5040_v8 = vpop.permute.xlu0 %1233 }
 0x14c   : > { %v3657_v23 = vpop.eup %3656  ;;  %3664 = vlog2.f32 %v1132_v63  ;;  %v1136_v33 = vadd.f32 1.0, %v1135_v56  ;;  %3232 = vst [vmem:[%s4412_s10 + $0x148] sm:$0xff] %v3655_v29  ;;  %v1138_v35 = vand.u32 2147483647, %v5020_v7  ;;  %v1101_v20 = vmul.f32 %v3647_v5, %v1100_v11  ;;  %v5073_v11 = vld [vmem:[%s4390_s7 + $0x8] sm:$0xf] }
 0x14d   : > { %v3659_v48 = vpop.eup %3658  ;;  %v1077_v10 = vsel %vm5023_vm10, %v1074_v59, %v1071_v30  ;;  %v1123_v25 = vadd.f32 1.0, %v3657_v23  ;;  %v1126_v19 = vmul.f32 -0.5, %v3657_v23  ;;  %v1260_v41 = vsub.f32 %v1206_v39, %v4900_v51 }
 0x14e   : > { %v3661_v47 = vpop.eup %3660  ;;  %v1165_v14 = vadd.f32 %v1077_v10, %v925_v2  ;;  %v1107_v34 = vmul.f32 0.6931472, %v3659_v48  ;;  %v1137_v6 = vmul.f32 %v5020_v7, %v1136_v33  ;;  %v1013_v62 = vmul.f32 1.442695, %v982_v15 }
 0x14f   : > { %v3663_v40 = vpop.eup %3662  ;;  %3666 = vlog2.f32 %v1123_v25  ;;  %3223 = vst [vmem:[%s4412_s10 + $0x100] sm:$0xff] %v3661_v47  ;;  %v1127_v12 = vadd.f32 1.0, %v1126_v19  ;;  %v4214_v59 = vmov 9   ;;  %v1129_v5 = vand.u32 2147483647, %v3657_v23 }
 0x150   : > { %3213 = vst [vmem:[%s4499_s11 + $0xb0] sm:$0xff] %v1165_v14  ;;  %v1113_v3 = vsel %vm5030_vm11, %v1110_v1, %v1107_v34  ;;  %v1098_v52 = vmul.f32 0.6931472, %v3663_v40  ;;  %3668 = vtanh.f32 %v1269_v27  ;;  %3457 = vset.pattern.permute.xlu0 %v4214_v59  ;;  %v1259_v4 = vsub.f32 %v4968_v37, %v4900_v51 }
 0x151   : > { %1701 = vperm.xlu2 %3452, %v4777_v50   ;;  %v1254_v49 = vpop.permute.xlu2 %1253  ;;  %v1169_v2 = vadd.f32 %v1113_v3, %v929_v24  ;;  %3670 = vpow2.f32 %v1013_v62  ;;  %1697 = vperm.xlu1 %3454, %v4843_v0   ;;  %v932_v63 = vmax.f32 %v4961_v45, %v4679_v31  ;;  %vm1139_vm13 = vcmp.lt.f32.partialorder %v1138_v35, 0.0004427343 }
 0x152   : > { %v1272_v7 = vsub.f32 %v1254_v49, %v4900_v51  ;;  %v1214_v21 = vpop.permute.xlu1 %1213  ;;  %1767 = vperm.xlu0 %3457, %v4722_v32   ;;  %v3665_v39 = vpop.eup %3664  ;;  %v1104_v50 = vsel %vm5034_vm12, %v1101_v20, %v1098_v52  ;;  %3672 = vtanh.f32 %v1260_v41  ;;  %v1264_v32 = vsub.f32 %v5003_v16, %v4900_v51 }
 0x153   : > { %v1262_v53 = vsub.f32 %v1214_v21, %v4900_v51  ;;  %3217 = vst [vmem:[%s4499_s11 + $0xd0] sm:$0xff] %v1169_v2  ;;  %v1168_v24 = vadd.f32 %v1104_v50, %v928_v46  ;;  %v1134_v38 = vmul.f32 0.6931472, %v3665_v39  ;;  %v1128_v56 = vmul.f32 %v3657_v23, %v1127_v12  ;;  %v1246_v1 = vpop.permute.xlu0 %1245 }
 0x154   : > { %3674 = vtanh.f32 %v1272_v7  ;;  %v931_v18 = vmax.f32 %v4894_v60, %v4679_v31  ;;  %vm5080_vm14 = vcmp.lt.f32.partialorder %v1129_v5, 0.0004427343  ;;  %v5085_v15 = vperm.slane %v5073_v11, 0 }
 0x155   : > { %3676 = vtanh.f32 %v1262_v53  ;;  %v3667_v37 = vpop.eup %3666  ;;  %3216 = vst [vmem:[%s4499_s11 + $0xc8] sm:$0xff] %v1168_v24  ;;  %v1140_v29 = vsel %vm1139_vm13, %v1137_v6, %v1134_v38  ;;  %v1267_v25 = vsub.f32 %v5040_v8, %v4900_v51  ;;  %v934_v3 = vmax.f32 %v4932_v58, %v4679_v31 }
 0x156   : > { %3678 = vtanh.f32 %v1259_v4  ;;  %v3669_v16 = vpop.eup %3668  ;;  %v1172_v30 = vadd.f32 %v1140_v29, %v932_v63  ;;  %v1125_v45 = vmul.f32 0.6931472, %v3667_v37 }
 0x157   : > { %3680 = vtanh.f32 %v1264_v32  ;;  %v3671_v13 = vpop.eup %3670  ;;  %3235 = vst [vmem:[%s4412_s10 + $0x160] sm:$0xff] %v3669_v16 }
 0x158   : > { %v3673_v23 = vpop.eup %3672  ;;  %3220 = vst [vmem:[%s4499_s11 + $0xe8] sm:$0xff] %v1172_v30  ;;  %v1131_v60 = vsel %vm5080_vm14, %v1128_v56, %v1125_v45  ;;  %v1150_v36 = vadd.f32 1.0, %v3671_v13  ;;  %v1153_v33 = vmul.f32 -0.5, %v3671_v13  ;;  %v1156_v8 = vand.u32 2147483647, %v3671_v13 }
 0x159   : > { %3456 = vset.pattern.permute.xlu2 %v4214_v59  ;;  %v1171_v48 = vadd.f32 %v1131_v60, %v931_v18  ;;  %3226 = vst [vmem:[%s4412_s10 + $0x118] sm:$0xff] %v3673_v23  ;;  %3455 = vset.pattern.permute.xlu1 %v4214_v59 }
 0x15a   : > { %v3675_v27 = vpop.eup %3674  ;;  %v1226_v10 = vpop.permute.xlu1 %1225  ;;  %1787 = vperm.xlu0 %3457, %v4787_v22   ;;  %3682 = vlog2.f32 %v1150_v36  ;;  %1763 = vperm.xlu2 %3456, %v4731_v26   ;;  %v1154_v22 = vadd.f32 1.0, %v1153_v33  ;;  %v1270_v26 = vsub.f32 %v1246_v1, %v4900_v51  ;;  %vm5110_vm15 = vcmp.lt.f32.partialorder %v1156_v8, 0.0004427343 }
 0x15b   : > { %v5093_v35 = vpop.permute.xlu2 %1315  ;;  %v3677_v19 = vpop.eup %3676  ;;  %3238 = vst [vmem:[%s4412_s10 + $0x178] sm:$0xff] %v3675_v27  ;;  %v1265_v47 = vsub.f32 %v1226_v10, %v4900_v51  ;;  %1759 = vperm.xlu1 %3455, %v4889_v57   ;;  %3684 = vtanh.f32 %v1267_v25  ;;  %v4215_v27 = vmov 4  }
 0x15c   : > { %v3679_v14 = vpop.eup %3678  ;;  %3219 = vst [vmem:[%s4499_s11 + $0xe0] sm:$0xff] %v1171_v48  ;;  %v1389_v34 = vsub.f32 %v5093_v35, %v5085_v15  ;;  %v1155_v40 = vmul.f32 %v3671_v13, %v1154_v22  ;;  %v5114_v12 = vpop.permute.xlu0 %1307  ;;  %v1373_v25 = vmax.f32 %v5093_v35, %v5085_v15 }
 0x15d   : > { %v3681_v20 = vpop.eup %3680  ;;  %3228 = vst [vmem:[%s4412_s10 + $0x128] sm:$0xff] %v3677_v19  ;;  %3686 = vtanh.f32 %v1265_v47 }
 0x15e   : > { %3225 = vst [vmem:[%s4412_s10 + $0x110] sm:$0xff] %v3679_v14  ;;  %v1405_v41 = vand.u32 2147483647, %v1389_v34  ;;  %3688 = vtanh.f32 %v1270_v26  ;;  %v5156_v14 = vld [vmem:[%s4304_s30 + $0x40] sm:$0xff] }
 0x15f   : > { %3230 = vst [vmem:[%s4412_s10 + $0x138] sm:$0xff] %v3681_v20 }
 0x160   : > { %v1421_v6 = vsub.f32 0.0, %v1405_v41  ;;  %v3683_v62 = vpop.eup %3682 }
 0x161   : > { %v3685_v59 = vpop.eup %3684  ;;  %v1152_v49 = vmul.f32 0.6931472, %v3683_v62 }
 0x162   : > { %v1439_v2 = vmul.f32 1.442695, %v1421_v6  ;;  %v1238_v5 = vpop.permute.xlu1 %1237  ;;  %1799 = vperm.xlu0 %3457, %v4811_v54   ;;  %3233 = vst [vmem:[%s4412_s10 + $0x150] sm:$0xff] %v3685_v59  ;;  %1775 = vperm.xlu2 %3456, %v4755_v43  }
 0x163   : > { %v5117_v7 = vpop.permute.xlu2 %1323  ;;  %v3687_v21 = vpop.eup %3686  ;;  %v1268_v31 = vsub.f32 %v1238_v5, %v4900_v51  ;;  %1771 = vperm.xlu1 %3455, %v4762_v61   ;;  %v1158_v39 = vsel %vm5110_vm15, %v1155_v40, %v1152_v49  ;;  %v1387_v61 = vsub.f32 %v5114_v12, %v5085_v15 }
 0x164   : > { %v1391_v58 = vsub.f32 %v5117_v7, %v5085_v15  ;;  %3231 = vst [vmem:[%s4412_s10 + $0x140] sm:$0xff] %v3687_v21  ;;  %3690 = vpow2.f32 %v1439_v2  ;;  %v1174_v54 = vadd.f32 %v1158_v39, %v934_v3  ;;  %v3689_v4 = vpop.eup %3688  ;;  %v5141_v46 = vpop.permute.xlu0 %1327 }
 0x165   : > { %3692 = vtanh.f32 %v1268_v31  ;;  %3236 = vst [vmem:[%s4412_s10 + $0x168] sm:$0xff] %v3689_v4  ;;  %v1392_v6 = vsub.f32 %v5141_v46, %v5085_v15  ;;  %v1375_v31 = vmax.f32 %v5117_v7, %v5085_v15 }
 0x166   : > { %v1407_v50 = vand.u32 2147483647, %v1391_v58  ;;  %3222 = vst [vmem:[%s4499_s11 + $0xf8] sm:$0xff] %v1174_v54 }
 0x168   : > { %v1423_v53 = vsub.f32 0.0, %v1407_v50 }
 0x16a   : > { %v1443_v24 = vmul.f32 1.442695, %v1423_v53  ;;  %v3691_v43 = vpop.eup %3690  ;;  %v1250_v38 = vpop.permute.xlu1 %1249  ;;  %1811 = vperm.xlu0 %3457, %v4843_v0   ;;  %1783 = vperm.xlu2 %3456, %v4794_v55   ;;  %v1403_v0 = vand.u32 2147483647, %v1387_v61 }
 0x16b   : > { %v5131_v32 = vpop.permute.xlu2 %1335  ;;  %v3693_v63 = vpop.eup %3692  ;;  %v1485_v56 = vadd.f32 1.0, %v3691_v43  ;;  %v1488_v37 = vmul.f32 -0.5, %v3691_v43  ;;  %1779 = vperm.xlu1 %3455, %v4964_v42   ;;  %v1271_v29 = vsub.f32 %v1250_v38, %v4900_v51  ;;  %v1491_v1 = vand.u32 2147483647, %v3691_v43  ;;  %v5182_v38 = vld [vmem:[%s4304_s30 + $0x58] sm:$0xff] }
 0x16c   : > { %3694 = vpow2.f32 %v1443_v24  ;;  %3234 = vst [vmem:[%s4412_s10 + $0x158] sm:$0xff] %v3693_v63  ;;  %v1394_v18 = vsub.f32 %v5131_v32, %v5085_v15  ;;  %v1419_v45 = vsub.f32 0.0, %v1403_v0  ;;  %v5169_v26 = vpop.permute.xlu0 %1339  ;;  %v1378_v0 = vmax.f32 %v5131_v32, %v5085_v15 }
 0x16d   : > { %3696 = vlog2.f32 %v1485_v56  ;;  %v1489_v16 = vadd.f32 1.0, %v1488_v37  ;;  %vm5148_vm0 = vcmp.lt.f32.partialorder %v1491_v1, 0.0004427343 }
 0x16e   : > { %3698 = vtanh.f32 %v1271_v29  ;;  %v1410_v30 = vand.u32 2147483647, %v1394_v18  ;;  %v1435_v55 = vmul.f32 1.442695, %v1419_v45 }
 0x16f   : > { %v1490_v60 = vmul.f32 %v3691_v43, %v1489_v16 }
 0x170   : > { %v1426_v13 = vsub.f32 0.0, %v1410_v30  ;;  %3700 = vpow2.f32 %v1435_v55 }
 0x172   : > { %v3695_v23 = vpop.eup %3694  ;;  %v1449_v51 = vmul.f32 1.442695, %v1426_v13  ;;  %3458 = vset.pattern.permute.xlu0 %v4215_v27  ;;  %1795 = vperm.xlu2 %3456, %v4823_v44   ;;  %v5159_v22 = vpop.permute.xlu1 %1311 }
 0x173   : > { %v1503_v36 = vadd.f32 1.0, %v3695_v23  ;;  %v1506_v33 = vmul.f32 -0.5, %v3695_v23  ;;  %v5144_v48 = vpop.permute.xlu2 %1347  ;;  %v3697_v10 = vpop.eup %3696  ;;  %1791 = vperm.xlu1 %3455, %v5156_v14   ;;  %2097 = vperm.xlu0 %3458, %v4889_v57   ;;  %v1388_v44 = vsub.f32 %v5159_v22, %v5085_v15  ;;  %v1509_v40 = vand.u32 2147483647, %v3695_v23 }
 0x174   : > { %v1397_v47 = vsub.f32 %v5144_v48, %v5085_v15  ;;  %v3699_v34 = vpop.eup %3698  ;;  %v1487_v20 = vmul.f32 0.6931472, %v3697_v10  ;;  %v1408_v57 = vand.u32 2147483647, %v1392_v6  ;;  %v1381_v1 = vmax.f32 %v5144_v48, %v5085_v15  ;;  %v5203_v55 = vpop.permute.xlu0 %1351 }
 0x175   : > { %3702 = vlog2.f32 %v1503_v36  ;;  %v1507_v35 = vadd.f32 1.0, %v1506_v33  ;;  %3237 = vst [vmem:[%s4412_s10 + $0x170] sm:$0xff] %v3699_v34  ;;  %v1404_v52 = vand.u32 2147483647, %v1388_v44  ;;  %vm5174_vm1 = vcmp.lt.f32.partialorder %v1509_v40, 0.0004427343 }
 0x176   : > { %3704 = vpow2.f32 %v1449_v51  ;;  %v1413_v8 = vand.u32 2147483647, %v1397_v47  ;;  %v1493_v41 = vsel %vm5148_vm0, %v1490_v60, %v1487_v20  ;;  %v3701_v59 = vpop.eup %3700  ;;  %v1424_v43 = vsub.f32 0.0, %v1408_v57  ;;  %v5217_v44 = vld [vmem:[%s4304_s30 + $0x70] sm:$0xff] }
 0x177   : > { %v1613_v62 = vadd.f32 %v1493_v41, %v1373_v25  ;;  %v1508_v49 = vmul.f32 %v3695_v23, %v1507_v35  ;;  %v1420_v5 = vsub.f32 0.0, %v1404_v52  ;;  %v1467_v39 = vadd.f32 1.0, %v3701_v59 }
 0x178   : > { %v1429_v3 = vsub.f32 0.0, %v1413_v8  ;;  %v1470_v54 = vmul.f32 -0.5, %v3701_v59  ;;  %v1473_v18 = vand.u32 2147483647, %v3701_v59  ;;  %v1445_v30 = vmul.f32 1.442695, %v1424_v43 }
 0x179   : > { %3241 = vst [vmem:[%s4499_s11 + $0x110] sm:$0xff] %v1613_v62  ;;  %v1437_v24 = vmul.f32 1.442695, %v1420_v5  ;;  %v1376_v60 = vmax.f32 %v5141_v46, %v5085_v15  ;;  %v1372_v19 = vmax.f32 %v5159_v22, %v5085_v15  ;;  %v5316_v46 = vld [vmem:[%s4304_s30 + $0x18] sm:$0xff] }
 0x17a   : > { %v1455_v2 = vmul.f32 1.442695, %v1429_v3  ;;  %1807 = vperm.xlu2 %3456, %v4853_v28   ;;  %v5185_v7 = vpop.permute.xlu1 %1319  ;;  %v1471_v37 = vadd.f32 1.0, %v1470_v54  ;;  %v1371_v28 = vmax.f32 %v5114_v12, %v5085_v15  ;;  %v1395_v12 = vsub.f32 %v5169_v26, %v5085_v15 }
 0x17b   : > { %v3703_v21 = vpop.eup %3702  ;;  %v5178_v50 = vpop.permute.xlu2 %1359  ;;  %1803 = vperm.xlu1 %3455, %v5182_v38   ;;  %2117 = vperm.xlu0 %3458, %v4964_v42   ;;  %v1390_v13 = vsub.f32 %v5185_v7, %v5085_v15  ;;  %vm5207_vm2 = vcmp.lt.f32.partialorder %v1473_v18, 0.0004427343 }
 0x17c   : > { %v3705_v53 = vpop.eup %3704  ;;  %v1505_v4 = vmul.f32 0.6931472, %v3703_v21  ;;  %3706 = vpow2.f32 %v1455_v2  ;;  %v1400_v45 = vsub.f32 %v5178_v50, %v5085_v15  ;;  %v1472_v32 = vmul.f32 %v3701_v59, %v1471_v37 }
 0x17d   : > { %v1530_v61 = vadd.f32 1.0, %v3705_v53  ;;  %v1533_v63 = vmul.f32 -0.5, %v3705_v53  ;;  %3708 = vlog2.f32 %v1467_v39  ;;  %v1536_v42 = vand.u32 2147483647, %v3705_v53 }
 0x17e   : > { %v1511_v56 = vsel %vm5174_vm1, %v1508_v49, %v1505_v4  ;;  %3710 = vpow2.f32 %v1437_v24  ;;  %v1416_v36 = vand.u32 2147483647, %v1400_v45  ;;  %v1406_v8 = vand.u32 2147483647, %v1390_v13 }
 0x17f   : > { %v1615_v29 = vadd.f32 %v1511_v56, %v1375_v31  ;;  %3712 = vlog2.f32 %v1530_v61  ;;  %v1534_v16 = vadd.f32 1.0, %v1533_v63  ;;  %vm5224_vm3 = vcmp.lt.f32.partialorder %v1536_v42, 0.0004427343 }
 0x180   : > { %3714 = vpow2.f32 %v1445_v30  ;;  %v1432_v35 = vsub.f32 0.0, %v1416_v36  ;;  %v1411_v52 = vand.u32 2147483647, %v1395_v12  ;;  %v1384_v39 = vmax.f32 %v5178_v50, %v5085_v15 }
 0x181   : > { %3243 = vst [vmem:[%s4499_s11 + $0x120] sm:$0xff] %v1615_v29  ;;  %v1535_v34 = vmul.f32 %v3705_v53, %v1534_v16  ;;  %v1422_v54 = vsub.f32 0.0, %v1406_v8  ;;  %v1398_v53 = vsub.f32 %v5203_v55, %v5085_v15 }
 0x182   : > { %v3707_v23 = vpop.eup %3706  ;;  %1819 = vperm.xlu2 %3456, %v4883_v17   ;;  %v5220_v41 = vpop.permute.xlu1 %1331  ;;  %v1461_v21 = vmul.f32 1.442695, %v1432_v35  ;;  %v1427_v37 = vsub.f32 0.0, %v1411_v52 }
 0x183   : > { %v3709_v33 = vpop.eup %3708  ;;  %v1557_v10 = vadd.f32 1.0, %v3707_v23  ;;  %v1560_v25 = vmul.f32 -0.5, %v3707_v23  ;;  %1815 = vperm.xlu1 %3455, %v5217_v44   ;;  %v5222_v40 = vpop.permute.xlu2 %1645  ;;  %2129 = vperm.xlu0 %3458, %v5156_v14   ;;  %v1563_v5 = vand.u32 2147483647, %v3707_v23  ;;  %v1441_v56 = vmul.f32 1.442695, %v1422_v54 }
 0x184   : > { %v5213_v47 = vpop.eup %3710  ;;  %v1469_v20 = vmul.f32 0.6931472, %v3709_v33  ;;  %v1451_v45 = vmul.f32 1.442695, %v1427_v37  ;;  %v1393_v42 = vsub.f32 %v5220_v41, %v5085_v15  ;;  %v5258_v33 = vperm.slane %v4897_v9, 3  ;;  %v5310_v37 = vld [vmem:[%s4304_s30 + $0x20] sm:$0xff] }
 0x185   : > { %v3713_v6 = vpop.eup %3712  ;;  %3716 = vlog2.f32 %v1557_v10  ;;  %v1476_v3 = vadd.f32 1.0, %v5213_v47  ;;  %v1561_v59 = vadd.f32 1.0, %v1560_v25  ;;  %v1479_v49 = vmul.f32 -0.5, %v5213_v47  ;;  %v5262_v10 = vld [vmem:[%s4304_s30 + $0x10] sm:$0xff] }
 0x186   : > { %v1532_v17 = vmul.f32 0.6931472, %v3713_v6  ;;  %v1475_v57 = vsel %vm5207_vm2, %v1472_v32, %v1469_v20  ;;  %v3715_v31 = vpop.eup %3714  ;;  %vm5241_vm4 = vcmp.lt.f32.partialorder %v1563_v5, 0.0004427343  ;;  %v1482_v18 = vand.u32 2147483647, %v5213_v47 }
 0x187   : > { %v1611_v2 = vadd.f32 %v1475_v57, %v1371_v28  ;;  %3718 = vlog2.f32 %v1476_v3  ;;  %v1480_v24 = vadd.f32 1.0, %v1479_v49  ;;  %v1512_v43 = vadd.f32 1.0, %v3715_v31  ;;  %v5268_v20 = vld [vmem:[%s4304_s30 + $0x8] sm:$0xff] }
 0x188   : > { %v1538_v58 = vsel %vm5224_vm3, %v1535_v34, %v1532_v17  ;;  %v1515_v61 = vmul.f32 -0.5, %v3715_v31  ;;  %v1562_v63 = vmul.f32 %v3707_v23, %v1561_v59  ;;  %3720 = vpow2.f32 %v1461_v21 }
 0x189   : > { %v1618_v4 = vadd.f32 %v1538_v58, %v1378_v0  ;;  %3239 = vst [vmem:[%s4499_s11 + $0x100] sm:$0xff] %v1611_v2  ;;  %3722 = vlog2.f32 %v1512_v43  ;;  %v5246_v0 = vpop.permute.xlu0 %1363  ;;  %v1481_v32 = vmul.f32 %v5213_v47, %v1480_v24  ;;  %v1518_v36 = vand.u32 2147483647, %v3715_v31 }
 0x18a   : > { %v1516_v16 = vadd.f32 1.0, %v1515_v61  ;;  %3724 = vpow2.f32 %v1441_v56  ;;  %3460 = vset.pattern.permute.xlu2 %v4215_v27  ;;  %v5252_v13 = vpop.permute.xlu1 %1343  ;;  %v1414_v51 = vand.u32 2147483647, %v1398_v53  ;;  %v1409_v34 = vand.u32 2147483647, %v1393_v42 }
 0x18b   : > { %v3717_v29 = vpop.eup %3716  ;;  %3246 = vst [vmem:[%s4499_s11 + $0x138] sm:$0xff] %v1618_v4  ;;  %3459 = vset.pattern.permute.xlu1 %v4215_v27  ;;  %v5254_v12 = vpop.permute.xlu2 %1657  ;;  %2141 = vperm.xlu0 %3458, %v5182_v38   ;;  %3726 = vpow2.f32 %v1451_v45  ;;  %vm1483_vm5 = vcmp.lt.f32.partialorder %v1482_v18, 0.0004427343  ;;  %v1374_v47 = vmax.f32 %v5185_v7, %v5085_v15  ;;  %v1709_v35 = vsub.f32 %v5222_v40, %v5258_v33 }
 0x18c   : > { %v1559_v30 = vmul.f32 0.6931472, %v3717_v29  ;;  %2105 = vperm.xlu2 %3460, %v5262_v10   ;;  %2101 = vperm.xlu1 %3459, %v5268_v20   ;;  %v1517_v62 = vmul.f32 %v3715_v31, %v1516_v16  ;;  %v1425_v3 = vsub.f32 0.0, %v1409_v34  ;;  %v1430_v52 = vsub.f32 0.0, %v1414_v51 }
 0x18d   : > { %v3719_v23 = vpop.eup %3718  ;;  %vm5282_vm6 = vcmp.lt.f32.partialorder %v1518_v36, 0.0004427343  ;;  %v1401_v40 = vsub.f32 %v5246_v0, %v5085_v15  ;;  %3728 = vtanh.f32 %v1709_v35  ;;  %v1712_v56 = vsub.f32 %v5254_v12, %v5258_v33 }
 0x18e   : > { %v1565_v27 = vsel %vm5241_vm4, %v1562_v63, %v1559_v30  ;;  %v1478_v25 = vmul.f32 0.6931472, %v3719_v23  ;;  %v3721_v8 = vpop.eup %3720  ;;  %v1447_v5 = vmul.f32 1.442695, %v1425_v3  ;;  %v1457_v4 = vmul.f32 1.442695, %v1430_v52 }
 0x18f   : > { %v1621_v9 = vadd.f32 %v1565_v27, %v1381_v1  ;;  %v3723_v17 = vpop.eup %3722  ;;  %v1584_v57 = vadd.f32 1.0, %v3721_v8  ;;  %v1587_v2 = vmul.f32 -0.5, %v3721_v8  ;;  %v1590_v21 = vand.u32 2147483647, %v3721_v8 }
 0x190   : > { %v1484_v6 = vsel %vm1483_vm5, %v1481_v32, %v1478_v25  ;;  %v5288_v59 = vpop.eup %3724  ;;  %v1514_v49 = vmul.f32 0.6931472, %v3723_v17  ;;  %v1379_v18 = vmax.f32 %v5169_v26, %v5085_v15  ;;  %v1417_v30 = vand.u32 2147483647, %v1401_v40 }
 0x191   : > { %3249 = vst [vmem:[%s4499_s11 + $0x150] sm:$0xff] %v1621_v9  ;;  %v1612_v48 = vadd.f32 %v1484_v6, %v1372_v19  ;;  %3730 = vlog2.f32 %v1584_v57  ;;  %v1494_v22 = vadd.f32 1.0, %v5288_v59  ;;  %v1396_v19 = vsub.f32 %v5252_v13, %v5085_v15  ;;  %v5294_v31 = vpop.permute.xlu0 %1649  ;;  %v3727_v58 = vpop.eup %3726 }
 0x192   : > { %v1520_v54 = vsel %vm5282_vm6, %v1517_v62, %v1514_v49  ;;  %v1497_v53 = vmul.f32 -0.5, %v5288_v59  ;;  %3732 = vpow2.f32 %v1447_v5  ;;  %v5299_v24 = vpop.permute.xlu1 %1355  ;;  %v1539_v63 = vadd.f32 1.0, %v3727_v58 }
 0x193   : > { %3240 = vst [vmem:[%s4499_s11 + $0x108] sm:$0xff] %v1612_v48  ;;  %v5301_v43 = vpop.permute.xlu2 %1665  ;;  %v1616_v61 = vadd.f32 %v1520_v54, %v1376_v60  ;;  %3734 = vlog2.f32 %v1494_v22  ;;  %2153 = vperm.xlu0 %3458, %v5217_v44   ;;  %v1588_v29 = vadd.f32 1.0, %v1587_v2  ;;  %v1542_v16 = vmul.f32 -0.5, %v3727_v58  ;;  %v3729_v45 = vpop.eup %3728 }
 0x194   : > { %2113 = vperm.xlu2 %3460, %v5310_v37   ;;  %v1498_v28 = vadd.f32 1.0, %v1497_v53  ;;  %2109 = vperm.xlu1 %3459, %v5316_v46   ;;  %3736 = vlog2.f32 %v1539_v63  ;;  %v1412_v60 = vand.u32 2147483647, %v1396_v19  ;;  %vm5320_vm7 = vcmp.lt.f32.partialorder %v1590_v21, 0.0004427343  ;;  %3255 = vst [vmem:[%s4412_s10 + $0x180] sm:$0xff] %v3729_v45 }
 0x195   : > { %3244 = vst [vmem:[%s4499_s11 + $0x128] sm:$0xff] %v1616_v61  ;;  %v1500_v12 = vand.u32 2147483647, %v5288_v59  ;;  %v1543_v23 = vadd.f32 1.0, %v1542_v16  ;;  %3738 = vpow2.f32 %v1457_v4  ;;  %v1545_v36 = vand.u32 2147483647, %v3727_v58 }
 0x196   : > { %v1428_v51 = vsub.f32 0.0, %v1412_v60  ;;  %3740 = vtanh.f32 %v1712_v56  ;;  %v1433_v27 = vsub.f32 0.0, %v1417_v30  ;;  %v1589_v9 = vmul.f32 %v3721_v8, %v1588_v29  ;;  %v5358_v61 = vld [vmem:[%s4304_s30 + $0x30] sm:$0xff] }
 0x197   : > { %v3731_v32 = vpop.eup %3730  ;;  %v1499_v35 = vmul.f32 %v5288_v59, %v1498_v28  ;;  %v1399_v6 = vsub.f32 %v5299_v24, %v5085_v15  ;;  %v1544_v3 = vmul.f32 %v3727_v58, %v1543_v23  ;;  %vm5340_vm8 = vcmp.lt.f32.partialorder %v1500_v12, 0.0004427343  ;;  %v5350_v58 = vld [vmem:[%s4304_s30 + $0x38] sm:$0xff] }
 0x198   : > { %v5326_v25 = vpop.eup %3732  ;;  %v1586_v34 = vmul.f32 0.6931472, %v3731_v32  ;;  %v1453_v48 = vmul.f32 1.442695, %v1428_v51  ;;  %v1463_v40 = vmul.f32 1.442695, %v1433_v27  ;;  %v1714_v16 = vsub.f32 %v5301_v43, %v5258_v33 }
 0x199   : > { %v3735_v62 = vpop.eup %3734  ;;  %v1521_v52 = vadd.f32 1.0, %v5326_v25  ;;  %v1524_v17 = vmul.f32 -0.5, %v5326_v25  ;;  %v1415_v49 = vand.u32 2147483647, %v1399_v6  ;;  %vm5344_vm9 = vcmp.lt.f32.partialorder %v1545_v36, 0.0004427343  ;;  %v5353_v54 = vpop.permute.xlu0 %1669 }
 0x19a   : > { %v1592_v1 = vsel %vm5320_vm7, %v1589_v9, %v1586_v34  ;;  %v1496_v57 = vmul.f32 0.6931472, %v3735_v62  ;;  %v5335_v8 = vpop.permute.xlu1 %1367  ;;  %v3737_v2 = vpop.eup %3736  ;;  %v4216_v19 = vmov 10   ;;  %v1527_v7 = vand.u32 2147483647, %v5326_v25 }
 0x19b   : > { %v1678_v59 = vpop.permute.xlu2 %1677  ;;  %v1624_v5 = vadd.f32 %v1592_v1, %v1384_v39  ;;  %3742 = vlog2.f32 %v1521_v52  ;;  %3462 = vset.pattern.permute.xlu0 %v4216_v19  ;;  %v3739_v50 = vpop.eup %3738  ;;  %v1541_v53 = vmul.f32 0.6931472, %v3737_v2  ;;  %v1431_v4 = vsub.f32 0.0, %v1415_v49 }
 0x19c   : > { %2125 = vperm.xlu2 %3460, %v5350_v58   ;;  %v1502_v39 = vsel %vm5340_vm8, %v1499_v35, %v1496_v57  ;;  %3744 = vpow2.f32 %v1453_v48  ;;  %2121 = vperm.xlu1 %3459, %v5358_v61   ;;  %v3741_v63 = vpop.eup %3740  ;;  %v1566_v29 = vadd.f32 1.0, %v3739_v50  ;;  %v1569_v28 = vmul.f32 -0.5, %v3739_v50 }
 0x19d   : > { %2215 = vperm.xlu0 %3462, %v5268_v20   ;;  %3252 = vst [vmem:[%s4499_s11 + $0x168] sm:$0xff] %v1624_v5  ;;  %v1614_v56 = vadd.f32 %v1502_v39, %v1374_v47  ;;  %v1547_v60 = vsel %vm5344_vm9, %v1544_v3, %v1541_v53  ;;  %v1525_v30 = vadd.f32 1.0, %v1524_v17  ;;  %3746 = vpow2.f32 %v1463_v40  ;;  %v5398_v17 = vld [vmem:[%s4304_s30 + $0x48] sm:$0xff] }
 0x19e   : > { %3258 = vst [vmem:[%s4412_s10 + $0x198] sm:$0xff] %v3741_v63  ;;  %v1459_v45 = vmul.f32 1.442695, %v1431_v4  ;;  %v1619_v42 = vadd.f32 %v1547_v60, %v1379_v18  ;;  %3748 = vlog2.f32 %v1566_v29  ;;  %v1570_v47 = vadd.f32 1.0, %v1569_v28 }
 0x19f   : > { %3242 = vst [vmem:[%s4499_s11 + $0x118] sm:$0xff] %v1614_v56  ;;  %v1402_v43 = vsub.f32 %v5335_v8, %v5085_v15  ;;  %v1717_v12 = vsub.f32 %v1678_v59, %v5258_v33  ;;  %v1377_v32 = vmax.f32 %v5220_v41, %v5085_v15  ;;  %v1572_v36 = vand.u32 2147483647, %v3739_v50  ;;  %v5390_v41 = vld [vmem:[%s4304_s30 + $0x50] sm:$0xff] }
 0x1a0   : > { %3750 = vpow2.f32 %v1459_v45  ;;  %3247 = vst [vmem:[%s4499_s11 + $0x140] sm:$0xff] %v1619_v42  ;;  %v1710_v26 = vsub.f32 %v5294_v31, %v5258_v33  ;;  %v1526_v27 = vmul.f32 %v5326_v25, %v1525_v30  ;;  %vm1528_vm10 = vcmp.lt.f32.partialorder %v1527_v7, 0.0004427343 }
 0x1a1   : > { %v3743_v23 = vpop.eup %3742  ;;  %3752 = vtanh.f32 %v1714_v16  ;;  %v1418_v34 = vand.u32 2147483647, %v1402_v43  ;;  %v1382_v25 = vmax.f32 %v5203_v55, %v5085_v15  ;;  %v1571_v52 = vmul.f32 %v3739_v50, %v1570_v47  ;;  %v1682_v49 = vpop.permute.xlu0 %1681 }
 0x1a2   : > { %v5384_v18 = vpop.eup %3744  ;;  %v1523_v51 = vmul.f32 0.6931472, %v3743_v23  ;;  %3754 = vtanh.f32 %v1717_v12  ;;  %vm5402_vm11 = vcmp.lt.f32.partialorder %v1572_v36, 0.0004427343  ;;  %v1715_v29 = vsub.f32 %v5353_v54, %v5258_v33  ;;  %v5429_v12 = vld [vmem:[%s4304_s30 + $0x68] sm:$0xff] }
 0x1a3   : > { %v1690_v9 = vpop.permute.xlu2 %1689  ;;  %v1548_v35 = vadd.f32 1.0, %v5384_v18  ;;  %v1551_v6 = vmul.f32 -0.5, %v5384_v18  ;;  %3756 = vtanh.f32 %v1710_v26  ;;  %v1654_v31 = vpop.permute.xlu1 %1653  ;;  %v1434_v40 = vsub.f32 0.0, %v1418_v34 }
 0x1a4   : > { %2137 = vperm.xlu2 %3460, %v5390_v41   ;;  %v5393_v62 = vpop.eup %3746  ;;  %v1529_v3 = vsel %vm1528_vm10, %v1526_v27, %v1523_v51  ;;  %2133 = vperm.xlu1 %3459, %v5398_v17   ;;  %v1720_v21 = vsub.f32 %v1690_v9, %v5258_v33  ;;  %v1711_v53 = vsub.f32 %v1654_v31, %v5258_v33  ;;  %v1554_v60 = vand.u32 2147483647, %v5384_v18  ;;  %v5435_v51 = vld [vmem:[%s4304_s30 + $0x60] sm:$0xff] }
 0x1a5   : > { %2235 = vperm.xlu0 %3462, %v5358_v61   ;;  %v3749_v48 = vpop.eup %3748  ;;  %v1617_v1 = vadd.f32 %v1529_v3, %v1377_v32  ;;  %3758 = vlog2.f32 %v1548_v35  ;;  %v1593_v2 = vadd.f32 1.0, %v5393_v62  ;;  %v1596_v5 = vmul.f32 -0.5, %v5393_v62 }
 0x1a6   : > { %v5406_v59 = vpop.eup %3750  ;;  %v1568_v55 = vmul.f32 0.6931472, %v3749_v48  ;;  %v1552_v50 = vadd.f32 1.0, %v1551_v6  ;;  %v1380_v45 = vmax.f32 %v5252_v13, %v5085_v15  ;;  %v1599_v42 = vand.u32 2147483647, %v5393_v62 }
 0x1a7   : > { %v3753_v22 = vpop.eup %3752  ;;  %3245 = vst [vmem:[%s4499_s11 + $0x130] sm:$0xff] %v1617_v1  ;;  %v1575_v39 = vadd.f32 1.0, %v5406_v59  ;;  %3760 = vlog2.f32 %v1593_v2  ;;  %v1578_v56 = vmul.f32 -0.5, %v5406_v59  ;;  %v1597_v30 = vadd.f32 1.0, %v1596_v5 }
 0x1a8   : > { %v3755_v4 = vpop.eup %3754  ;;  %v1574_v63 = vsel %vm5402_vm11, %v1571_v52, %v1568_v55  ;;  %3260 = vst [vmem:[%s4412_s10 + $0x1a8] sm:$0xff] %v3753_v22  ;;  %v1465_v7 = vmul.f32 1.442695, %v1434_v40  ;;  %v1553_v54 = vmul.f32 %v5384_v18, %v1552_v50  ;;  %v1718_v13 = vsub.f32 %v1682_v49, %v5258_v33 }
 0x1a9   : > { %v3757_v28 = vpop.eup %3756  ;;  %v1622_v16 = vadd.f32 %v1574_v63, %v1382_v25  ;;  %3762 = vlog2.f32 %v1575_v39  ;;  %3263 = vst [vmem:[%s4412_s10 + $0x1c0] sm:$0xff] %v3755_v4  ;;  %v1579_v26 = vadd.f32 1.0, %v1578_v56  ;;  %vm1555_vm12 = vcmp.lt.f32.partialorder %v1554_v60, 0.0004427343  ;;  %v5462_v4 = vld [vmem:[%s4304_s30 + $0x78] sm:$0xff] }
 0x1aa   : > { %3256 = vst [vmem:[%s4412_s10 + $0x188] sm:$0xff] %v3757_v28  ;;  %3764 = vtanh.f32 %v1720_v21  ;;  %v1598_v18 = vmul.f32 %v5393_v62, %v1597_v30  ;;  %v1581_v34 = vand.u32 2147483647, %v5406_v59  ;;  %v1385_v6 = vmax.f32 %v5246_v0, %v5085_v15  ;;  %v1694_v62 = vpop.permute.xlu0 %1693  ;;  %v5472_v28 = vld [vmem:[%s4304_s30] sm:$0xff] }
 0x1ab   : > { %v1702_v47 = vpop.permute.xlu2 %1701  ;;  %v3759_v43 = vpop.eup %3758  ;;  %3250 = vst [vmem:[%s4499_s11 + $0x158] sm:$0xff] %v1622_v16  ;;  %3766 = vtanh.f32 %v1711_v53  ;;  %vm5444_vm13 = vcmp.lt.f32.partialorder %v1599_v42, 0.0004427343  ;;  %v1580_v57 = vmul.f32 %v5406_v59, %v1579_v26  ;;  %v1383_v49 = vmax.f32 %v5299_v24, %v5085_v15 }
 0x1ac   : > { %2149 = vperm.xlu2 %3460, %v5429_v12   ;;  %v1723_v23 = vsub.f32 %v1702_v47, %v5258_v33  ;;  %v1662_v32 = vpop.permute.xlu1 %1661  ;;  %v1550_v36 = vmul.f32 0.6931472, %v3759_v43  ;;  %3768 = vpow2.f32 %v1465_v7  ;;  %2145 = vperm.xlu1 %3459, %v5435_v51   ;;  %vm1582_vm14 = vcmp.lt.f32.partialorder %v1581_v34, 0.0004427343 }
 0x1ad   : > { %v1713_v27 = vsub.f32 %v1662_v32, %v5258_v33  ;;  %2247 = vperm.xlu0 %3462, %v5398_v17   ;;  %3770 = vtanh.f32 %v1715_v29  ;;  %v3761_v9 = vpop.eup %3760  ;;  %v5455_v2 = vperm.slane %v5073_v11, 1  ;;  %v1721_v56 = vsub.f32 %v1694_v62, %v5258_v33 }
 0x1ae   : > { %v1556_v35 = vsel %vm1555_vm12, %v1553_v54, %v1550_v36  ;;  %3772 = vtanh.f32 %v1723_v23  ;;  %v1595_v52 = vmul.f32 0.6931472, %v3761_v9  ;;  %v1386_v9 = vmax.f32 %v5335_v8, %v5085_v15 }
 0x1af   : > { %v3763_v3 = vpop.eup %3762  ;;  %v1620_v25 = vadd.f32 %v1556_v35, %v1380_v45  ;;  %3774 = vtanh.f32 %v1713_v27 }
 0x1b0   : > { %v3765_v48 = vpop.eup %3764  ;;  %v1577_v1 = vmul.f32 0.6931472, %v3763_v3  ;;  %3776 = vtanh.f32 %v1718_v13  ;;  %v1601_v0 = vsel %vm5444_vm13, %v1598_v18, %v1595_v52 }
 0x1b1   : > { %v3767_v40 = vpop.eup %3766  ;;  %3248 = vst [vmem:[%s4499_s11 + $0x148] sm:$0xff] %v1620_v25  ;;  %v1625_v5 = vadd.f32 %v1601_v0, %v1385_v6 }
 0x1b2   : > { %v3769_v55 = vpop.eup %3768  ;;  %v1583_v21 = vsel %vm1582_vm14, %v1580_v57, %v1577_v1  ;;  %3266 = vst [vmem:[%s4412_s10 + $0x1d8] sm:$0xff] %v3765_v48  ;;  %v1706_v7 = vpop.permute.xlu0 %1705  ;;  %v4217_v1 = vmov 5  }
 0x1b3   : > { %v3771_v59 = vpop.eup %3770  ;;  %v1623_v22 = vadd.f32 %v1583_v21, %v1383_v49  ;;  %v1602_v50 = vadd.f32 1.0, %v3769_v55  ;;  %v1605_v39 = vmul.f32 -0.5, %v3769_v55  ;;  %3257 = vst [vmem:[%s4412_s10 + $0x190] sm:$0xff] %v3767_v40  ;;  %v1608_v42 = vand.u32 2147483647, %v3769_v55 }
 0x1b4   : > { %3461 = vset.pattern.permute.xlu2 %v4216_v19  ;;  %v1674_v24 = vpop.permute.xlu1 %1673  ;;  %v3773_v53 = vpop.eup %3772  ;;  %3253 = vst [vmem:[%s4499_s11 + $0x170] sm:$0xff] %v1625_v5  ;;  %2157 = vperm.xlu1 %3459, %v5462_v4   ;;  %v1724_v43 = vsub.f32 %v1706_v7, %v5258_v33  ;;  %v5506_v5 = vld [vmem:[%s4304_s30 + $0x28] sm:$0xff] }
 0x1b5   : > { %v1716_v11 = vsub.f32 %v1674_v24, %v5258_v33  ;;  %2259 = vperm.xlu0 %3462, %v5435_v51   ;;  %v5467_v63 = vpop.permute.xlu2 %1763  ;;  %v3775_v29 = vpop.eup %3774  ;;  %3251 = vst [vmem:[%s4499_s11 + $0x160] sm:$0xff] %v1623_v22  ;;  %3778 = vlog2.f32 %v1602_v50  ;;  %2211 = vperm.xlu2 %3461, %v5472_v28   ;;  %v1606_v30 = vadd.f32 1.0, %v1605_v39  ;;  %vm1609_vm15 = vcmp.lt.f32.partialorder %v1608_v42, 0.0004427343 }
 0x1b6   : > { %v3777_v16 = vpop.eup %3776  ;;  %3261 = vst [vmem:[%s4412_s10 + $0x1b0] sm:$0xff] %v3771_v59  ;;  %v1840_v60 = vsub.f32 %v5467_v63, %v5455_v2 }
 0x1b7   : > { %3780 = vtanh.f32 %v1716_v11  ;;  %3269 = vst [vmem:[%s4412_s10 + $0x1f0] sm:$0xff] %v3773_v53  ;;  %v1607_v23 = vmul.f32 %v3769_v55, %v1606_v30 }
 0x1b8   : > { %3782 = vtanh.f32 %v1721_v56  ;;  %3259 = vst [vmem:[%s4412_s10 + $0x1a0] sm:$0xff] %v3775_v29  ;;  %v1856_v45 = vand.u32 2147483647, %v1840_v60 }
 0x1b9   : > { %3264 = vst [vmem:[%s4412_s10 + $0x1c8] sm:$0xff] %v3777_v16  ;;  %3784 = vtanh.f32 %v1724_v43 }
 0x1ba   : > { %v1872_v47 = vsub.f32 0.0, %v1856_v45 }
 0x1bb   : > { %v3779_v54 = vpop.eup %3778 }
 0x1bc   : > { %v1686_v32 = vpop.permute.xlu1 %1685  ;;  %v1604_v36 = vmul.f32 0.6931472, %v3779_v54  ;;  %v1889_v26 = vmul.f32 1.442695, %v1872_v47  ;;  %3463 = vset.pattern.permute.xlu1 %v4216_v19  ;;  %v1824_v47 = vmax.f32 %v5467_v63, %v5455_v2 }
 0x1bd   : > { %v3781_v13 = vpop.eup %3780  ;;  %v1719_v27 = vsub.f32 %v1686_v32, %v5258_v33  ;;  %2271 = vperm.xlu0 %3462, %v5462_v4   ;;  %v5485_v18 = vpop.permute.xlu2 %1775  ;;  %2223 = vperm.xlu2 %3461, %v5316_v46  }
 0x1be   : > { %v3783_v34 = vpop.eup %3782  ;;  %3262 = vst [vmem:[%s4412_s10 + $0x1b8] sm:$0xff] %v3781_v13  ;;  %v1843_v19 = vsub.f32 %v5485_v18, %v5455_v2  ;;  %2219 = vperm.xlu1 %3463, %v5262_v10   ;;  %v1610_v35 = vsel %vm1609_vm15, %v1607_v23, %v1604_v36  ;;  %3786 = vpow2.f32 %v1889_v26 }
 0x1bf   : > { %3267 = vst [vmem:[%s4412_s10 + $0x1e0] sm:$0xff] %v3783_v34  ;;  %v1626_v6 = vadd.f32 %v1610_v35, %v1386_v9  ;;  %3788 = vtanh.f32 %v1719_v27  ;;  %v3785_v15 = vpop.eup %3784 }
 0x1c0   : > { %v1859_v31 = vand.u32 2147483647, %v1843_v19  ;;  %3270 = vst [vmem:[%s4412_s10 + $0x1f8] sm:$0xff] %v3785_v15 }
 0x1c1   : > { %3254 = vst [vmem:[%s4499_s11 + $0x178] sm:$0xff] %v1626_v6 }
 0x1c2   : > { %v1875_v3 = vsub.f32 0.0, %v1859_v31 }
 0x1c4   : > { %v1895_v8 = vmul.f32 1.442695, %v1875_v3  ;;  %v1698_v25 = vpop.permute.xlu1 %1697  ;;  %v5497_v52 = vpop.permute.xlu0 %1767 }
 0x1c5   : > { %v3787_v62 = vpop.eup %3786  ;;  %v1722_v48 = vsub.f32 %v1698_v25, %v5258_v33  ;;  %3466 = vset.pattern.permute.xlu0 %v4217_v1  ;;  %v5501_v57 = vpop.permute.xlu2 %1783  ;;  %v1841_v40 = vsub.f32 %v5497_v52, %v5455_v2  ;;  %2231 = vperm.xlu2 %3461, %v5506_v5  }
 0x1c6   : > { %v3789_v0 = vpop.eup %3788  ;;  %v1928_v49 = vadd.f32 1.0, %v3787_v62  ;;  %v1931_v55 = vmul.f32 -0.5, %v3787_v62  ;;  %3790 = vpow2.f32 %v1895_v8  ;;  %2227 = vperm.xlu1 %3463, %v5310_v37   ;;  %v1845_v33 = vsub.f32 %v5501_v57, %v5455_v2  ;;  %2557 = vperm.xlu0 %3466, %v5262_v10  }
 0x1c7   : > { %3265 = vst [vmem:[%s4412_s10 + $0x1d0] sm:$0xff] %v3789_v0  ;;  %3792 = vtanh.f32 %v1722_v48  ;;  %v1857_v21 = vand.u32 2147483647, %v1841_v40  ;;  %v1934_v39 = vand.u32 2147483647, %v3787_v62  ;;  %v1827_v8 = vmax.f32 %v5485_v18, %v5455_v2 }
 0x1c8   : > { %3794 = vlog2.f32 %v1928_v49  ;;  %v1932_v59 = vadd.f32 1.0, %v1931_v55  ;;  %v1861_v22 = vand.u32 2147483647, %v1845_v33 }
 0x1c9   : > { %v1873_v50 = vsub.f32 0.0, %v1857_v21  ;;  %vm5522_vm0 = vcmp.lt.f32.partialorder %v1934_v39, 0.0004427343 }
 0x1ca   : > { %v1877_v24 = vsub.f32 0.0, %v1861_v22  ;;  %v1933_v16 = vmul.f32 %v3787_v62, %v1932_v59 }
 0x1cb   : > { %v1891_v53 = vmul.f32 1.442695, %v1873_v50  ;;  %v1825_v50 = vmax.f32 %v5497_v52, %v5455_v2 }
 0x1cc   : > { %v3791_v11 = vpop.eup %3790  ;;  %v5514_v56 = vpop.permute.xlu0 %1787  ;;  %v1899_v45 = vmul.f32 1.442695, %v1877_v24 }
 0x1cd   : > { %v3793_v29 = vpop.eup %3792  ;;  %v1955_v60 = vadd.f32 1.0, %v3791_v11  ;;  %v1958_v30 = vmul.f32 -0.5, %v3791_v11  ;;  %v5516_v42 = vpop.permute.xlu2 %1795  ;;  %3796 = vpow2.f32 %v1891_v53  ;;  %2243 = vperm.xlu2 %3461, %v5156_v14   ;;  %v1961_v14 = vand.u32 2147483647, %v3791_v11 }
 0x1ce   : > { %v5518_v10 = vpop.permute.xlu1 %1759  ;;  %v3795_v7 = vpop.eup %3794  ;;  %3268 = vst [vmem:[%s4412_s10 + $0x1e8] sm:$0xff] %v3793_v29  ;;  %v1848_v54 = vsub.f32 %v5516_v42, %v5455_v2  ;;  %2239 = vperm.xlu1 %3463, %v5350_v58   ;;  %2577 = vperm.xlu0 %3466, %v5350_v58   ;;  %v1846_v26 = vsub.f32 %v5514_v56, %v5455_v2 }
 0x1cf   : > { %v1930_v23 = vmul.f32 0.6931472, %v3795_v7  ;;  %3798 = vlog2.f32 %v1955_v60  ;;  %v1959_v32 = vadd.f32 1.0, %v1958_v30  ;;  %v1839_v13 = vsub.f32 %v5518_v10, %v5455_v2 }
 0x1d0   : > { %3800 = vpow2.f32 %v1899_v45  ;;  %v1864_v63 = vand.u32 2147483647, %v1848_v54  ;;  %v1862_v19 = vand.u32 2147483647, %v1846_v26  ;;  %vm5543_vm1 = vcmp.lt.f32.partialorder %v1961_v14, 0.0004427343 }
 0x1d1   : > { %v1936_v36 = vsel %vm5522_vm0, %v1933_v16, %v1930_v23  ;;  %v1855_v9 = vand.u32 2147483647, %v1839_v13  ;;  %v1960_v58 = vmul.f32 %v3791_v11, %v1959_v32  ;;  %v1832_v29 = vmax.f32 %v5516_v42, %v5455_v2 }
 0x1d2   : > { %v2064_v27 = vadd.f32 %v1936_v36, %v1824_v47  ;;  %v1880_v34 = vsub.f32 0.0, %v1864_v63  ;;  %v1878_v21 = vsub.f32 0.0, %v1862_v19  ;;  %v1823_v52 = vmax.f32 %v5518_v10, %v5455_v2 }
 0x1d3   : > { %v3797_v35 = vpop.eup %3796  ;;  %v1871_v31 = vsub.f32 0.0, %v1855_v9  ;;  %v1830_v30 = vmax.f32 %v5514_v56, %v5455_v2 }
 0x1d4   : > { %3272 = vst [vmem:[%s4499_s11 + $0x188] sm:$0xff] %v2064_v27  ;;  %v1905_v6 = vmul.f32 1.442695, %v1880_v34  ;;  %v5539_v3 = vpop.permute.xlu0 %1799  ;;  %v1937_v62 = vadd.f32 1.0, %v3797_v35  ;;  %v1940_v48 = vmul.f32 -0.5, %v3797_v35 }
 0x1d5   : > { %v3799_v15 = vpop.eup %3798  ;;  %v5547_v40 = vpop.permute.xlu2 %1807  ;;  %v1887_v33 = vmul.f32 1.442695, %v1871_v31  ;;  %2255 = vperm.xlu2 %3461, %v5182_v38   ;;  %v1829_v38 = vmax.f32 %v5501_v57, %v5455_v2  ;;  %v1943_v53 = vand.u32 2147483647, %v3797_v35  ;;  %v1901_v16 = vmul.f32 1.442695, %v1878_v21 }
 0x1d6   : > { %v5549_v0 = vpop.permute.xlu1 %1771  ;;  %v3801_v49 = vpop.eup %3800  ;;  %v1957_v55 = vmul.f32 0.6931472, %v3799_v15  ;;  %3802 = vpow2.f32 %v1905_v6  ;;  %2251 = vperm.xlu1 %3463, %v5390_v41   ;;  %2589 = vperm.xlu0 %3466, %v5390_v41   ;;  %v1941_v39 = vadd.f32 1.0, %v1940_v48  ;;  %v1851_v41 = vsub.f32 %v5547_v40, %v5455_v2 }
 0x1d7   : > { %v1973_v18 = vadd.f32 1.0, %v3801_v49  ;;  %v1976_v59 = vmul.f32 -0.5, %v3801_v49  ;;  %3804 = vlog2.f32 %v1937_v62  ;;  %v1979_v60 = vand.u32 2147483647, %v3801_v49 }
 0x1d8   : > { %v1963_v22 = vsel %vm5543_vm1, %v1960_v58, %v1957_v55  ;;  %3806 = vpow2.f32 %v1887_v33  ;;  %v1842_v57 = vsub.f32 %v5549_v0, %v5455_v2  ;;  %v1942_v7 = vmul.f32 %v3797_v35, %v1941_v39 }
 0x1d9   : > { %v2067_v24 = vadd.f32 %v1963_v22, %v1827_v8  ;;  %3808 = vlog2.f32 %v1973_v18  ;;  %v1977_v11 = vadd.f32 1.0, %v1976_v59  ;;  %v1867_v47 = vand.u32 2147483647, %v1851_v41 }
 0x1da   : > { %3810 = vpow2.f32 %v1901_v16  ;;  %v1849_v43 = vsub.f32 %v5539_v3, %v5455_v2  ;;  %vm5575_vm2 = vcmp.lt.f32.partialorder %v1943_v53, 0.0004427343  ;;  %v1858_v19 = vand.u32 2147483647, %v1842_v57 }
 0x1db   : > { %3275 = vst [vmem:[%s4499_s11 + $0x1a0] sm:$0xff] %v2067_v24  ;;  %v1978_v27 = vmul.f32 %v3801_v49, %v1977_v11  ;;  %v1883_v9 = vsub.f32 0.0, %v1867_v47  ;;  %vm5585_vm3 = vcmp.lt.f32.partialorder %v1979_v60, 0.0004427343  ;;  %v1835_v18 = vmax.f32 %v5547_v40, %v5455_v2 }
 0x1dc   : > { %v3803_v45 = vpop.eup %3802  ;;  %v5573_v54 = vpop.permute.xlu0 %1811  ;;  %v1865_v62 = vand.u32 2147483647, %v1849_v43 }
 0x1dd   : > { %v3805_v23 = vpop.eup %3804  ;;  %v2000_v63 = vadd.f32 1.0, %v3803_v45  ;;  %v2003_v13 = vmul.f32 -0.5, %v3803_v45  ;;  %v5579_v36 = vpop.permute.xlu2 %1819  ;;  %2267 = vperm.xlu2 %3461, %v5217_v44   ;;  %v2006_v48 = vand.u32 2147483647, %v3803_v45  ;;  %v1911_v49 = vmul.f32 1.442695, %v1883_v9 }
 0x1de   : > { %v5581_v14 = vpop.permute.xlu1 %1779  ;;  %v3807_v26 = vpop.eup %3806  ;;  %v1939_v34 = vmul.f32 0.6931472, %v3805_v23  ;;  %2263 = vperm.xlu1 %3463, %v5429_v12   ;;  %2601 = vperm.xlu0 %3466, %v5429_v12   ;;  %v1874_v12 = vsub.f32 0.0, %v1858_v19  ;;  %v1881_v11 = vsub.f32 0.0, %v1865_v62  ;;  %v1854_v57 = vsub.f32 %v5579_v36, %v5455_v2 }
 0x1df   : > { %v3809_v35 = vpop.eup %3808  ;;  %3812 = vlog2.f32 %v2000_v63  ;;  %v2004_v6 = vadd.f32 1.0, %v2003_v13  ;;  %v1919_v31 = vadd.f32 1.0, %v3807_v26  ;;  %v1922_v25 = vmul.f32 -0.5, %v3807_v26 }
 0x1e0   : > { %v1975_v15 = vmul.f32 0.6931472, %v3809_v35  ;;  %v1945_v8 = vsel %vm5575_vm2, %v1942_v7, %v1939_v34  ;;  %v3811_v55 = vpop.eup %3810  ;;  %v1925_v21 = vand.u32 2147483647, %v3807_v26  ;;  %vm5598_vm4 = vcmp.lt.f32.partialorder %v2006_v48, 0.0004427343 }
 0x1e1   : > { %v2065_v44 = vadd.f32 %v1945_v8, %v1825_v50  ;;  %3814 = vlog2.f32 %v1919_v31  ;;  %v2005_v22 = vmul.f32 %v3803_v45, %v2004_v6  ;;  %v1982_v39 = vadd.f32 1.0, %v3811_v55 }
 0x1e2   : > { %v1981_v33 = vsel %vm5585_vm3, %v1978_v27, %v1975_v15  ;;  %v1985_v24 = vmul.f32 -0.5, %v3811_v55  ;;  %v1923_v53 = vadd.f32 1.0, %v1922_v25  ;;  %3816 = vpow2.f32 %v1911_v49 }
 0x1e3   : > { %v2069_v59 = vadd.f32 %v1981_v33, %v1829_v38  ;;  %3273 = vst [vmem:[%s4499_s11 + $0x190] sm:$0xff] %v2065_v44  ;;  %v1893_v50 = vmul.f32 1.442695, %v1874_v12  ;;  %3818 = vlog2.f32 %v1982_v39  ;;  %v1988_v60 = vand.u32 2147483647, %v3811_v55 }
 0x1e4   : > { %v1986_v7 = vadd.f32 1.0, %v1985_v24  ;;  %v1907_v47 = vmul.f32 1.442695, %v1881_v11  ;;  %vm5612_vm5 = vcmp.lt.f32.partialorder %v1925_v21, 0.0004427343  ;;  %v1844_v27 = vsub.f32 %v5581_v14, %v5455_v2 }
 0x1e5   : > { %v3813_v16 = vpop.eup %3812  ;;  %3277 = vst [vmem:[%s4499_s11 + $0x1b0] sm:$0xff] %v2069_v59  ;;  %3820 = vpow2.f32 %v1893_v50  ;;  %3465 = vset.pattern.permute.xlu2 %v4217_v1  ;;  %v5610_v23 = vpop.permute.xlu0 %2097  ;;  %v1870_v13 = vand.u32 2147483647, %v1854_v57  ;;  %v1852_v34 = vsub.f32 %v5573_v54, %v5455_v2  ;;  %v4218_v9 = vmov 11   ;;  %v5656_v57 = vld [vmem:[%s4390_s7] sm:$0xff] }
 0x1e6   : > { %v5604_v38 = vpop.permute.xlu1 %1791  ;;  %v2002_v45 = vmul.f32 0.6931472, %v3813_v16  ;;  %3464 = vset.pattern.permute.xlu1 %v4217_v1  ;;  %v5608_v43 = vpop.permute.xlu2 %2105  ;;  %3467 = vset.pattern.permute.xlu0 %v4218_v9  ;;  %v1924_v35 = vmul.f32 %v3807_v26, %v1923_v53  ;;  %3822 = vpow2.f32 %v1907_v47  ;;  %v1860_v31 = vand.u32 2147483647, %v1844_v27 }
 0x1e7   : > { %v3815_v32 = vpop.eup %3814  ;;  %2553 = vperm.xlu2 %3465, %v5268_v20   ;;  %2549 = vperm.xlu1 %3464, %v5472_v28   ;;  %v1886_v6 = vsub.f32 0.0, %v1870_v13  ;;  %v1868_v15 = vand.u32 2147483647, %v1852_v34  ;;  %v1987_v25 = vmul.f32 %v3811_v55, %v1986_v7  ;;  %vm5631_vm6 = vcmp.lt.f32.partialorder %v1988_v60, 0.0004427343 }
 0x1e8   : > { %v2008_v1 = vsel %vm5598_vm4, %v2005_v22, %v2002_v45  ;;  %v1921_v19 = vmul.f32 0.6931472, %v3815_v32  ;;  %2663 = vperm.xlu0 %3467, %v5472_v28   ;;  %v3817_v8 = vpop.eup %3816  ;;  %v1826_v28 = vmax.f32 %v5549_v0, %v5455_v2  ;;  %v1876_v55 = vsub.f32 0.0, %v1860_v31 }
 0x1e9   : > { %v2072_v58 = vadd.f32 %v2008_v1, %v1832_v29  ;;  %v3819_v62 = vpop.eup %3818  ;;  %v2027_v29 = vadd.f32 1.0, %v3817_v8  ;;  %v2030_v44 = vmul.f32 -0.5, %v3817_v8  ;;  %v2033_v48 = vand.u32 2147483647, %v3817_v8 }
 0x1ea   : > { %v1927_v20 = vsel %vm5612_vm5, %v1924_v35, %v1921_v19  ;;  %v1984_v33 = vmul.f32 0.6931472, %v3819_v62  ;;  %v1917_v21 = vmul.f32 1.442695, %v1886_v6  ;;  %v1847_v12 = vsub.f32 %v5604_v38, %v5455_v2 }
 0x1eb   : > { %3280 = vst [vmem:[%s4499_s11 + $0x1c8] sm:$0xff] %v2072_v58  ;;  %v2063_v42 = vadd.f32 %v1927_v20, %v1823_v52  ;;  %v3821_v49 = vpop.eup %3820  ;;  %3824 = vlog2.f32 %v2027_v29  ;;  %v2031_v59 = vadd.f32 1.0, %v2030_v44  ;;  %v1884_v39 = vsub.f32 0.0, %v1868_v15 }
 0x1ec   : > { %v1946_v22 = vadd.f32 1.0, %v3821_v49  ;;  %v3823_v10 = vpop.eup %3822  ;;  %v1990_v52 = vsel %vm5631_vm6, %v1987_v25, %v1984_v33  ;;  %v1949_v53 = vmul.f32 -0.5, %v3821_v49  ;;  %v1952_v50 = vand.u32 2147483647, %v3821_v49 }
 0x1ed   : > { %3271 = vst [vmem:[%s4499_s11 + $0x180] sm:$0xff] %v2063_v42  ;;  %3826 = vpow2.f32 %v1917_v21  ;;  %v5650_v16 = vpop.permute.xlu0 %2117  ;;  %v2070_v41 = vadd.f32 %v1990_v52, %v1830_v30  ;;  %v2009_v60 = vadd.f32 1.0, %v3823_v10  ;;  %v5659_v45 = vperm.slane %v5656_v57, 4 }
 0x1ee   : > { %v5644_v24 = vpop.permute.xlu1 %1803  ;;  %v5648_v11 = vpop.permute.xlu2 %2113  ;;  %3828 = vlog2.f32 %v1946_v22  ;;  %vm5662_vm7 = vcmp.lt.f32.partialorder %v2033_v48, 0.0004427343  ;;  %v1950_v47 = vadd.f32 1.0, %v1949_v53  ;;  %v1833_v32 = vmax.f32 %v5539_v3, %v5455_v2  ;;  %v4080_v22 = vld [vmem:[%s4304_s30 + $0x40] sm:$0xff] }
 0x1ef   : > { %2565 = vperm.xlu2 %3465, %v5310_v37   ;;  %v2012_v63 = vmul.f32 -0.5, %v3823_v10  ;;  %2561 = vperm.xlu1 %3464, %v5316_v46   ;;  %3278 = vst [vmem:[%s4499_s11 + $0x1b8] sm:$0xff] %v2070_v41  ;;  %3830 = vlog2.f32 %v2009_v60  ;;  %v1897_v56 = vmul.f32 1.442695, %v1876_v55  ;;  %v1913_v30 = vmul.f32 1.442695, %v1884_v39 }
 0x1f0   : > { %2683 = vperm.xlu0 %3467, %v5506_v5   ;;  %v2163_v37 = vsub.f32 %v5608_v43, %v5659_v45  ;;  %v2032_v13 = vmul.f32 %v3817_v8, %v2031_v59  ;;  %vm5673_vm8 = vcmp.lt.f32.partialorder %v1952_v50, 0.0004427343  ;;  %v1863_v1 = vand.u32 2147483647, %v1847_v12 }
 0x1f1   : > { %v2013_v34 = vadd.f32 1.0, %v2012_v63  ;;  %v3825_v3 = vpop.eup %3824  ;;  %v1951_v19 = vmul.f32 %v3821_v49, %v1950_v47  ;;  %v2015_v35 = vand.u32 2147483647, %v3823_v10  ;;  %3832 = vpow2.f32 %v1897_v56  ;;  %v4082_v63 = vld [vmem:[%s4304_s30 + $0x70] sm:$0xff] }
 0x1f2   : > { %v2161_v46 = vsub.f32 %v5610_v23, %v5659_v45  ;;  %v2029_v6 = vmul.f32 0.6931472, %v3825_v3  ;;  %3834 = vpow2.f32 %v1913_v30  ;;  %v1879_v31 = vsub.f32 0.0, %v1863_v1 }
 0x1f3   : > { %v3827_v58 = vpop.eup %3826  ;;  %v1850_v43 = vsub.f32 %v5644_v24, %v5455_v2  ;;  %v2014_v8 = vmul.f32 %v3823_v10, %v2013_v34  ;;  %3836 = vtanh.f32 %v2163_v37  ;;  %vm5692_vm9 = vcmp.lt.f32.partialorder %v2015_v35, 0.0004427343 }
 0x1f4   : > { %v3829_v15 = vpop.eup %3828  ;;  %v2054_v20 = vadd.f32 1.0, %v3827_v58  ;;  %v2057_v25 = vmul.f32 -0.5, %v3827_v58  ;;  %v2035_v62 = vsel %vm5662_vm7, %v2032_v13, %v2029_v6  ;;  %v1903_v23 = vmul.f32 1.442695, %v1879_v31 }
 0x1f5   : > { %v1948_v42 = vmul.f32 0.6931472, %v3829_v15  ;;  %3838 = vtanh.f32 %v2161_v46  ;;  %v5687_v44 = vpop.permute.xlu0 %2129  ;;  %v3831_v48 = vpop.eup %3830  ;;  %v2075_v49 = vadd.f32 %v2035_v62, %v1835_v18  ;;  %v2060_v21 = vand.u32 2147483647, %v3827_v58 }
 0x1f6   : > { %v5681_v26 = vpop.permute.xlu1 %1815  ;;  %v5685_v29 = vpop.permute.xlu2 %2125  ;;  %3840 = vlog2.f32 %v2054_v20  ;;  %v2011_v12 = vmul.f32 0.6931472, %v3831_v48  ;;  %v1866_v59 = vand.u32 2147483647, %v1850_v43  ;;  %v2058_v39 = vadd.f32 1.0, %v2057_v25  ;;  %v4081_v20 = vld [vmem:[%s4304_s30 + $0x58] sm:$0xff] }
 0x1f7   : > { %2573 = vperm.xlu2 %3465, %v5358_v61   ;;  %v1954_v55 = vsel %vm5673_vm8, %v1951_v19, %v1948_v42  ;;  %3842 = vpow2.f32 %v1903_v23  ;;  %2569 = vperm.xlu1 %3464, %v5506_v5   ;;  %v5701_v40 = vpop.eup %3832  ;;  %3283 = vst [vmem:[%s4499_s11 + $0x1e0] sm:$0xff] %v2075_v49  ;;  %v1838_v61 = vmax.f32 %v5579_v36, %v5455_v2  ;;  %vm5718_vm10 = vcmp.lt.f32.partialorder %v2060_v21, 0.0004427343 }
 0x1f8   : > { %2695 = vperm.xlu0 %3467, %v4080_v22   ;;  %v2066_v18 = vadd.f32 %v1954_v55, %v1826_v28  ;;  %v1828_v10 = vmax.f32 %v5581_v14, %v5455_v2  ;;  %v3835_v52 = vpop.eup %3834  ;;  %v2017_v5 = vsel %vm5692_vm9, %v2014_v8, %v2011_v12  ;;  %v1964_v53 = vadd.f32 1.0, %v5701_v40 }
 0x1f9   : > { %v1967_v50 = vmul.f32 -0.5, %v5701_v40  ;;  %v2165_v0 = vsub.f32 %v5648_v11, %v5659_v45  ;;  %v3837_v28 = vpop.eup %3836  ;;  %v2073_v36 = vadd.f32 %v2017_v5, %v1833_v32  ;;  %v2036_v41 = vadd.f32 1.0, %v3835_v52 }
 0x1fa   : > { %3274 = vst [vmem:[%s4499_s11 + $0x198] sm:$0xff] %v2066_v18  ;;  %v2039_v60 = vmul.f32 -0.5, %v3835_v52  ;;  %v2042_v7 = vand.u32 2147483647, %v3835_v52  ;;  %3844 = vlog2.f32 %v1964_v53  ;;  %v1836_v56 = vmax.f32 %v5573_v54, %v5455_v2 }
 0x1fb   : > { %v3839_v47 = vpop.eup %3838  ;;  %3289 = vst [vmem:[%s4412_s10 + $0x210] sm:$0xff] %v3837_v28  ;;  %v1882_v30 = vsub.f32 0.0, %v1866_v59  ;;  %v2059_v11 = vmul.f32 %v3827_v58, %v2058_v39  ;;  %v1968_v13 = vadd.f32 1.0, %v1967_v50  ;;  %3846 = vlog2.f32 %v2036_v41 }
 0x1fc   : > { %v3841_v37 = vpop.eup %3840  ;;  %3281 = vst [vmem:[%s4499_s11 + $0x1d0] sm:$0xff] %v2073_v36  ;;  %v2040_v32 = vadd.f32 1.0, %v2039_v60  ;;  %3848 = vtanh.f32 %v2165_v0  ;;  %v2166_v3 = vsub.f32 %v5650_v16, %v5659_v45  ;;  %v1970_v46 = vand.u32 2147483647, %v5701_v40 }
 0x1fd   : > { %v5726_v27 = vpop.eup %3842  ;;  %v2056_v34 = vmul.f32 0.6931472, %v3841_v37  ;;  %3287 = vst [vmem:[%s4412_s10 + $0x200] sm:$0xff] %v3839_v47  ;;  %v1909_v1 = vmul.f32 1.442695, %v1882_v30  ;;  %v5731_v35 = vpop.permute.xlu0 %2141  ;;  %v1853_v16 = vsub.f32 %v5681_v26, %v5455_v2  ;;  %v2168_v8 = vsub.f32 %v5685_v29, %v5659_v45 }
 0x1fe   : > { %v2138_v19 = vpop.permute.xlu2 %2137  ;;  %vm5734_vm11 = vcmp.lt.f32.partialorder %v2042_v7, 0.0004427343  ;;  %v1991_v6 = vadd.f32 1.0, %v5726_v27  ;;  %v1994_v31 = vmul.f32 -0.5, %v5726_v27  ;;  %v2102_v43 = vpop.permute.xlu1 %2101  ;;  %v1969_v62 = vmul.f32 %v5701_v40, %v1968_v13 }
 0x1ff   : > { %2585 = vperm.xlu2 %3465, %v5398_v17   ;;  %v2062_v15 = vsel %vm5718_vm10, %v2059_v11, %v2056_v34  ;;  %3850 = vpow2.f32 %v1909_v1  ;;  %2581 = vperm.xlu1 %3464, %v4080_v22   ;;  %v2041_v42 = vmul.f32 %v3835_v52, %v2040_v32  ;;  %v1869_v23 = vand.u32 2147483647, %v1853_v16 }
 0x200   : > { %2707 = vperm.xlu0 %3467, %v4081_v20   ;;  %v2078_v25 = vadd.f32 %v2062_v15, %v1838_v61  ;;  %3852 = vlog2.f32 %v1991_v6  ;;  %v3845_v17 = vpop.eup %3844  ;;  %v2169_v48 = vsub.f32 %v5687_v44, %v5659_v45  ;;  %v2171_v49 = vsub.f32 %v2138_v19, %v5659_v45 }
 0x201   : > { %3854 = vtanh.f32 %v2166_v3  ;;  %v3847_v33 = vpop.eup %3846  ;;  %v1966_v29 = vmul.f32 0.6931472, %v3845_v17  ;;  %v1995_v21 = vadd.f32 1.0, %v1994_v31  ;;  %v2162_v55 = vsub.f32 %v2102_v43, %v5659_v45  ;;  %v5786_v3 = vld [vmem:[%s4390_s7 + $0x8] sm:$0xf] }
 0x202   : > { %3286 = vst [vmem:[%s4499_s11 + $0x1f8] sm:$0xff] %v2078_v25  ;;  %3856 = vtanh.f32 %v2168_v8  ;;  %v3849_v12 = vpop.eup %3848  ;;  %vm1971_vm12 = vcmp.lt.f32.partialorder %v1970_v46, 0.0004427343  ;;  %v2038_v59 = vmul.f32 0.6931472, %v3847_v33  ;;  %v1885_v22 = vsub.f32 0.0, %v1869_v23 }
 0x203   : > { %3858 = vtanh.f32 %v2169_v48  ;;  %v1972_v40 = vsel %vm1971_vm12, %v1969_v62, %v1966_v29  ;;  %v1997_v18 = vand.u32 2147483647, %v5726_v27  ;;  %3291 = vst [vmem:[%s4412_s10 + $0x220] sm:$0xff] %v3849_v12  ;;  %v2172_v44 = vsub.f32 %v5731_v35, %v5659_v45 }
 0x204   : > { %3860 = vtanh.f32 %v2171_v49  ;;  %v2068_v39 = vadd.f32 %v1972_v40, %v1828_v10  ;;  %v2044_v52 = vsel %vm5734_vm11, %v2041_v42, %v2038_v59  ;;  %v1915_v5 = vmul.f32 1.442695, %v1885_v22 }
 0x205   : > { %v5758_v61 = vpop.eup %3850  ;;  %3862 = vtanh.f32 %v2162_v55  ;;  %v2154_v50 = vpop.permute.xlu0 %2153  ;;  %v2076_v28 = vadd.f32 %v2044_v52, %v1836_v56  ;;  %v1996_v36 = vmul.f32 %v5726_v27, %v1995_v21  ;;  %vm1998_vm13 = vcmp.lt.f32.partialorder %v1997_v18, 0.0004427343 }
 0x206   : > { %v2150_v53 = vpop.permute.xlu2 %2149  ;;  %v3853_v0 = vpop.eup %3852  ;;  %v2018_v41 = vadd.f32 1.0, %v5758_v61  ;;  %v2021_v14 = vmul.f32 -0.5, %v5758_v61  ;;  %3276 = vst [vmem:[%s4499_s11 + $0x1a8] sm:$0xff] %v2068_v39  ;;  %3864 = vpow2.f32 %v1915_v5  ;;  %v2175_v30 = vsub.f32 %v2154_v50, %v5659_v45 }
 0x207   : > { %2597 = vperm.xlu2 %3465, %v5435_v51   ;;  %v2110_v10 = vpop.permute.xlu1 %2109  ;;  %v3855_v60 = vpop.eup %3854  ;;  %v1993_v7 = vmul.f32 0.6931472, %v3853_v0  ;;  %v2174_v47 = vsub.f32 %v2150_v53, %v5659_v45  ;;  %2593 = vperm.xlu1 %3464, %v4081_v20   ;;  %3284 = vst [vmem:[%s4499_s11 + $0x1e8] sm:$0xff] %v2076_v28  ;;  %v1831_v51 = vmax.f32 %v5604_v38, %v5455_v2  ;;  %v2024_v38 = vand.u32 2147483647, %v5758_v61  ;;  %v4084_v53 = vld [vmem:[%s4304_s30 + $0x10] sm:$0xff] }
 0x208   : > { %v2164_v54 = vsub.f32 %v2110_v10, %v5659_v45  ;;  %2719 = vperm.xlu0 %3467, %v4082_v63   ;;  %v3857_v56 = vpop.eup %3856  ;;  %3866 = vlog2.f32 %v2018_v41  ;;  %3292 = vst [vmem:[%s4412_s10 + $0x228] sm:$0xff] %v3855_v60  ;;  %v2022_v34 = vadd.f32 1.0, %v2021_v14  ;;  %v5789_v19 = vperm.slane %v5786_v3, 2 }
 0x209   : > { %v3859_v37 = vpop.eup %3858  ;;  %v1999_v11 = vsel %vm1998_vm13, %v1996_v36, %v1993_v7  ;;  %3868 = vtanh.f32 %v2172_v44  ;;  %3294 = vst [vmem:[%s4412_s10 + $0x238] sm:$0xff] %v3857_v56  ;;  %vm2025_vm14 = vcmp.lt.f32.partialorder %v2024_v38, 0.0004427343  ;;  %v1837_v0 = vmax.f32 %v5681_v26, %v5455_v2 }
 0x20a   : > { %v3861_v13 = vpop.eup %3860  ;;  %v2071_v32 = vadd.f32 %v1999_v11, %v1831_v51  ;;  %3870 = vtanh.f32 %v2174_v47  ;;  %3295 = vst [vmem:[%s4412_s10 + $0x240] sm:$0xff] %v3859_v37  ;;  %v2023_v16 = vmul.f32 %v5758_v61, %v2022_v34 }
 0x20b   : > { %v3863_v27 = vpop.eup %3862  ;;  %3872 = vtanh.f32 %v2164_v54  ;;  %3297 = vst [vmem:[%s4412_s10 + $0x250] sm:$0xff] %v3861_v13  ;;  %v4086_v13 = vld [vmem:[%s4304_s30 + $0x20] sm:$0xff] }
 0x20c   : > { %3279 = vst [vmem:[%s4499_s11 + $0x1c0] sm:$0xff] %v2071_v32  ;;  %3874 = vtanh.f32 %v2175_v30  ;;  %v3865_v1 = vpop.eup %3864 }
 0x20d   : > { %v2045_v46 = vadd.f32 1.0, %v3865_v1  ;;  %v2048_v58 = vmul.f32 -0.5, %v3865_v1  ;;  %3288 = vst [vmem:[%s4412_s10 + $0x208] sm:$0xff] %v3863_v27 }
 0x20e   : > { %v3867_v35 = vpop.eup %3866 }
 0x20f   : > { %2609 = vperm.xlu2 %3465, %v5462_v4   ;;  %v2122_v6 = vpop.permute.xlu1 %2121  ;;  %v5794_v31 = vpop.permute.xlu0 %2215  ;;  %v2020_v15 = vmul.f32 0.6931472, %v3867_v35  ;;  %2605 = vperm.xlu1 %3464, %v4082_v63   ;;  %v1834_v4 = vmax.f32 %v5644_v24, %v5455_v2  ;;  %3876 = vlog2.f32 %v2045_v46  ;;  %v2049_v29 = vadd.f32 1.0, %v2048_v58  ;;  %v4087_v58 = vld [vmem:[%s4304_s30 + $0x18] sm:$0xff] }
 0x210   : > { %v3869_v43 = vpop.eup %3868  ;;  %v2167_v8 = vsub.f32 %v2122_v6, %v5659_v45  ;;  %v2292_v20 = vsub.f32 %v5794_v31, %v5789_v19  ;;  %v5800_v25 = vpop.permute.xlu2 %2211  ;;  %v2051_v24 = vand.u32 2147483647, %v3865_v1 }
 0x211   : > { %v3871_v62 = vpop.eup %3870  ;;  %3298 = vst [vmem:[%s4412_s10 + $0x258] sm:$0xff] %v3869_v43  ;;  %v2026_v17 = vsel %vm2025_vm14, %v2023_v16, %v2020_v15  ;;  %v2291_v48 = vsub.f32 %v5800_v25, %v5789_v19  ;;  %v2050_v40 = vmul.f32 %v3865_v1, %v2049_v29 }
 0x212   : > { %v3873_v42 = vpop.eup %3872  ;;  %3300 = vst [vmem:[%s4412_s10 + $0x268] sm:$0xff] %v3871_v62  ;;  %3878 = vtanh.f32 %v2167_v8  ;;  %v2308_v23 = vand.u32 2147483647, %v2292_v20  ;;  %v2074_v33 = vadd.f32 %v2026_v17, %v1834_v4  ;;  %vm2052_vm15 = vcmp.lt.f32.partialorder %v2051_v24, 0.0004427343 }
 0x213   : > { %v3875_v49 = vpop.eup %3874  ;;  %3290 = vst [vmem:[%s4412_s10 + $0x218] sm:$0xff] %v3873_v42  ;;  %v2307_v55 = vand.u32 2147483647, %v2291_v48  ;;  %v2276_v17 = vmax.f32 %v5794_v31, %v5789_v19  ;;  %v2275_v48 = vmax.f32 %v5800_v25, %v5789_v19 }
 0x214   : > { %3301 = vst [vmem:[%s4412_s10 + $0x270] sm:$0xff] %v3875_v49  ;;  %v2324_v21 = vsub.f32 0.0, %v2308_v23 }
 0x215   : > { %3282 = vst [vmem:[%s4499_s11 + $0x1d8] sm:$0xff] %v2074_v33  ;;  %v2323_v59 = vsub.f32 0.0, %v2307_v55  ;;  %v3877_v22 = vpop.eup %3876 }
 0x216   : > { %v2341_v12 = vmul.f32 1.442695, %v2324_v21  ;;  %v2047_v39 = vmul.f32 0.6931472, %v3877_v22 }
 0x217   : > { %3469 = vset.pattern.permute.xlu2 %v4218_v9  ;;  %v2134_v18 = vpop.permute.xlu1 %2133  ;;  %v5812_v44 = vpop.permute.xlu0 %2235  ;;  %v2339_v52 = vmul.f32 1.442695, %v2323_v59  ;;  %3468 = vset.pattern.permute.xlu1 %v4218_v9  ;;  %v4085_v9 = vld [vmem:[%s4304_s30 + $0x8] sm:$0xff]  ;;  %v4088_v59 = vld [vmem:[%s4304_s30 + $0x38] sm:$0xff] }
 0x218   : > { %v3879_v61 = vpop.eup %3878  ;;  %3880 = vpow2.f32 %v2341_v12  ;;  %v2170_v5 = vsub.f32 %v2134_v18, %v5659_v45  ;;  %2671 = vperm.xlu2 %3469, %v4084_v53   ;;  %v5817_v50 = vpop.permute.xlu2 %2223  ;;  %v2297_v28 = vsub.f32 %v5812_v44, %v5789_v19  ;;  %v2053_v41 = vsel %vm2052_vm15, %v2050_v40, %v2047_v39  ;;  %2667 = vperm.xlu1 %3468, %v4085_v9   ;;  %v4089_v53 = vld [vmem:[%s4304_s30 + $0x30] sm:$0xff] }
 0x219   : > { %3293 = vst [vmem:[%s4412_s10 + $0x230] sm:$0xff] %v3879_v61  ;;  %v2294_v36 = vsub.f32 %v5817_v50, %v5789_v19  ;;  %3882 = vpow2.f32 %v2339_v52  ;;  %v2077_v14 = vadd.f32 %v2053_v41, %v1837_v0 }
 0x21a   : > { %3884 = vtanh.f32 %v2170_v5  ;;  %v2313_v10 = vand.u32 2147483647, %v2297_v28 }
 0x21b   : > { %v2310_v60 = vand.u32 2147483647, %v2294_v36  ;;  %3285 = vst [vmem:[%s4499_s11 + $0x1f0] sm:$0xff] %v2077_v14 }
 0x21c   : > { %v2329_v7 = vsub.f32 0.0, %v2313_v10 }
 0x21d   : > { %v2326_v2 = vsub.f32 0.0, %v2310_v60 }
 0x21e   : > { %v3881_v26 = vpop.eup %3880  ;;  %v2351_v63 = vmul.f32 1.442695, %v2329_v7 }
 0x21f   : > { %v2380_v47 = vadd.f32 1.0, %v3881_v26  ;;  %v2383_v54 = vmul.f32 -0.5, %v3881_v26  ;;  %v2146_v56 = vpop.permute.xlu1 %2145  ;;  %v5828_v51 = vpop.permute.xlu0 %2247  ;;  %v2345_v37 = vmul.f32 1.442695, %v2326_v2  ;;  %v2386_v6 = vand.u32 2147483647, %v3881_v26 }
 0x220   : > { %v3883_v30 = vpop.eup %3882  ;;  %v2300_v11 = vsub.f32 %v5828_v51, %v5789_v19  ;;  %2679 = vperm.xlu2 %3469, %v4086_v13   ;;  %v5833_v32 = vpop.permute.xlu2 %2231  ;;  %v2173_v38 = vsub.f32 %v2146_v56, %v5659_v45  ;;  %2675 = vperm.xlu1 %3468, %v4087_v58  }
 0x221   : > { %v3885_v27 = vpop.eup %3884  ;;  %3886 = vlog2.f32 %v2380_v47  ;;  %v2371_v34 = vadd.f32 1.0, %v3883_v30  ;;  %v2384_v1 = vadd.f32 1.0, %v2383_v54  ;;  %v2374_v35 = vmul.f32 -0.5, %v3883_v30 }
 0x222   : > { %3296 = vst [vmem:[%s4412_s10 + $0x248] sm:$0xff] %v3885_v27  ;;  %3888 = vpow2.f32 %v2351_v63  ;;  %v2316_v46 = vand.u32 2147483647, %v2300_v11  ;;  %v2296_v43 = vsub.f32 %v5833_v32, %v5789_v19  ;;  %v2377_v8 = vand.u32 2147483647, %v3883_v30 }
 0x223   : > { %3890 = vlog2.f32 %v2371_v34  ;;  %v2375_v15 = vadd.f32 1.0, %v2374_v35  ;;  %v2385_v62 = vmul.f32 %v3881_v26, %v2384_v1  ;;  %vm5842_vm0 = vcmp.lt.f32.partialorder %v2386_v6, 0.0004427343 }
 0x224   : > { %3892 = vpow2.f32 %v2345_v37  ;;  %v2332_v16 = vsub.f32 0.0, %v2316_v46  ;;  %v2312_v20 = vand.u32 2147483647, %v2296_v43  ;;  %vm5854_vm1 = vcmp.lt.f32.partialorder %v2377_v8, 0.0004427343 }
 0x225   : > { %3894 = vtanh.f32 %v2173_v38  ;;  %v2376_v24 = vmul.f32 %v3883_v30, %v2375_v15  ;;  %v2281_v26 = vmax.f32 %v5812_v44, %v5789_v19  ;;  %v2278_v47 = vmax.f32 %v5817_v50, %v5789_v19  ;;  %v4090_v50 = vld [vmem:[%s4304_s30 + $0x50] sm:$0xff] }
 0x226   : > { %v2357_v4 = vmul.f32 1.442695, %v2332_v16  ;;  %v2328_v49 = vsub.f32 0.0, %v2312_v20  ;;  %v2284_v16 = vmax.f32 %v5828_v51, %v5789_v19 }
 0x227   : > { %v3887_v42 = vpop.eup %3886  ;;  %v2158_v33 = vpop.permute.xlu1 %2157 }
 0x228   : > { %v5848_v29 = vpop.permute.xlu0 %2259  ;;  %v3889_v21 = vpop.eup %3888  ;;  %v2382_v55 = vmul.f32 0.6931472, %v3887_v42  ;;  %3896 = vpow2.f32 %v2357_v4  ;;  %v2176_v12 = vsub.f32 %v2158_v33, %v5659_v45  ;;  %2691 = vperm.xlu2 %3469, %v4088_v59   ;;  %v2349_v61 = vmul.f32 1.442695, %v2328_v49  ;;  %2687 = vperm.xlu1 %3468, %v4089_v53  }
 0x229   : > { %v5852_v31 = vpop.permute.xlu2 %2243  ;;  %v3891_v22 = vpop.eup %3890  ;;  %v2425_v25 = vadd.f32 1.0, %v3889_v21  ;;  %v2428_v18 = vmul.f32 -0.5, %v3889_v21  ;;  %v2303_v45 = vsub.f32 %v5848_v29, %v5789_v19  ;;  %v2431_v60 = vand.u32 2147483647, %v3889_v21 }
 0x22a   : > { %v3893_v39 = vpop.eup %3892  ;;  %v2388_v52 = vsel %vm5842_vm0, %v2385_v62, %v2382_v55  ;;  %v2373_v5 = vmul.f32 0.6931472, %v3891_v22  ;;  %3898 = vtanh.f32 %v2176_v12  ;;  %v2299_v38 = vsub.f32 %v5852_v31, %v5789_v19  ;;  %v4091_v62 = vld [vmem:[%s4304_s30 + $0x48] sm:$0xff] }
 0x22b   : > { %v3895_v0 = vpop.eup %3894  ;;  %v2516_v28 = vadd.f32 %v2388_v52, %v2276_v17  ;;  %3900 = vlog2.f32 %v2425_v25  ;;  %v2429_v41 = vadd.f32 1.0, %v2428_v18  ;;  %v2398_v9 = vadd.f32 1.0, %v3893_v39 }
 0x22c   : > { %v2379_v36 = vsel %vm5854_vm1, %v2376_v24, %v2373_v5  ;;  %v2401_v14 = vmul.f32 -0.5, %v3893_v39  ;;  %3299 = vst [vmem:[%s4412_s10 + $0x260] sm:$0xff] %v3895_v0  ;;  %3902 = vpow2.f32 %v2349_v61  ;;  %v2319_v7 = vand.u32 2147483647, %v2303_v45 }
 0x22d   : > { %3304 = vst [vmem:[%s4499_s11 + $0x208] sm:$0xff] %v2516_v28  ;;  %v2515_v10 = vadd.f32 %v2379_v36, %v2275_v48  ;;  %3904 = vlog2.f32 %v2398_v9  ;;  %v2404_v54 = vand.u32 2147483647, %v3893_v39  ;;  %v2430_v27 = vmul.f32 %v3889_v21, %v2429_v41  ;;  %v4092_v36 = vld [vmem:[%s4304_s30 + $0x68] sm:$0xff] }
 0x22e   : > { %v3897_v2 = vpop.eup %3896  ;;  %v2402_v63 = vadd.f32 1.0, %v2401_v14  ;;  %v2335_v37 = vsub.f32 0.0, %v2319_v7  ;;  %vm5883_vm2 = vcmp.lt.f32.partialorder %v2431_v60, 0.0004427343  ;;  %v2315_v8 = vand.u32 2147483647, %v2299_v38 }
 0x22f   : > { %3303 = vst [vmem:[%s4499_s11 + $0x200] sm:$0xff] %v2515_v10  ;;  %v2452_v56 = vadd.f32 1.0, %v3897_v2  ;;  %v2455_v30 = vmul.f32 -0.5, %v3897_v2  ;;  %v2458_v34 = vand.u32 2147483647, %v3897_v2  ;;  %v2280_v10 = vmax.f32 %v5833_v32, %v5789_v19 }
 0x230   : > { %v5872_v11 = vpop.permute.xlu0 %2271  ;;  %v3899_v13 = vpop.eup %3898  ;;  %2703 = vperm.xlu2 %3469, %v4090_v50   ;;  %v2363_v43 = vmul.f32 1.442695, %v2335_v37  ;;  %2699 = vperm.xlu1 %3468, %v4091_v62   ;;  %v2403_v42 = vmul.f32 %v3893_v39, %v2402_v63  ;;  %vm5891_vm3 = vcmp.lt.f32.partialorder %v2404_v54, 0.0004427343  ;;  %v2331_v12 = vsub.f32 0.0, %v2315_v8 }
 0x231   : > { %v2306_v44 = vsub.f32 %v5872_v11, %v5789_v19  ;;  %v5879_v1 = vpop.permute.xlu2 %2255  ;;  %v5881_v35 = vpop.permute.xlu1 %2219  ;;  %3906 = vlog2.f32 %v2452_v56  ;;  %v2456_v6 = vadd.f32 1.0, %v2455_v30  ;;  %3302 = vst [vmem:[%s4412_s10 + $0x278] sm:$0xff] %v3899_v13  ;;  %vm5899_vm4 = vcmp.lt.f32.partialorder %v2458_v34, 0.0004427343  ;;  %v4093_v56 = vld [vmem:[%s4304_s30 + $0x60] sm:$0xff] }
 0x232   : > { %v3901_v46 = vpop.eup %3900  ;;  %3908 = vpow2.f32 %v2363_v43  ;;  %v2302_v23 = vsub.f32 %v5879_v1, %v5789_v19  ;;  %v2355_v39 = vmul.f32 1.442695, %v2331_v12  ;;  %v2293_v5 = vsub.f32 %v5881_v35, %v5789_v19 }
 0x233   : > { %v2427_v15 = vmul.f32 0.6931472, %v3901_v46  ;;  %v2322_v20 = vand.u32 2147483647, %v2306_v44  ;;  %v3903_v4 = vpop.eup %3902  ;;  %v2457_v22 = vmul.f32 %v3897_v2, %v2456_v6  ;;  %v2287_v58 = vmax.f32 %v5848_v29, %v5789_v19 }
 0x234   : > { %v3905_v48 = vpop.eup %3904  ;;  %v2416_v33 = vadd.f32 1.0, %v3903_v4  ;;  %v2419_v21 = vmul.f32 -0.5, %v3903_v4  ;;  %v2318_v25 = vand.u32 2147483647, %v2302_v23  ;;  %v2422_v0 = vand.u32 2147483647, %v3903_v4 }
 0x235   : > { %v2433_v49 = vsel %vm5883_vm2, %v2430_v27, %v2427_v15  ;;  %v2400_v24 = vmul.f32 0.6931472, %v3905_v48  ;;  %v2338_v59 = vsub.f32 0.0, %v2322_v20  ;;  %v2309_v60 = vand.u32 2147483647, %v2293_v5 }
 0x236   : > { %v2521_v55 = vadd.f32 %v2433_v49, %v2281_v26  ;;  %3910 = vlog2.f32 %v2416_v33  ;;  %v2420_v40 = vadd.f32 1.0, %v2419_v21  ;;  %v2334_v28 = vsub.f32 0.0, %v2318_v25  ;;  %v4094_v25 = vld [vmem:[%s4304_s30 + $0x78] sm:$0xff]  ;;  %s4111_s30 = scalar_lea.hbm %s4110_s29, 768 }
 0x237   : > { %v3907_v18 = vpop.eup %3906  ;;  %v2406_v61 = vsel %vm5891_vm3, %v2403_v42, %v2400_v24  ;;  %v2369_v52 = vmul.f32 1.442695, %v2338_v59  ;;  %3912 = vpow2.f32 %v2355_v39  ;;  %v2325_v37 = vsub.f32 0.0, %v2309_v60  ;;  %p4112_p12 = scmp.ne.s32.totalorder %s4110_s29, %s4111_s30  ;;  %p4117_p2 = scmp.lt.s32.totalorder %s4115_s6, %s4111_s30 }
 0x238   : > { %3309 = vst [vmem:[%s4499_s11 + $0x230] sm:$0xff] %v2521_v55  ;;  %v2518_v45 = vadd.f32 %v2406_v61, %v2278_v47  ;;  %v2454_v53 = vmul.f32 0.6931472, %v3907_v18  ;;  %2715 = vperm.xlu2 %3469, %v4092_v36   ;;  %v3909_v14 = vpop.eup %3908  ;;  %v5917_v2 = vpop.permute.xlu0 %2557  ;;  %v2421_v47 = vmul.f32 %v3903_v4, %v2420_v40  ;;  %2711 = vperm.xlu1 %3468, %v4093_v56   ;;  %v2361_v32 = vmul.f32 1.442695, %v2334_v28 }
 0x239   : > { %v5909_v41 = vpop.permute.xlu2 %2267  ;;  %v5911_v9 = vpop.permute.xlu1 %2227  ;;  %v2479_v54 = vadd.f32 1.0, %v3909_v14  ;;  %v2482_v63 = vmul.f32 -0.5, %v3909_v14  ;;  %3914 = vpow2.f32 %v2369_v52  ;;  %vm5923_vm5 = vcmp.lt.f32.partialorder %v2422_v0, 0.0004427343  ;;  %p4113_p13 = pnand %p4112_p12, %p4281_p4  ;;  %p4118_p3 = por %p4117_p2, %p4116_p1 }
 0x23a   : > { %v2305_v7 = vsub.f32 %v5909_v41, %v5789_v19  ;;  %3306 = vst [vmem:[%s4499_s11 + $0x218] sm:$0xff] %v2518_v45  ;;  %v2460_v26 = vsel %vm5899_vm4, %v2457_v22, %v2454_v53  ;;  %v2485_v34 = vand.u32 2147483647, %v3909_v14  ;;  %v2343_v46 = vmul.f32 1.442695, %v2325_v37 }
 0x23b   : > { %v2524_v30 = vadd.f32 %v2460_v26, %v2284_v16  ;;  %3916 = vlog2.f32 %v2479_v54  ;;  %v2483_v50 = vadd.f32 1.0, %v2482_v63  ;;  %v2283_v6 = vmax.f32 %v5852_v31, %v5789_v19  ;;  %p4114_p0 = pneg %p4113_p13 }
 0x23c   : > { %v3911_v13 = vpop.eup %3910  ;;  %v2321_v38 = vand.u32 2147483647, %v2305_v7  ;;  %3918 = vpow2.f32 %v2361_v32  ;;  %v2295_v15 = vsub.f32 %v5911_v9, %v5789_v19  ;;  %v2290_v20 = vmax.f32 %v5872_v11, %v5789_v19 }
 0x23d   : > { %3312 = vst [vmem:[%s4499_s11 + $0x248] sm:$0xff] %v2524_v30  ;;  %v2418_v44 = vmul.f32 0.6931472, %v3911_v13  ;;  %v3913_v16 = vpop.eup %3912  ;;  %v2286_v62 = vmax.f32 %v5879_v1, %v5789_v19  ;;  %3920 = vpow2.f32 %v2343_v46  ;;  %v2277_v17 = vmax.f32 %v5881_v35, %v5789_v19  ;;  %p4119_p5 = pnand %p4118_p3, %p4114_p0 }
 0x23e   : > { %v2337_v43 = vsub.f32 0.0, %v2321_v38  ;;  %v2443_v4 = vadd.f32 1.0, %v3913_v16  ;;  %v2446_v42 = vmul.f32 -0.5, %v3913_v16  ;;  %v2484_v49 = vmul.f32 %v3909_v14, %v2483_v50 }
 0x23f   : > { %v2424_v8 = vsel %vm5923_vm5, %v2421_v47, %v2418_v44  ;;  %v3915_v48 = vpop.eup %3914  ;;  %vm5944_vm6 = vcmp.lt.f32.partialorder %v2485_v34, 0.0004427343  ;;  %v2289_v33 = vmax.f32 %v5909_v41, %v5789_v19  ;;  %v2449_v59 = vand.u32 2147483647, %v3913_v16 }
 0x240   : > { %v2520_v29 = vadd.f32 %v2424_v8, %v2280_v10  ;;  %v2367_v21 = vmul.f32 1.442695, %v2337_v43  ;;  %v5952_v24 = vpop.permute.xlu0 %2577  ;;  %3922 = vlog2.f32 %v2443_v4  ;;  %v2506_v22 = vadd.f32 1.0, %v3915_v48  ;;  %2723 = vperm.xlu1 %3468, %v4094_v25  }
 0x241   : > { %v5942_v23 = vpop.permute.xlu1 %2239  ;;  %v5950_v55 = vpop.permute.xlu2 %2553  ;;  %v2311_v40 = vand.u32 2147483647, %v2295_v15  ;;  %v2447_v39 = vadd.f32 1.0, %v2446_v42  ;;  %v2509_v52 = vmul.f32 -0.5, %v3915_v48  ;;  %v2512_v5 = vand.u32 2147483647, %v3915_v48 }
 0x242   : > { %v3917_v12 = vpop.eup %3916  ;;  %3308 = vst [vmem:[%s4499_s11 + $0x228] sm:$0xff] %v2520_v29  ;;  %3924 = vpow2.f32 %v2367_v21  ;;  %v2298_v10 = vsub.f32 %v5942_v23, %v5789_v19  ;;  %vm5960_vm7 = vcmp.lt.f32.partialorder %v2449_v59, 0.0004427343  ;;  %v5976_v46 = vperm.slane %v5656_v57, 5 }
 0x243   : > { %v3919_v18 = vpop.eup %3918  ;;  %v2481_v61 = vmul.f32 0.6931472, %v3917_v12  ;;  %3926 = vlog2.f32 %v2506_v22  ;;  %v2510_v36 = vadd.f32 1.0, %v2509_v52  ;;  %v2448_v47 = vmul.f32 %v3913_v16, %v2447_v39 }
 0x244   : > { %v2470_v45 = vadd.f32 1.0, %v3919_v18  ;;  %v2473_v53 = vmul.f32 -0.5, %v3919_v18  ;;  %v3921_v0 = vpop.eup %3920  ;;  %v2476_v14 = vand.u32 2147483647, %v3919_v18  ;;  %vm5965_vm8 = vcmp.lt.f32.partialorder %v2512_v5, 0.0004427343 }
 0x245   : > { %v2487_v28 = vsel %vm5944_vm6, %v2484_v49, %v2481_v61  ;;  %v2389_v26 = vadd.f32 1.0, %v3921_v0  ;;  %v2392_v63 = vmul.f32 -0.5, %v3921_v0  ;;  %v2395_v56 = vand.u32 2147483647, %v3921_v0 }
 0x246   : > { %v2527_v60 = vadd.f32 %v2487_v28, %v2287_v58  ;;  %3928 = vlog2.f32 %v2470_v45  ;;  %v2474_v7 = vadd.f32 1.0, %v2473_v53  ;;  %v3923_v30 = vpop.eup %3922  ;;  %v2511_v32 = vmul.f32 %v3915_v48, %v2510_v36 }
 0x247   : > { %3930 = vlog2.f32 %v2389_v26  ;;  %v2327_v13 = vsub.f32 0.0, %v2311_v40  ;;  %v2445_v38 = vmul.f32 0.6931472, %v3923_v30  ;;  %vm5971_vm9 = vcmp.lt.f32.partialorder %v2476_v14, 0.0004427343 }
 0x248   : > { %3315 = vst [vmem:[%s4499_s11 + $0x260] sm:$0xff] %v2527_v60  ;;  %v3925_v34 = vpop.eup %3924  ;;  %v2393_v50 = vadd.f32 1.0, %v2392_v63  ;;  %v2590_v43 = vpop.permute.xlu0 %2589  ;;  %v2475_v16 = vmul.f32 %v3919_v18, %v2474_v7  ;;  %vm5980_vm10 = vcmp.lt.f32.partialorder %v2395_v56, 0.0004427343  ;;  %v2615_v57 = vsub.f32 %v5917_v2, %v5976_v46 }
 0x249   : > { %v5969_v27 = vpop.permute.xlu1 %2251  ;;  %v2566_v58 = vpop.permute.xlu2 %2565  ;;  %v2497_v8 = vadd.f32 1.0, %v3925_v34  ;;  %v2500_v29 = vmul.f32 -0.5, %v3925_v34  ;;  %v2347_v4 = vmul.f32 1.442695, %v2327_v13  ;;  %v2451_v42 = vsel %vm5960_vm7, %v2448_v47, %v2445_v38 }
 0x24a   : > { %v3927_v15 = vpop.eup %3926  ;;  %v2523_v21 = vadd.f32 %v2451_v42, %v2283_v6  ;;  %v2394_v12 = vmul.f32 %v3921_v0, %v2393_v50  ;;  %v2503_v59 = vand.u32 2147483647, %v3925_v34  ;;  %v2314_v25 = vand.u32 2147483647, %v2298_v10 }
 0x24b   : > { %v2508_v48 = vmul.f32 0.6931472, %v3927_v15  ;;  %3932 = vlog2.f32 %v2497_v8  ;;  %v2501_v61 = vadd.f32 1.0, %v2500_v29  ;;  %v2614_v31 = vsub.f32 %v5950_v55, %v5976_v46 }
 0x24c   : > { %v3929_v51 = vpop.eup %3928  ;;  %3934 = vpow2.f32 %v2347_v4  ;;  %3311 = vst [vmem:[%s4499_s11 + $0x240] sm:$0xff] %v2523_v21  ;;  %v2330_v52 = vsub.f32 0.0, %v2314_v25  ;;  %v2620_v5 = vsub.f32 %v5952_v24, %v5976_v46  ;;  %v2617_v55 = vsub.f32 %v2566_v58, %v5976_v46 }
 0x24d   : > { %v2514_v22 = vsel %vm5965_vm8, %v2511_v32, %v2508_v48  ;;  %v2472_v40 = vmul.f32 0.6931472, %v3929_v51  ;;  %v3931_v18 = vpop.eup %3930  ;;  %3936 = vtanh.f32 %v2615_v57  ;;  %v2623_v24 = vsub.f32 %v2590_v43, %v5976_v46 }
 0x24e   : > { %v2530_v2 = vadd.f32 %v2514_v22, %v2290_v20  ;;  %v2391_v39 = vmul.f32 0.6931472, %v3931_v18  ;;  %3938 = vtanh.f32 %v2614_v31  ;;  %v2301_v20 = vsub.f32 %v5969_v27, %v5789_v19 }
 0x24f   : > { %v2478_v6 = vsel %vm5971_vm9, %v2475_v16, %v2472_v40  ;;  %v2353_v0 = vmul.f32 1.442695, %v2330_v52  ;;  %3940 = vtanh.f32 %v2620_v5  ;;  %v2502_v14 = vmul.f32 %v3925_v34, %v2501_v61 }
 0x250   : > { %3318 = vst [vmem:[%s4499_s11 + $0x278] sm:$0xff] %v2530_v2  ;;  %v2526_v11 = vadd.f32 %v2478_v6, %v2286_v62  ;;  %v2397_v53 = vsel %vm5980_vm10, %v2394_v12, %v2391_v39  ;;  %v2602_v36 = vpop.permute.xlu0 %2601  ;;  %v2317_v10 = vand.u32 2147483647, %v2301_v20  ;;  %3942 = vtanh.f32 %v2617_v55 }
 0x251   : > { %v6008_v45 = vpop.permute.xlu1 %2263  ;;  %v2574_v28 = vpop.permute.xlu2 %2573  ;;  %v2517_v62 = vadd.f32 %v2397_v53, %v2277_v17  ;;  %3944 = vpow2.f32 %v2353_v0  ;;  %vm2504_vm11 = vcmp.lt.f32.partialorder %v2503_v59, 0.0004427343  ;;  %v2626_v32 = vsub.f32 %v2602_v36, %v5976_v46 }
 0x252   : > { %v3933_v1 = vpop.eup %3932  ;;  %3314 = vst [vmem:[%s4499_s11 + $0x258] sm:$0xff] %v2526_v11  ;;  %v2304_v26 = vsub.f32 %v6008_v45, %v5789_v19  ;;  %v2619_v47 = vsub.f32 %v2574_v28, %v5976_v46  ;;  %v2333_v35 = vsub.f32 0.0, %v2317_v10  ;;  %3946 = vtanh.f32 %v2623_v24 }
 0x253   : > { %v3935_v60 = vpop.eup %3934  ;;  %v2499_v7 = vmul.f32 0.6931472, %v3933_v1  ;;  %3305 = vst [vmem:[%s4499_s11 + $0x210] sm:$0xff] %v2517_v62  ;;  %v6027_v38 = vperm.slane %v5786_v3, 3  ;;  %v2279_v25 = vmax.f32 %v5911_v9, %v5789_v19  ;;  %v2282_v9 = vmax.f32 %v5942_v23, %v5789_v19 }
 0x254   : > { %v3937_v54 = vpop.eup %3936  ;;  %v2407_v63 = vadd.f32 1.0, %v3935_v60  ;;  %v2410_v56 = vmul.f32 -0.5, %v3935_v60  ;;  %v2320_v30 = vand.u32 2147483647, %v2304_v26  ;;  %v2359_v44 = vmul.f32 1.442695, %v2333_v35 }
 0x255   : > { %v2505_v17 = vsel %vm2504_vm11, %v2502_v14, %v2499_v7  ;;  %3321 = vst [vmem:[%s4412_s10 + $0x290] sm:$0xff] %v3937_v54  ;;  %v3939_v37 = vpop.eup %3938  ;;  %v2413_v16 = vand.u32 2147483647, %v3935_v60 }
 0x256   : > { %v2529_v13 = vadd.f32 %v2505_v17, %v2289_v33  ;;  %3948 = vlog2.f32 %v2407_v63  ;;  %v3941_v34 = vpop.eup %3940  ;;  %3320 = vst [vmem:[%s4412_s10 + $0x288] sm:$0xff] %v3939_v37  ;;  %v2336_v50 = vsub.f32 0.0, %v2320_v30  ;;  %v2411_v15 = vadd.f32 1.0, %v2410_v56 }
 0x257   : > { %3950 = vtanh.f32 %v2619_v47  ;;  %v3943_v58 = vpop.eup %3942  ;;  %3326 = vst [vmem:[%s4412_s10 + $0x2b8] sm:$0xff] %v3941_v34  ;;  %vm2414_vm12 = vcmp.lt.f32.partialorder %v2413_v16, 0.0004427343  ;;  %v2285_v37 = vmax.f32 %v5969_v27, %v5789_v19 }
 0x258   : > { %3317 = vst [vmem:[%s4499_s11 + $0x270] sm:$0xff] %v2529_v13  ;;  %3952 = vtanh.f32 %v2626_v32  ;;  %v3945_v43 = vpop.eup %3944  ;;  %v2365_v41 = vmul.f32 1.442695, %v2336_v50  ;;  %v2412_v59 = vmul.f32 %v3935_v60, %v2411_v15 }
 0x259   : > { %3954 = vpow2.f32 %v2359_v44  ;;  %v2586_v33 = vpop.permute.xlu2 %2585  ;;  %v2434_v8 = vadd.f32 1.0, %v3945_v43  ;;  %3323 = vst [vmem:[%s4412_s10 + $0x2a0] sm:$0xff] %v3943_v58  ;;  %v2550_v29 = vpop.permute.xlu1 %2549  ;;  %v2437_v48 = vmul.f32 -0.5, %v3945_v43  ;;  %v2440_v39 = vand.u32 2147483647, %v3945_v43 }
 0x25a   : > { %v2622_v3 = vsub.f32 %v2586_v33, %v5976_v46  ;;  %v6034_v4 = vpop.permute.xlu0 %2663  ;;  %v3947_v42 = vpop.eup %3946  ;;  %3956 = vpow2.f32 %v2365_v41  ;;  %v2613_v49 = vsub.f32 %v2550_v29, %v5976_v46 }
 0x25b   : > { %v2743_v57 = vsub.f32 %v6034_v4, %v6027_v38  ;;  %3958 = vlog2.f32 %v2434_v8  ;;  %3329 = vst [vmem:[%s4412_s10 + $0x2d0] sm:$0xff] %v3947_v42  ;;  %v2438_v61 = vadd.f32 1.0, %v2437_v48  ;;  %vm2441_vm13 = vcmp.lt.f32.partialorder %v2440_v39, 0.0004427343 }
 0x25c   : > { %v3949_v51 = vpop.eup %3948  ;;  %3960 = vtanh.f32 %v2622_v3 }
 0x25d   : > { %v3951_v21 = vpop.eup %3950  ;;  %v2409_v12 = vmul.f32 0.6931472, %v3949_v51  ;;  %v2759_v22 = vand.u32 2147483647, %v2743_v57  ;;  %3962 = vtanh.f32 %v2613_v49  ;;  %v2439_v62 = vmul.f32 %v3945_v43, %v2438_v61 }
 0x25e   : > { %v3953_v40 = vpop.eup %3952  ;;  %3325 = vst [vmem:[%s4412_s10 + $0x2b0] sm:$0xff] %v3951_v21  ;;  %v2288_v49 = vmax.f32 %v6008_v45, %v5789_v19 }
 0x25f   : > { %v3955_v18 = vpop.eup %3954  ;;  %v2415_v2 = vsel %vm2414_vm12, %v2412_v59, %v2409_v12  ;;  %3332 = vst [vmem:[%s4412_s10 + $0x2e8] sm:$0xff] %v3953_v40  ;;  %v2775_v31 = vsub.f32 0.0, %v2759_v22 }
 0x260   : > { %v2519_v6 = vadd.f32 %v2415_v2, %v2279_v25  ;;  %v2461_v52 = vadd.f32 1.0, %v3955_v18  ;;  %v3957_v5 = vpop.eup %3956  ;;  %v2464_v11 = vmul.f32 -0.5, %v3955_v18  ;;  %v2467_v47 = vand.u32 2147483647, %v3955_v18 }
 0x261   : > { %v2791_v20 = vmul.f32 1.442695, %v2775_v31  ;;  %v2598_v55 = vpop.permute.xlu2 %2597  ;;  %v3959_v53 = vpop.eup %3958  ;;  %v2488_v0 = vadd.f32 1.0, %v3957_v5  ;;  %v2491_v14 = vmul.f32 -0.5, %v3957_v5  ;;  %v2494_v17 = vand.u32 2147483647, %v3957_v5 }
 0x262   : > { %3307 = vst [vmem:[%s4499_s11 + $0x220] sm:$0xff] %v2519_v6  ;;  %3964 = vlog2.f32 %v2461_v52  ;;  %v2562_v24 = vpop.permute.xlu1 %2561  ;;  %v6047_v28 = vpop.permute.xlu0 %2683  ;;  %v2436_v1 = vmul.f32 0.6931472, %v3959_v53  ;;  %v2625_v60 = vsub.f32 %v2598_v55, %v5976_v46  ;;  %v2465_v26 = vadd.f32 1.0, %v2464_v11 }
 0x263   : > { %v3961_v36 = vpop.eup %3960  ;;  %3966 = vpow2.f32 %v2791_v20  ;;  %v2616_v23 = vsub.f32 %v2562_v24, %v5976_v46  ;;  %v2492_v63 = vadd.f32 1.0, %v2491_v14  ;;  %v2748_v56 = vsub.f32 %v6047_v28, %v6027_v38 }
 0x264   : > { %v3963_v10 = vpop.eup %3962  ;;  %3968 = vlog2.f32 %v2488_v0  ;;  %3328 = vst [vmem:[%s4412_s10 + $0x2c8] sm:$0xff] %v3961_v36  ;;  %v2442_v7 = vsel %vm2441_vm13, %v2439_v62, %v2436_v1  ;;  %v2466_v34 = vmul.f32 %v3955_v18, %v2465_v26  ;;  %vm2468_vm14 = vcmp.lt.f32.partialorder %v2467_v47, 0.0004427343 }
 0x265   : > { %3319 = vst [vmem:[%s4412_s10 + $0x280] sm:$0xff] %v3963_v10  ;;  %v2522_v54 = vadd.f32 %v2442_v7, %v2282_v9  ;;  %3970 = vtanh.f32 %v2625_v60  ;;  %v2764_v30 = vand.u32 2147483647, %v2748_v56  ;;  %v2493_v58 = vmul.f32 %v3957_v5, %v2492_v63 }
 0x266   : > { %3972 = vtanh.f32 %v2616_v23  ;;  %vm2495_vm15 = vcmp.lt.f32.partialorder %v2494_v17, 0.0004427343  ;;  %v2727_v18 = vmax.f32 %v6034_v4, %v6027_v38 }
 0x267   : > { %3310 = vst [vmem:[%s4499_s11 + $0x238] sm:$0xff] %v2522_v54  ;;  %v2780_v41 = vsub.f32 0.0, %v2764_v30 }
 0x268   : > { %v3965_v35 = vpop.eup %3964 }
 0x269   : > { %v3967_v32 = vpop.eup %3966  ;;  %v2463_v13 = vmul.f32 0.6931472, %v3965_v35  ;;  %v2610_v44 = vpop.permute.xlu2 %2609  ;;  %v2801_v12 = vmul.f32 1.442695, %v2780_v41 }
 0x26a   : > { %v3969_v50 = vpop.eup %3968  ;;  %v2823_v43 = vadd.f32 1.0, %v3967_v32  ;;  %v2826_v15 = vmul.f32 -0.5, %v3967_v32  ;;  %v2570_v33 = vpop.permute.xlu1 %2569  ;;  %v2628_v29 = vsub.f32 %v2610_v44, %v5976_v46  ;;  %v2829_v22 = vand.u32 2147483647, %v3967_v32 }
 0x26b   : > { %v6058_v16 = vpop.permute.xlu0 %2695  ;;  %v2469_v8 = vsel %vm2468_vm14, %v2466_v34, %v2463_v13  ;;  %v2490_v3 = vmul.f32 0.6931472, %v3969_v50  ;;  %v2618_v27 = vsub.f32 %v2570_v33, %v5976_v46  ;;  %v3971_v42 = vpop.eup %3970  ;;  %v2732_v13 = vmax.f32 %v6047_v28, %v6027_v38 }
 0x26c   : > { %v2525_v48 = vadd.f32 %v2469_v8, %v2285_v37  ;;  %3974 = vlog2.f32 %v2823_v43  ;;  %v3973_v57 = vpop.eup %3972  ;;  %v2827_v21 = vadd.f32 1.0, %v2826_v15  ;;  %3331 = vst [vmem:[%s4412_s10 + $0x2e0] sm:$0xff] %v3971_v42  ;;  %v2751_v40 = vsub.f32 %v6058_v16, %v6027_v38 }
 0x26d   : > { %v2496_v51 = vsel %vm2495_vm15, %v2493_v58, %v2490_v3  ;;  %3976 = vtanh.f32 %v2628_v29  ;;  %3322 = vst [vmem:[%s4412_s10 + $0x298] sm:$0xff] %v3973_v57  ;;  %vm6072_vm0 = vcmp.lt.f32.partialorder %v2829_v22, 0.0004427343 }
 0x26e   : > { %3313 = vst [vmem:[%s4499_s11 + $0x250] sm:$0xff] %v2525_v48  ;;  %v2528_v59 = vadd.f32 %v2496_v51, %v2288_v49  ;;  %3978 = vtanh.f32 %v2618_v27  ;;  %v2767_v19 = vand.u32 2147483647, %v2751_v40  ;;  %v2828_v45 = vmul.f32 %v3967_v32, %v2827_v21 }
 0x26f   : > { %3980 = vpow2.f32 %v2801_v12 }
 0x270   : > { %3316 = vst [vmem:[%s4499_s11 + $0x268] sm:$0xff] %v2528_v59  ;;  %v2783_v61 = vsub.f32 0.0, %v2767_v19 }
 0x272   : > { %v3975_v25 = vpop.eup %3974  ;;  %v2582_v31 = vpop.permute.xlu1 %2581  ;;  %v2807_v55 = vmul.f32 1.442695, %v2783_v61 }
 0x273   : > { %v6076_v6 = vpop.permute.xlu0 %2707  ;;  %v3977_v39 = vpop.eup %3976  ;;  %v2825_v52 = vmul.f32 0.6931472, %v3975_v25  ;;  %v2621_v5 = vsub.f32 %v2582_v31, %v5976_v46  ;;  %v2735_v25 = vmax.f32 %v6058_v16, %v6027_v38 }
 0x274   : > { %v2754_v11 = vsub.f32 %v6076_v6, %v6027_v38  ;;  %v6081_v20 = vpop.permute.xlu2 %2671  ;;  %v3979_v4 = vpop.eup %3978  ;;  %3334 = vst [vmem:[%s4412_s10 + $0x2f8] sm:$0xff] %v3977_v39 }
 0x275   : > { %v2745_v53 = vsub.f32 %v6081_v20, %v6027_v38  ;;  %v3981_v9 = vpop.eup %3980  ;;  %v2831_v0 = vsel %vm6072_vm0, %v2828_v45, %v2825_v52  ;;  %3324 = vst [vmem:[%s4412_s10 + $0x2a8] sm:$0xff] %v3979_v4  ;;  %3982 = vtanh.f32 %v2621_v5 }
 0x276   : > { %v2770_v24 = vand.u32 2147483647, %v2754_v11  ;;  %v2967_v36 = vadd.f32 %v2831_v0, %v2727_v18  ;;  %v2868_v1 = vadd.f32 1.0, %v3981_v9  ;;  %v2871_v62 = vmul.f32 -0.5, %v3981_v9 }
 0x277   : > { %3984 = vpow2.f32 %v2807_v55  ;;  %v2761_v10 = vand.u32 2147483647, %v2745_v53  ;;  %v2874_v26 = vand.u32 2147483647, %v3981_v9 }
 0x278   : > { %v2786_v14 = vsub.f32 0.0, %v2770_v24  ;;  %3335 = vst [vmem:[%s4499_s11 + $0x280] sm:$0xff] %v2967_v36  ;;  %3986 = vlog2.f32 %v2868_v1  ;;  %v2872_v60 = vadd.f32 1.0, %v2871_v62 }
 0x279   : > { %v2777_v7 = vsub.f32 0.0, %v2761_v10  ;;  %vm2875_vm1 = vcmp.lt.f32.partialorder %v2874_v26, 0.0004427343 }
 0x27a   : > { %v2813_v23 = vmul.f32 1.442695, %v2786_v14  ;;  %v2594_v47 = vpop.permute.xlu1 %2593  ;;  %v2873_v34 = vmul.f32 %v3981_v9, %v2872_v60  ;;  %v2738_v9 = vmax.f32 %v6076_v6, %v6027_v38  ;;  %v2729_v60 = vmax.f32 %v6081_v20, %v6027_v38 }
 0x27b   : > { %v6090_v54 = vpop.permute.xlu0 %2719  ;;  %v3983_v63 = vpop.eup %3982  ;;  %v2795_v56 = vmul.f32 1.442695, %v2777_v7  ;;  %v2624_v35 = vsub.f32 %v2594_v47, %v5976_v46 }
 0x27c   : > { %3988 = vpow2.f32 %v2813_v23  ;;  %v6093_v17 = vpop.permute.xlu2 %2679  ;;  %3327 = vst [vmem:[%s4412_s10 + $0x2c0] sm:$0xff] %v3983_v63  ;;  %v2757_v30 = vsub.f32 %v6090_v54, %v6027_v38 }
 0x27d   : > { %v2747_v32 = vsub.f32 %v6093_v17, %v6027_v38  ;;  %v3985_v37 = vpop.eup %3984  ;;  %3990 = vpow2.f32 %v2795_v56 }
 0x27e   : > { %v3987_v44 = vpop.eup %3986  ;;  %v2895_v50 = vadd.f32 1.0, %v3985_v37  ;;  %v2898_v58 = vmul.f32 -0.5, %v3985_v37  ;;  %3992 = vtanh.f32 %v2624_v35  ;;  %v2773_v15 = vand.u32 2147483647, %v2757_v30 }
 0x27f   : > { %v2870_v43 = vmul.f32 0.6931472, %v3987_v44  ;;  %v2763_v41 = vand.u32 2147483647, %v2747_v32  ;;  %v2901_v28 = vand.u32 2147483647, %v3985_v37 }
 0x280   : > { %3994 = vlog2.f32 %v2895_v50  ;;  %v2899_v3 = vadd.f32 1.0, %v2898_v58  ;;  %v2789_v29 = vsub.f32 0.0, %v2773_v15 }
 0x281   : > { %v2876_v8 = vsel %vm2875_vm1, %v2873_v34, %v2870_v43  ;;  %v2779_v27 = vsub.f32 0.0, %v2763_v41  ;;  %vm2902_vm2 = vcmp.lt.f32.partialorder %v2901_v28, 0.0004427343 }
 0x282   : > { %v3989_v33 = vpop.eup %3988  ;;  %v2972_v42 = vadd.f32 %v2876_v8, %v2732_v13  ;;  %v2606_v57 = vpop.permute.xlu1 %2605  ;;  %v2819_v21 = vmul.f32 1.442695, %v2789_v29  ;;  %v2900_v18 = vmul.f32 %v3985_v37, %v2899_v3 }
 0x283   : > { %v2922_v48 = vadd.f32 1.0, %v3989_v33  ;;  %v2925_v49 = vmul.f32 -0.5, %v3989_v33  ;;  %v3991_v51 = vpop.eup %3990  ;;  %v2799_v12 = vmul.f32 1.442695, %v2779_v27  ;;  %v2627_v45 = vsub.f32 %v2606_v57, %v5976_v46 }
 0x284   : > { %v6102_v59 = vpop.permute.xlu2 %2691  ;;  %v3993_v22 = vpop.eup %3992  ;;  %3340 = vst [vmem:[%s4499_s11 + $0x2a8] sm:$0xff] %v2972_v42  ;;  %v2841_v40 = vadd.f32 1.0, %v3991_v51  ;;  %v2844_v19 = vmul.f32 -0.5, %v3991_v51  ;;  %v2928_v31 = vand.u32 2147483647, %v3989_v33 }
 0x285   : > { %3996 = vlog2.f32 %v2922_v48  ;;  %v2926_v2 = vadd.f32 1.0, %v2925_v49  ;;  %3330 = vst [vmem:[%s4412_s10 + $0x2d8] sm:$0xff] %v3993_v22  ;;  %v2750_v39 = vsub.f32 %v6102_v59, %v6027_v38  ;;  %v2847_v46 = vand.u32 2147483647, %v3991_v51 }
 0x286   : > { %3998 = vpow2.f32 %v2819_v21  ;;  %v3995_v61 = vpop.eup %3994  ;;  %v2845_v5 = vadd.f32 1.0, %v2844_v19  ;;  %vm6121_vm3 = vcmp.lt.f32.partialorder %v2928_v31, 0.0004427343 }
 0x287   : > { %4000 = vlog2.f32 %v2841_v40  ;;  %v2897_v52 = vmul.f32 0.6931472, %v3995_v61  ;;  %v2766_v11 = vand.u32 2147483647, %v2750_v39  ;;  %v2927_v4 = vmul.f32 %v3989_v33, %v2926_v2 }
 0x288   : > { %4002 = vpow2.f32 %v2799_v12  ;;  %v2846_v62 = vmul.f32 %v3991_v51, %v2845_v5  ;;  %vm6132_vm4 = vcmp.lt.f32.partialorder %v2847_v46, 0.0004427343 }
 0x289   : > { %4004 = vtanh.f32 %v2627_v45  ;;  %v2903_v16 = vsel %vm2902_vm2, %v2900_v18, %v2897_v52  ;;  %v2782_v24 = vsub.f32 0.0, %v2766_v11 }
 0x28a   : > { %v2975_v53 = vadd.f32 %v2903_v16, %v2735_v25  ;;  %v6136_v26 = vpop.permute.xlu1 %2667 }
 0x28b   : > { %v3997_v55 = vpop.eup %3996  ;;  %v2805_v35 = vmul.f32 1.442695, %v2782_v24 }
 0x28c   : > { %v3999_v36 = vpop.eup %3998  ;;  %v2924_v1 = vmul.f32 0.6931472, %v3997_v55  ;;  %v6126_v14 = vpop.permute.xlu2 %2703  ;;  %3343 = vst [vmem:[%s4499_s11 + $0x2c0] sm:$0xff] %v2975_v53 }
 0x28d   : > { %v4001_v10 = vpop.eup %4000  ;;  %v2949_v6 = vadd.f32 1.0, %v3999_v36  ;;  %v2952_v7 = vmul.f32 -0.5, %v3999_v36  ;;  %v2753_v30 = vsub.f32 %v6126_v14, %v6027_v38  ;;  %v2955_v58 = vand.u32 2147483647, %v3999_v36 }
 0x28e   : > { %v4003_v47 = vpop.eup %4002  ;;  %v2930_v63 = vsel %vm6121_vm3, %v2927_v4, %v2924_v1  ;;  %v2843_v56 = vmul.f32 0.6931472, %v4001_v10 }
 0x28f   : > { %v4005_v20 = vpop.eup %4004  ;;  %v2978_v32 = vadd.f32 %v2930_v63, %v2738_v9  ;;  %4006 = vlog2.f32 %v2949_v6  ;;  %v2953_v13 = vadd.f32 1.0, %v2952_v7  ;;  %v2859_v34 = vadd.f32 1.0, %v4003_v47 }
 0x290   : > { %v2849_v37 = vsel %vm6132_vm4, %v2846_v62, %v2843_v56  ;;  %v2862_v44 = vmul.f32 -0.5, %v4003_v47  ;;  %3333 = vst [vmem:[%s4412_s10 + $0x2f0] sm:$0xff] %v4005_v20  ;;  %4008 = vpow2.f32 %v2805_v35  ;;  %v2769_v43 = vand.u32 2147483647, %v2753_v30 }
 0x291   : > { %3346 = vst [vmem:[%s4499_s11 + $0x2d8] sm:$0xff] %v2978_v32  ;;  %v2969_v50 = vadd.f32 %v2849_v37, %v2729_v60  ;;  %4010 = vlog2.f32 %v2859_v34 }
 0x292   : > { %4122 = shalt.err (!%p4119_p5)
}
 0x293   : > { %s4219_s10 = smov 128   ;;  %s4220_s19 = smov 8   ;;  %3337 = vst [vmem:[%s4499_s11 + $0x290] sm:$0xff] %v2969_v50  ;;  %v2863_v15 = vadd.f32 1.0, %v2862_v44  ;;  %v2785_v41 = vsub.f32 0.0, %v2769_v43  ;;  %v2744_v33 = vsub.f32 %v6136_v26, %v6027_v38  ;;  %v2741_v8 = vmax.f32 %v6090_v54, %v6027_v38  ;;  %v6180_v51 = vpop.permute.xlu1 %2675 }
 0x294   : > { %3360 = dma.vmem_to_hbm [thread:$0]  (%p4281_p4), %s6142_s26, 12288, %s6144_s27, %s3001_s28, %s4219_s10, %s4219_s10, %s4220_s19   ;;  %v2954_v3 = vmul.f32 %v3999_v36, %v2953_v13  ;;  %v2865_v29 = vand.u32 2147483647, %v4003_v47  ;;  %v6172_v27 = vpop.permute.xlu2 %2715  ;;  %vm6174_vm5 = vcmp.lt.f32.partialorder %v2955_v58, 0.0004427343  ;;  %v2731_v54 = vmax.f32 %v6093_v17, %v6027_v38 }
 0x295   : > { %v4007_v42 = vpop.eup %4006  ;;  %v2811_v48 = vmul.f32 1.442695, %v2785_v41  ;;  %v2760_v49 = vand.u32 2147483647, %v2744_v33  ;;  %v2756_v57 = vsub.f32 %v6172_v27, %v6027_v38  ;;  %v2746_v12 = vsub.f32 %v6180_v51, %v6027_v38  ;;  %s3040_s26 = scalar_lea.hbm %s6274_s3, %s3358_s18  ;;  %s3041_s27 = sshll.u32 %s4499_s11, 4  ;;  %s3042_s27 = int_to_ptr.vmem [resolvable:$true] %s3041_s27 }
 0x296   : > { %v2951_v21 = vmul.f32 0.6931472, %v4007_v42  ;;  %v4009_v22 = vpop.eup %4008  ;;  %v2864_v40 = vmul.f32 %v4003_v47, %v2863_v15  ;;  %vm2866_vm6 = vcmp.lt.f32.partialorder %v2865_v29, 0.0004427343  ;;  %v2734_v63 = vmax.f32 %v6102_v59, %v6027_v38  ;;  %s3043_s28 = sshll.u32 %s3040_s26, 4  ;;  %s3006_s29 = scalar_lea.sflag [#allocation5], %s4403_s8  ;;  %s3044_s28 = int_to_ptr.hbm [resolvable:$true] %s3043_s28 }
 0x297   : > { %4012 = vpow2.f32 %v2811_v48  ;;  %v2776_v19 = vsub.f32 0.0, %v2760_v49  ;;  %v2772_v45 = vand.u32 2147483647, %v2756_v57  ;;  %v4011_v25 = vpop.eup %4010  ;;  %v2886_v2 = vadd.f32 1.0, %v4009_v22  ;;  %s4137_s15 = sshra.s32 %s3044_s28, 4  ;;  %s4143_s5 = scalar_lea.hbm %s6274_s3, 1536  ;;  %s4138_s15 = int_to_ptr.hbm [resolvable:$true] %s4137_s15 }
 0x298   : > { %v2957_v18 = vsel %vm6174_vm5, %v2954_v3, %v2951_v21  ;;  %v2889_v61 = vmul.f32 -0.5, %v4009_v22  ;;  %v2861_v39 = vmul.f32 0.6931472, %v4011_v25  ;;  %v2762_v5 = vand.u32 2147483647, %v2746_v12  ;;  %s4139_s30 = scalar_lea.hbm %s4138_s15, 768  ;;  %p4144_p10 = scmp.lt.s32.totalorder %s4138_s15, %s6274_s3 }
 0x299   : > { %v2981_v31 = vadd.f32 %v2957_v18, %v2741_v8  ;;  %v2793_v17 = vmul.f32 1.442695, %v2776_v19  ;;  %v2788_v52 = vsub.f32 0.0, %v2772_v45  ;;  %4014 = vlog2.f32 %v2886_v2  ;;  %p4140_p6 = scmp.ne.s32.totalorder %s4138_s15, %s4139_s30  ;;  %p4145_p11 = scmp.lt.s32.totalorder %s4143_s5, %s4139_s30 }
 0x29a   : > { %v2867_v46 = vsel %vm2866_vm6, %v2864_v40, %v2861_v39  ;;  %v2890_v11 = vadd.f32 1.0, %v2889_v61  ;;  %v2892_v55 = vand.u32 2147483647, %v4009_v22  ;;  %v2778_v53 = vsub.f32 0.0, %v2762_v5 }
 0x29b   : > { %3349 = vst [vmem:[%s4499_s11 + $0x2f0] sm:$0xff] %v2981_v31  ;;  %4016 = vpow2.f32 %v2793_v17  ;;  %v2817_v16 = vmul.f32 1.442695, %v2788_v52  ;;  %v2971_v4 = vadd.f32 %v2867_v46, %v2731_v54  ;;  %v6189_v0 = vpop.permute.xlu1 %2687  ;;  %v2737_v3 = vmax.f32 %v6126_v14, %v6027_v38  ;;  %p4141_p7 = pnand %p4140_p6, %p4281_p4  ;;  %p4146_p12 = por %p4145_p11, %p4144_p10 }
 0x29c   : > { %v2891_v1 = vmul.f32 %v4009_v22, %v2890_v11  ;;  %v2797_v62 = vmul.f32 1.442695, %v2778_v53  ;;  %v2749_v10 = vsub.f32 %v6189_v0, %v6027_v38  ;;  %vm2893_vm7 = vcmp.lt.f32.partialorder %v2892_v55, 0.0004427343 }
 0x29d   : > { %v4013_v9 = vpop.eup %4012  ;;  %4018 = vpow2.f32 %v2817_v16  ;;  %3339 = vst [vmem:[%s4499_s11 + $0x2a0] sm:$0xff] %v2971_v4  ;;  %v2728_v45 = vmax.f32 %v6136_v26, %v6027_v38  ;;  %v2740_v11 = vmax.f32 %v6172_v27, %v6027_v38  ;;  %p4142_p9 = pneg %p4141_p7 }
 0x29e   : > { %v2913_v24 = vadd.f32 1.0, %v4013_v9  ;;  %v2916_v36 = vmul.f32 -0.5, %v4013_v9  ;;  %v2765_v47 = vand.u32 2147483647, %v2749_v10  ;;  %v2919_v56 = vand.u32 2147483647, %v4013_v9 }
 0x29f   : > { %v4015_v60 = vpop.eup %4014  ;;  %p4147_p13 = pnand %p4146_p12, %p4142_p9 }
 0x2a0   : > { %4020 = vlog2.f32 %v2913_v24  ;;  %v2888_v6 = vmul.f32 0.6931472, %v4015_v60  ;;  %v2917_v7 = vadd.f32 1.0, %v2916_v36  ;;  %v2781_v37 = vsub.f32 0.0, %v2765_v47 }
 0x2a1   : > { %v4017_v23 = vpop.eup %4016  ;;  %4022 = vpow2.f32 %v2797_v62  ;;  %vm2920_vm8 = vcmp.lt.f32.partialorder %v2919_v56, 0.0004427343 }
 0x2a2   : > { %v2832_v35 = vadd.f32 1.0, %v4017_v23  ;;  %v2894_v20 = vsel %vm2893_vm7, %v2891_v1, %v2888_v6  ;;  %v2835_v32 = vmul.f32 -0.5, %v4017_v23  ;;  %v2918_v34 = vmul.f32 %v4013_v9, %v2917_v7 }
 0x2a3   : > { %v4019_v30 = vpop.eup %4018  ;;  %v2974_v13 = vadd.f32 %v2894_v20, %v2734_v63  ;;  %v2803_v50 = vmul.f32 1.442695, %v2781_v37  ;;  %v6196_v58 = vpop.permute.xlu1 %2699  ;;  %v2838_v29 = vand.u32 2147483647, %v4017_v23  ;;  %v2730_v1 = vmax.f32 %v6180_v51, %v6027_v38 }
 0x2a4   : > { %4024 = vlog2.f32 %v2832_v35  ;;  %v2940_v44 = vadd.f32 1.0, %v4019_v30  ;;  %v2943_v15 = vmul.f32 -0.5, %v4019_v30  ;;  %v2752_v59 = vsub.f32 %v6196_v58, %v6027_v38 }
 0x2a5   : > { %3342 = vst [vmem:[%s4499_s11 + $0x2b8] sm:$0xff] %v2974_v13  ;;  %v2836_v8 = vadd.f32 1.0, %v2835_v32  ;;  %v2946_v40 = vand.u32 2147483647, %v4019_v30  ;;  %vm2839_vm9 = vcmp.lt.f32.partialorder %v2838_v29, 0.0004427343  ;;  %v2733_v32 = vmax.f32 %v6189_v0, %v6027_v38 }
 0x2a6   : > { %v4021_v43 = vpop.eup %4020  ;;  %4026 = vlog2.f32 %v2940_v44  ;;  %v2768_v49 = vand.u32 2147483647, %v2752_v59  ;;  %v2944_v54 = vadd.f32 1.0, %v2943_v15  ;;  %v2736_v0 = vmax.f32 %v6196_v58, %v6027_v38 }
 0x2a7   : > { %v4023_v41 = vpop.eup %4022  ;;  %v2915_v33 = vmul.f32 0.6931472, %v4021_v43  ;;  %4028 = vpow2.f32 %v2803_v50  ;;  %v2837_v22 = vmul.f32 %v4017_v23, %v2836_v8  ;;  %vm2947_vm10 = vcmp.lt.f32.partialorder %v2946_v40, 0.0004427343 }
 0x2a8   : > { %v2850_v42 = vadd.f32 1.0, %v4023_v41  ;;  %v2853_v48 = vmul.f32 -0.5, %v4023_v41  ;;  %v2784_v19 = vsub.f32 0.0, %v2768_v49  ;;  %v2856_v2 = vand.u32 2147483647, %v4023_v41 }
 0x2a9   : > { %v2921_v28 = vsel %vm2920_vm8, %v2918_v34, %v2915_v33  ;;  %v2945_v5 = vmul.f32 %v4019_v30, %v2944_v54 }
 0x2aa   : > { %v4025_v57 = vpop.eup %4024  ;;  %v2977_v21 = vadd.f32 %v2921_v28, %v2737_v3  ;;  %4030 = vlog2.f32 %v2850_v42  ;;  %v2854_v18 = vadd.f32 1.0, %v2853_v48  ;;  %v2809_v61 = vmul.f32 1.442695, %v2784_v19 }
 0x2ab   : > { %v2834_v12 = vmul.f32 0.6931472, %v4025_v57  ;;  %v6206_v31 = vpop.permute.xlu1 %2711  ;;  %vm2857_vm11 = vcmp.lt.f32.partialorder %v2856_v2, 0.0004427343 }
 0x2ac   : > { %3345 = vst [vmem:[%s4499_s11 + $0x2d0] sm:$0xff] %v2977_v21  ;;  %v4027_v14 = vpop.eup %4026  ;;  %v2755_v46 = vsub.f32 %v6206_v31, %v6027_v38  ;;  %4032 = vpow2.f32 %v2809_v61  ;;  %v2855_v36 = vmul.f32 %v4023_v41, %v2854_v18 }
 0x2ad   : > { %v2840_v25 = vsel %vm2839_vm9, %v2837_v22, %v2834_v12  ;;  %v4029_v39 = vpop.eup %4028  ;;  %v2942_v52 = vmul.f32 0.6931472, %v4027_v14  ;;  %v2739_v22 = vmax.f32 %v6206_v31, %v6027_v38 }
 0x2ae   : > { %v2968_v17 = vadd.f32 %v2840_v25, %v2728_v45  ;;  %v2877_v26 = vadd.f32 1.0, %v4029_v39  ;;  %v2880_v55 = vmul.f32 -0.5, %v4029_v39  ;;  %v2771_v53 = vand.u32 2147483647, %v2755_v46 }
 0x2af   : > { %v2948_v4 = vsel %vm2947_vm10, %v2945_v5, %v2942_v52  ;;  %v2883_v7 = vand.u32 2147483647, %v4029_v39 }
 0x2b0   : > { %v4031_v16 = vpop.eup %4030  ;;  %3336 = vst [vmem:[%s4499_s11 + $0x288] sm:$0xff] %v2968_v17  ;;  %v2980_v9 = vadd.f32 %v2948_v4, %v2740_v11  ;;  %4034 = vlog2.f32 %v2877_v26  ;;  %v2787_v62 = vsub.f32 0.0, %v2771_v53  ;;  %v2881_v60 = vadd.f32 1.0, %v2880_v55 }
 0x2b1   : > { %v2852_v24 = vmul.f32 0.6931472, %v4031_v16  ;;  %vm2884_vm12 = vcmp.lt.f32.partialorder %v2883_v7, 0.0004427343 }
 0x2b2   : > { %3348 = vst [vmem:[%s4499_s11 + $0x2e8] sm:$0xff] %v2980_v9  ;;  %v2815_v23 = vmul.f32 1.442695, %v2787_v62  ;;  %v4033_v6 = vpop.eup %4032  ;;  %v2882_v51 = vmul.f32 %v4029_v39, %v2881_v60 }
 0x2b3   : > { %v2858_v27 = vsel %vm2857_vm11, %v2855_v36, %v2852_v24  ;;  %v2724_v47 = vpop.permute.xlu1 %2723  ;;  %v2904_v63 = vadd.f32 1.0, %v4033_v6  ;;  %v2907_v35 = vmul.f32 -0.5, %v4033_v6  ;;  %v2910_v15 = vand.u32 2147483647, %v4033_v6 }
 0x2b4   : > { %v2970_v10 = vadd.f32 %v2858_v27, %v2730_v1  ;;  %4036 = vpow2.f32 %v2815_v23  ;;  %v2758_v30 = vsub.f32 %v2724_v47, %v6027_v38  ;;  %v2742_v31 = vmax.f32 %v2724_v47, %v6027_v38 }
 0x2b5   : > { %4038 = vlog2.f32 %v2904_v63  ;;  %v2908_v44 = vadd.f32 1.0, %v2907_v35  ;;  %vm2911_vm13 = vcmp.lt.f32.partialorder %v2910_v15, 0.0004427343 }
 0x2b6   : > { %3338 = vst [vmem:[%s4499_s11 + $0x298] sm:$0xff] %v2970_v10  ;;  %v4035_v56 = vpop.eup %4034  ;;  %v2774_v37 = vand.u32 2147483647, %v2758_v30 }
 0x2b7   : > { %v2879_v20 = vmul.f32 0.6931472, %v4035_v56  ;;  %v2909_v29 = vmul.f32 %v4033_v6, %v2908_v44 }
 0x2b8   : > { %v2790_v50 = vsub.f32 0.0, %v2774_v37 }
 0x2b9   : > { %v2885_v13 = vsel %vm2884_vm12, %v2882_v51, %v2879_v20 }
 0x2ba   : > { %v2973_v34 = vadd.f32 %v2885_v13, %v2733_v32  ;;  %v4037_v43 = vpop.eup %4036  ;;  %v2821_v8 = vmul.f32 1.442695, %v2790_v50 }
 0x2bb   : > { %v2931_v59 = vadd.f32 1.0, %v4037_v43  ;;  %v4039_v41 = vpop.eup %4038  ;;  %v2934_v33 = vmul.f32 -0.5, %v4037_v43  ;;  %v2937_v49 = vand.u32 2147483647, %v4037_v43 }
 0x2bc   : > { %3341 = vst [vmem:[%s4499_s11 + $0x2b0] sm:$0xff] %v2973_v34  ;;  %v2906_v3 = vmul.f32 0.6931472, %v4039_v41 }
 0x2bd   : > { %4040 = vlog2.f32 %v2931_v59  ;;  %v2935_v48 = vadd.f32 1.0, %v2934_v33  ;;  %vm2938_vm14 = vcmp.lt.f32.partialorder %v2937_v49, 0.0004427343 }
 0x2be   : > { %4042 = vpow2.f32 %v2821_v8  ;;  %v2912_v42 = vsel %vm2911_vm13, %v2909_v29, %v2906_v3 }
 0x2bf   : > { %v2976_v28 = vadd.f32 %v2912_v42, %v2736_v0  ;;  %v2936_v12 = vmul.f32 %v4037_v43, %v2935_v48 }
 0x2c1   : > { %3344 = vst [vmem:[%s4499_s11 + $0x2c8] sm:$0xff] %v2976_v28 }
 0x2c3   : > { %v4041_v57 = vpop.eup %4040 }
 0x2c4   : > { %v4043_v21 = vpop.eup %4042  ;;  %v2933_v54 = vmul.f32 0.6931472, %v4041_v57 }
 0x2c5   : > { %v2958_v40 = vadd.f32 1.0, %v4043_v21  ;;  %v2961_v19 = vmul.f32 -0.5, %v4043_v21  ;;  %v2964_v25 = vand.u32 2147483647, %v4043_v21 }
 0x2c6   : > { %v2939_v58 = vsel %vm2938_vm14, %v2936_v12, %v2933_v54 }
 0x2c7   : > { %v2979_v45 = vadd.f32 %v2939_v58, %v2739_v22  ;;  %4044 = vlog2.f32 %v2958_v40  ;;  %v2962_v14 = vadd.f32 1.0, %v2961_v19  ;;  %vm2965_vm15 = vcmp.lt.f32.partialorder %v2964_v25, 0.0004427343 }
 0x2c9   : > { %3347 = vst [vmem:[%s4499_s11 + $0x2e0] sm:$0xff] %v2979_v45  ;;  %v2963_v61 = vmul.f32 %v4043_v21, %v2962_v14 }
 0x2cd   : > { %v4045_v18 = vpop.eup %4044 }
 0x2ce   : > { %v2960_v2 = vmul.f32 0.6931472, %v4045_v18 }
 0x2d0   : > { %v2966_v39 = vsel %vm2965_vm15, %v2963_v61, %v2960_v2 }
 0x2d1   : > { %v2982_v17 = vadd.f32 %v2966_v39, %v2742_v31 }
 0x2d3   : > { %3350 = vst [vmem:[%s4499_s11 + $0x2f8] sm:$0xff] %v2982_v17 }
 0x2d4   : > { %4150 = shalt.err (!%p4147_p13)
}
 0x2d5   : > { %3361 = dma.vmem_to_hbm [thread:$0]  (%p4281_p4), %s3042_s27, 12288, %s3044_s28, %s3006_s29, %s4219_s10, %s4219_s10, %s4220_s19  }
 0x2d6 PF: > { %p3371_p0 = scmp.ge.s32.totalorder %s4205_s17, 2  ;;  %s3058_s8 = sand.u32 1, %s4185_s12  }
 0x2d7   : > { %s3059_s11 = scalar_lea.sflag [#allocation3], %s3058_s8 }
 0x2d8   : > { %p3365_p1 = pnand %p3371_p0, %p4288_p8 }
 0x2da   : > { %p3366_p2 = pneg %p3365_p1 }
 0x2dc   : > { %4176 = dma.done.wait (%p3366_p2), %s3059_s11, 12288  }
 0x2dd   : > { %4178 = vsyncadd (%p3366_p2), %s3059_s11, 4294955008  ;;  %s3069_s9 = scalar_lea.sflag [#allocation5], %s3058_s8 }
 0x2de   : > { %4180 = dma.done.wait (%p3366_p2), %s3069_s9, 12288  }
 0x2df   : > { %4182 = vsyncadd (%p3366_p2), %s3069_s9, 4294955008  ;;  %s20_s17 = sadd.s32 1, %s4205_s17   ;;  %s6401_s12 = smov %s4189_s13 }
 0x2e0   : > { %p17_p3 = scmp.ge.s32.totalorder %s20_s17, 4   ;;  %s6402_s13 = smov %s4193_s14 }
 0x2e1   : > { %s6403_s14 = smov %s4294_s25  ;;  %s6404_s15 = smov %s4201_s16 }
 0x2e2   : > { %s6405_s16 = smov %s6407_s20  ;;  %19 = sbr.rel (!%p17_p3) target bundleno = 6 (0x6), region = 93 }
 0x2e7   :  { %3075 = vsyncpa [#allocation3], 1 }
 0x2e8   :  { %3077 = vsyncpa [#allocation3 + $0x1], 1 }
 0x2e9   :  { %3078 = vsyncpa [#allocation5], 1 }
 0x2ea   :  { %3080 = vsyncpa [#allocation5 + $0x1], 1 }

</bundles_post_ra>
